<compile_context>
chip_gen: v7x
topology: tpu7x:2x2x1
jax: 0.10.0
libtpu: 0.0.40
codegen_flags: <defaults>
</compile_context>

<pallas_src>
import functools

import jax
import jax.numpy as jnp
import numpy as np
from jax.experimental import pallas as pl
from jax.experimental.pallas import tpu as pltpu

_EPS = 1e-5


# ------------------------------ Pallas kernel ------------------------------

def _make_block_kernel(Mo, PAD, Cout, conv1_taps, conv2_taps, has_sc_conv):
    """Fused residual-block kernel; one image per grid step.

    conv*_taps: tuple of (row_offset, mask_code) with mask_code in {None,'l','r'}.
    """

    def kernel(*refs):
        if has_sc_conv:
            (x_ref, w1_ref, w2_ref, ws_ref, b1_ref, b2_ref, bs_ref,
             ml_ref, mr_ref, o_ref, h_scr) = refs
        else:
            (x_ref, w1_ref, w2_ref, b1_ref, b2_ref,
             ml_ref, mr_ref, o_ref, h_scr) = refs
            ws_ref = bs_ref = None

        def shifted_conv(load_slab, w_ref, taps):
            # sum_t mask_t * (slab_t @ W_t), f32 accumulation, bf16 MXU operands.
            acc = jnp.zeros((Mo, Cout), jnp.float32)
            for t, (off, mcode) in enumerate(taps):
                slab = load_slab(off).astype(jnp.bfloat16)          # (Mo, K)
                r = jnp.dot(slab, w_ref[t], preferred_element_type=jnp.float32)
                if mcode == "l":
                    r = r * ml_ref[...]
                elif mcode == "r":
                    r = r * mr_ref[...]
                acc = acc + r
            return acc

        # ---- conv1 + BN1 + ReLU -> halo-padded VMEM scratch ----
        acc1 = shifted_conv(lambda off: x_ref[0, pl.ds(PAD + off, Mo), :],
                            w1_ref, conv1_taps)
        h = jnp.maximum(acc1 + b1_ref[...], 0.0)
        h_scr[...] = jnp.zeros_like(h_scr)          # zero halos (and interior)
        h_scr[pl.ds(PAD, Mo), :] = h

        # ---- conv2 + BN2 ----
        acc2 = shifted_conv(lambda off: h_scr[pl.ds(PAD + off, Mo), :],
                            w2_ref, conv2_taps)
        out = acc2 + b2_ref[...]

        # ---- shortcut (identity, or 1x1 conv with BN scale folded into ws) ----
        res_in = x_ref[0, pl.ds(PAD, Mo), :]
        if has_sc_conv:
            out = out + jnp.dot(res_in.astype(jnp.bfloat16), ws_ref[...],
                                preferred_element_type=jnp.float32) + bs_ref[...]
        else:
            out = out + res_in.astype(jnp.float32)

        o_ref[0, :, :] = jnp.maximum(out, 0.0).astype(o_ref.dtype)

    return kernel


def _residual_block_call(x1, w1, w2, ws, b1, b2, bs, mask_l, mask_r,
                         Mo, PAD, Cout, conv1_taps, conv2_taps):
    N, L, K1 = x1.shape
    has_sc_conv = ws is not None
    kernel = _make_block_kernel(Mo, PAD, Cout, conv1_taps, conv2_taps, has_sc_conv)

    in_specs = [pl.BlockSpec((1, L, K1), lambda n: (n, 0, 0)),
                pl.BlockSpec(w1.shape, lambda n: (0, 0, 0)),
                pl.BlockSpec(w2.shape, lambda n: (0, 0, 0))]
    args = [x1, w1, w2]
    if has_sc_conv:
        in_specs.append(pl.BlockSpec(ws.shape, lambda n: (0, 0)))
        args.append(ws)
    in_specs += [pl.BlockSpec((1, Cout), lambda n: (0, 0)),
                 pl.BlockSpec((1, Cout), lambda n: (0, 0))]
    args += [b1, b2]
    if has_sc_conv:
        in_specs.append(pl.BlockSpec((1, Cout), lambda n: (0, 0)))
        args.append(bs)
    in_specs += [pl.BlockSpec((Mo, 1), lambda n: (0, 0)),
                 pl.BlockSpec((Mo, 1), lambda n: (0, 0))]
    args += [mask_l, mask_r]

    return pl.pallas_call(
        kernel,
        out_shape=jax.ShapeDtypeStruct((N, Mo, Cout), jnp.float32),
        grid=(N,),
        in_specs=in_specs,
        out_specs=pl.BlockSpec((1, Mo, Cout), lambda n: (n, 0, 0)),
        scratch_shapes=[pltpu.VMEM((2 * PAD + Mo, Cout), jnp.float32)],
        compiler_params=pltpu.CompilerParams(dimension_semantics=("parallel",)),
    )(*args)


# ------------------------------ trace-time prep ------------------------------

def _fold_bn(gamma, beta, mean, var):
    scale = gamma / jnp.sqrt(var + _EPS)
    bias = beta - mean * scale
    return scale, bias


def _prep_conv3x3(w_oihw, scale, stride, Wo):
    """Fold BN scale into an OIHW 3x3 weight and regroup it into per-shift
    matrices for the shifted-matmul conv.  Returns (w_stack [T,K,Cout] bf16,
    taps tuple of (row_offset, mask_code))."""
    cout, cin = w_oihw.shape[0], w_oihw.shape[1]
    w = jnp.transpose(w_oihw, (2, 3, 1, 0)) * scale[None, None, None, :]  # (3,3,Cin,Cout)
    mats, taps = [], []
    if stride == 1:
        for kh in range(3):
            for kw in range(3):
                dh, dw = kh - 1, kw - 1
                mats.append(w[kh, kw])
                taps.append((dh * Wo + dw,
                             "l" if dw == -1 else ("r" if dw == 1 else None)))
    else:  # stride 2: group the 9 taps by their shift in the space-to-depth layout
        order = ((0, 0), (0, -1), (-1, 0), (-1, -1))
        grouped = {g: jnp.zeros((4 * cin, cout), w.dtype) for g in order}
        for kh in range(3):
            for kw in range(3):
                dh, dw = kh - 1, kw - 1
                p, sh = dh % 2, (dh - dh % 2) // 2
                q, sw = dw % 2, (dw - dw % 2) // 2
                ph = p * 2 + q
                grouped[(sh, sw)] = grouped[(sh, sw)].at[
                    ph * cin:(ph + 1) * cin, :].set(w[kh, kw])
        for sh, sw in order:
            mats.append(grouped[(sh, sw)])
            taps.append((sh * Wo + sw, "l" if sw == -1 else None))
    return jnp.stack(mats).astype(jnp.bfloat16), tuple(taps)


@functools.partial(jax.jit, static_argnums=(2,))
def residual_block_pallas(x_nchw, params, stride):
    """Forward pass of the ResidualBlock; input/output are NCHW float32."""
    assert stride in (1, 2)
    N, Cin, H, W = x_nchw.shape
    Cout = params["w1"].shape[0]
    assert H % stride == 0 and W % stride == 0
    Ho, Wo = H // stride, W // stride
    Mo = Ho * Wo
    PAD = Wo + 1                      # halo rows (covers a +-1 row/col shift)

    s1, b1 = _fold_bn(**params["bn1"])
    s2, b2 = _fold_bn(**params["bn2"])

    x = jnp.transpose(x_nchw, (0, 2, 3, 1))                      # NHWC
    if stride == 1:
        x1 = x.reshape(N, H * W, Cin)
    else:
        # space-to-depth: strided conv becomes a stride-1 conv with 4 shifts
        x1 = (x.reshape(N, Ho, stride, Wo, stride, Cin)
               .transpose(0, 1, 3, 2, 4, 5)
               .reshape(N, Mo, stride * stride * Cin))
    x1 = jnp.pad(x1, ((0, 0), (PAD, PAD), (0, 0))).astype(jnp.float32)

    w1_stack, conv1_taps = _prep_conv3x3(params["w1"], s1, stride, Wo)
    w2_stack, conv2_taps = _prep_conv3x3(params["w2"], s2, 1, Wo)

    has_sc_conv = (stride != 1) or (Cin != Cout)
    if has_sc_conv:
        ss, bs = _fold_bn(**params["bns"])
        ws = params["ws"][:, :, 0, 0].T * ss[None, :]            # (Cin, Cout)
        if stride != 1:
            # 1x1 stride-2 conv only reads space-to-depth phase (0, 0)
            ws = jnp.concatenate(
                [ws, jnp.zeros(((stride * stride - 1) * Cin, Cout), ws.dtype)],
                axis=0)
        ws = ws.astype(jnp.bfloat16)
        bs = bs.reshape(1, Cout).astype(jnp.float32)
    else:
        ws = None
        bs = None

    ow = jnp.arange(Mo, dtype=jnp.int32) % Wo
    mask_l = (ow != 0).astype(jnp.float32).reshape(Mo, 1)        # left-column taps
    mask_r = (ow != Wo - 1).astype(jnp.float32).reshape(Mo, 1)   # right-column taps

    out = _residual_block_call(
        x1, w1_stack, w2_stack, ws,
        b1.reshape(1, Cout).astype(jnp.float32),
        b2.reshape(1, Cout).astype(jnp.float32),
        bs, mask_l, mask_r, Mo, PAD, Cout, conv1_taps, conv2_taps)

    out = out.reshape(N, Ho, Wo, Cout)
    return jnp.transpose(out, (0, 3, 1, 2))                      # NHWC -> NCHW


# ------------------------------ params & reference ------------------------------

def init_params(key, inchannel, outchannel, stride):
    ks = jax.random.split(key, 16)

    def bn(k0, k1, k2, k3, c):
        return dict(
            gamma=jax.random.uniform(k0, (c,), jnp.float32, 0.5, 1.5),
            beta=jax.random.normal(k1, (c,), jnp.float32) * 0.1,
            mean=jax.random.normal(k2, (c,), jnp.float32) * 0.1,
            var=jax.random.uniform(k3, (c,), jnp.float32, 0.5, 1.5),
        )

    p = dict(
        w1=jax.random.normal(ks[0], (outchannel, inchannel, 3, 3), jnp.float32) * 0.1,
        bn1=bn(ks[1], ks[2], ks[3], ks[4], outchannel),
        w2=jax.random.normal(ks[5], (outchannel, outchannel, 3, 3), jnp.float32) * 0.1,
        bn2=bn(ks[6], ks[7], ks[8], ks[9], outchannel),
    )
    if stride != 1 or inchannel != outchannel:
        p["ws"] = jax.random.normal(ks[10], (outchannel, inchannel, 1, 1), jnp.float32) * 0.1
        p["bns"] = bn(ks[11], ks[12], ks[13], ks[14], outchannel)
    return p


def _ref_conv(x, w, stride, pad):
    return jax.lax.conv_general_dilated(
        x, w, (stride, stride), [(pad, pad), (pad, pad)],
        dimension_numbers=("NCHW", "OIHW", "NCHW"))


def _ref_bn(x, bn):
    s, b = _fold_bn(**bn)
    return x * s[None, :, None, None] + b[None, :, None, None]


def residual_block_ref(x, params, stride):
    inchannel = x.shape[1]
    outchannel = params["w1"].shape[0]
    out = jax.nn.relu(_ref_bn(_ref_conv(x, params["w1"], stride, 1), params["bn1"]))
    out = _ref_bn(_ref_conv(out, params["w2"], 1, 1), params["bn2"])
    if stride != 1 or inchannel != outchannel:
        sc = _ref_bn(_ref_conv(x, params["ws"], stride, 0), params["bns"])
    else:
        sc = x
    return jax.nn.relu(out + sc)


# ------------------------------------ main ------------------------------------

if __name__ == "__main__":
    key = jax.random.PRNGKey(0)

    configs = [
        # (inchannel, outchannel, stride)
        (4, 8, 1),   # conv shortcut (channel change)
        (4, 8, 2),   # conv shortcut, strided
        (4, 4, 1),   # identity shortcut
    ]

    for inchannel, outchannel, stride in configs:
        kx, kp, key = jax.random.split(key, 3)
        x = jax.random.normal(kx, (2, inchannel, 16, 16), jnp.float32)  # NCHW
        params = init_params(kp, inchannel, outchannel, stride)

        out = jax.block_until_ready(residual_block_pallas(x, params, stride))
        ref = jax.block_until_ready(residual_block_ref(x, params, stride))

        # bf16 MXU operands -> looser tolerance than the pure-f32 version.
        np.testing.assert_allclose(np.asarray(out), np.asarray(ref),
                                   rtol=5e-2, atol=5e-2)

    print("KERNEL_OK")
</pallas_src>

<mosaic_0001>
module attributes {stable_mosaic.version = 11 : i64} {
  func.func @kernel(%arg0: i32, %arg1: memref<1x290x4xf32, #tpu.memory_space<vmem>>, %arg2: memref<9x4x8xbf16, #tpu.memory_space<vmem>>, %arg3: memref<9x8x8xbf16, #tpu.memory_space<vmem>>, %arg4: memref<4x8xbf16, #tpu.memory_space<vmem>>, %arg5: memref<1x8xf32, #tpu.memory_space<vmem>>, %arg6: memref<1x8xf32, #tpu.memory_space<vmem>>, %arg7: memref<1x8xf32, #tpu.memory_space<vmem>>, %arg8: memref<256x1xf32, #tpu.memory_space<vmem>>, %arg9: memref<256x1xf32, #tpu.memory_space<vmem>>, %arg10: memref<1x256x8xf32, #tpu.memory_space<vmem>>, %arg11: memref<290x8xf32, #tpu.memory_space<vmem>>) attributes {dimension_semantics = [#tpu.dimension_semantics<parallel>], iteration_bounds = array<i64: 2>, scalar_prefetch = 0 : i64, scratch_operands = 1 : i64, tpu.core_type = #tpu.core_type<tc>, window_params = [{transform_indices = @transform_0, window_bounds = array<i64: 1, 290, 4>}, {pipeline_mode = #tpu.pipeline_mode<synchronous>, transform_indices = @transform_1, window_bounds = array<i64: 9, 4, 8>}, {pipeline_mode = #tpu.pipeline_mode<synchronous>, transform_indices = @transform_2, window_bounds = array<i64: 9, 8, 8>}, {pipeline_mode = #tpu.pipeline_mode<synchronous>, transform_indices = @transform_3, window_bounds = array<i64: 4, 8>}, {pipeline_mode = #tpu.pipeline_mode<synchronous>, transform_indices = @transform_4, window_bounds = array<i64: 1, 8>}, {pipeline_mode = #tpu.pipeline_mode<synchronous>, transform_indices = @transform_5, window_bounds = array<i64: 1, 8>}, {pipeline_mode = #tpu.pipeline_mode<synchronous>, transform_indices = @transform_6, window_bounds = array<i64: 1, 8>}, {pipeline_mode = #tpu.pipeline_mode<synchronous>, transform_indices = @transform_7, window_bounds = array<i64: 256, 1>}, {pipeline_mode = #tpu.pipeline_mode<synchronous>, transform_indices = @transform_8, window_bounds = array<i64: 256, 1>}, {transform_indices = @transform_9, window_bounds = array<i64: 1, 256, 8>}]} {
    %cst = arith.constant 0.000000e+00 : f32
    %0 = vector.broadcast %cst : f32 to vector<256x8xf32>
    %c0 = arith.constant 0 : index
    %c0_0 = arith.constant 0 : index
    %c0_1 = arith.constant 0 : index
    %1 = vector.load %arg1[%c0, %c0_0, %c0_1] : memref<1x290x4xf32, #tpu.memory_space<vmem>>, vector<1x256x4xf32>
    %2 = vector.shape_cast %1 : vector<1x256x4xf32> to vector<256x4xf32>
    %3 = arith.truncf %2 : vector<256x4xf32> to vector<256x4xbf16>
    %c0_2 = arith.constant 0 : index
    %c0_3 = arith.constant 0 : index
    %c0_4 = arith.constant 0 : index
    %4 = vector.load %arg2[%c0_2, %c0_3, %c0_4] : memref<9x4x8xbf16, #tpu.memory_space<vmem>>, vector<1x4x8xbf16>
    %5 = vector.shape_cast %4 : vector<1x4x8xbf16> to vector<4x8xbf16>
    %cst_5 = arith.constant dense<0.000000e+00> : vector<256x8xf32>
    %6 = tpu.matmul %3, %5, %cst_5 {dimension_numbers = #tpu.dot_dimension_numbers<[1], [0], [0], [1], [0, 0, 1, 1], [], []>} : vector<256x4xbf16>, vector<4x8xbf16>, vector<256x8xf32> -> vector<256x8xf32>
    %c0_6 = arith.constant 0 : index
    %c0_7 = arith.constant 0 : index
    %7 = vector.load %arg8[%c0_6, %c0_7] : memref<256x1xf32, #tpu.memory_space<vmem>>, vector<256x1xf32>
    %8 = vector.broadcast %7 : vector<256x1xf32> to vector<256x8xf32>
    %9 = arith.mulf %6, %8 : vector<256x8xf32>
    %10 = arith.addf %0, %9 : vector<256x8xf32>
    %c0_8 = arith.constant 0 : index
    %c1 = arith.constant 1 : index
    %c0_9 = arith.constant 0 : index
    %11 = vector.load %arg1[%c0_8, %c1, %c0_9] : memref<1x290x4xf32, #tpu.memory_space<vmem>>, vector<1x256x4xf32>
    %12 = vector.shape_cast %11 : vector<1x256x4xf32> to vector<256x4xf32>
    %13 = arith.truncf %12 : vector<256x4xf32> to vector<256x4xbf16>
    %c1_10 = arith.constant 1 : index
    %c0_11 = arith.constant 0 : index
    %c0_12 = arith.constant 0 : index
    %14 = vector.load %arg2[%c1_10, %c0_11, %c0_12] : memref<9x4x8xbf16, #tpu.memory_space<vmem>>, vector<1x4x8xbf16>
    %15 = vector.shape_cast %14 : vector<1x4x8xbf16> to vector<4x8xbf16>
    %cst_13 = arith.constant dense<0.000000e+00> : vector<256x8xf32>
    %16 = tpu.matmul %13, %15, %cst_13 {dimension_numbers = #tpu.dot_dimension_numbers<[1], [0], [0], [1], [0, 0, 1, 1], [], []>} : vector<256x4xbf16>, vector<4x8xbf16>, vector<256x8xf32> -> vector<256x8xf32>
    %17 = arith.addf %10, %16 : vector<256x8xf32>
    %c0_14 = arith.constant 0 : index
    %c2 = arith.constant 2 : index
    %c0_15 = arith.constant 0 : index
    %18 = vector.load %arg1[%c0_14, %c2, %c0_15] : memref<1x290x4xf32, #tpu.memory_space<vmem>>, vector<1x256x4xf32>
    %19 = vector.shape_cast %18 : vector<1x256x4xf32> to vector<256x4xf32>
    %20 = arith.truncf %19 : vector<256x4xf32> to vector<256x4xbf16>
    %c2_16 = arith.constant 2 : index
    %c0_17 = arith.constant 0 : index
    %c0_18 = arith.constant 0 : index
    %21 = vector.load %arg2[%c2_16, %c0_17, %c0_18] : memref<9x4x8xbf16, #tpu.memory_space<vmem>>, vector<1x4x8xbf16>
    %22 = vector.shape_cast %21 : vector<1x4x8xbf16> to vector<4x8xbf16>
    %cst_19 = arith.constant dense<0.000000e+00> : vector<256x8xf32>
    %23 = tpu.matmul %20, %22, %cst_19 {dimension_numbers = #tpu.dot_dimension_numbers<[1], [0], [0], [1], [0, 0, 1, 1], [], []>} : vector<256x4xbf16>, vector<4x8xbf16>, vector<256x8xf32> -> vector<256x8xf32>
    %c0_20 = arith.constant 0 : index
    %c0_21 = arith.constant 0 : index
    %24 = vector.load %arg9[%c0_20, %c0_21] : memref<256x1xf32, #tpu.memory_space<vmem>>, vector<256x1xf32>
    %25 = vector.broadcast %24 : vector<256x1xf32> to vector<256x8xf32>
    %26 = arith.mulf %23, %25 : vector<256x8xf32>
    %27 = arith.addf %17, %26 : vector<256x8xf32>
    %c0_22 = arith.constant 0 : index
    %c16 = arith.constant 16 : index
    %c0_23 = arith.constant 0 : index
    %28 = vector.load %arg1[%c0_22, %c16, %c0_23] : memref<1x290x4xf32, #tpu.memory_space<vmem>>, vector<1x256x4xf32>
    %29 = vector.shape_cast %28 : vector<1x256x4xf32> to vector<256x4xf32>
    %30 = arith.truncf %29 : vector<256x4xf32> to vector<256x4xbf16>
    %c3 = arith.constant 3 : index
    %c0_24 = arith.constant 0 : index
    %c0_25 = arith.constant 0 : index
    %31 = vector.load %arg2[%c3, %c0_24, %c0_25] : memref<9x4x8xbf16, #tpu.memory_space<vmem>>, vector<1x4x8xbf16>
    %32 = vector.shape_cast %31 : vector<1x4x8xbf16> to vector<4x8xbf16>
    %cst_26 = arith.constant dense<0.000000e+00> : vector<256x8xf32>
    %33 = tpu.matmul %30, %32, %cst_26 {dimension_numbers = #tpu.dot_dimension_numbers<[1], [0], [0], [1], [0, 0, 1, 1], [], []>} : vector<256x4xbf16>, vector<4x8xbf16>, vector<256x8xf32> -> vector<256x8xf32>
    %c0_27 = arith.constant 0 : index
    %c0_28 = arith.constant 0 : index
    %34 = vector.load %arg8[%c0_27, %c0_28] : memref<256x1xf32, #tpu.memory_space<vmem>>, vector<256x1xf32>
    %35 = vector.broadcast %34 : vector<256x1xf32> to vector<256x8xf32>
    %36 = arith.mulf %33, %35 : vector<256x8xf32>
    %37 = arith.addf %27, %36 : vector<256x8xf32>
    %c0_29 = arith.constant 0 : index
    %c17 = arith.constant 17 : index
    %c0_30 = arith.constant 0 : index
    %38 = vector.load %arg1[%c0_29, %c17, %c0_30] : memref<1x290x4xf32, #tpu.memory_space<vmem>>, vector<1x256x4xf32>
    %39 = vector.shape_cast %38 : vector<1x256x4xf32> to vector<256x4xf32>
    %40 = arith.truncf %39 : vector<256x4xf32> to vector<256x4xbf16>
    %c4 = arith.constant 4 : index
    %c0_31 = arith.constant 0 : index
    %c0_32 = arith.constant 0 : index
    %41 = vector.load %arg2[%c4, %c0_31, %c0_32] : memref<9x4x8xbf16, #tpu.memory_space<vmem>>, vector<1x4x8xbf16>
    %42 = vector.shape_cast %41 : vector<1x4x8xbf16> to vector<4x8xbf16>
    %cst_33 = arith.constant dense<0.000000e+00> : vector<256x8xf32>
    %43 = tpu.matmul %40, %42, %cst_33 {dimension_numbers = #tpu.dot_dimension_numbers<[1], [0], [0], [1], [0, 0, 1, 1], [], []>} : vector<256x4xbf16>, vector<4x8xbf16>, vector<256x8xf32> -> vector<256x8xf32>
    %44 = arith.addf %37, %43 : vector<256x8xf32>
    %c0_34 = arith.constant 0 : index
    %c18 = arith.constant 18 : index
    %c0_35 = arith.constant 0 : index
    %45 = vector.load %arg1[%c0_34, %c18, %c0_35] : memref<1x290x4xf32, #tpu.memory_space<vmem>>, vector<1x256x4xf32>
    %46 = vector.shape_cast %45 : vector<1x256x4xf32> to vector<256x4xf32>
    %47 = arith.truncf %46 : vector<256x4xf32> to vector<256x4xbf16>
    %c5 = arith.constant 5 : index
    %c0_36 = arith.constant 0 : index
    %c0_37 = arith.constant 0 : index
    %48 = vector.load %arg2[%c5, %c0_36, %c0_37] : memref<9x4x8xbf16, #tpu.memory_space<vmem>>, vector<1x4x8xbf16>
    %49 = vector.shape_cast %48 : vector<1x4x8xbf16> to vector<4x8xbf16>
    %cst_38 = arith.constant dense<0.000000e+00> : vector<256x8xf32>
    %50 = tpu.matmul %47, %49, %cst_38 {dimension_numbers = #tpu.dot_dimension_numbers<[1], [0], [0], [1], [0, 0, 1, 1], [], []>} : vector<256x4xbf16>, vector<4x8xbf16>, vector<256x8xf32> -> vector<256x8xf32>
    %c0_39 = arith.constant 0 : index
    %c0_40 = arith.constant 0 : index
    %51 = vector.load %arg9[%c0_39, %c0_40] : memref<256x1xf32, #tpu.memory_space<vmem>>, vector<256x1xf32>
    %52 = vector.broadcast %51 : vector<256x1xf32> to vector<256x8xf32>
    %53 = arith.mulf %50, %52 : vector<256x8xf32>
    %54 = arith.addf %44, %53 : vector<256x8xf32>
    %c0_41 = arith.constant 0 : index
    %c32 = arith.constant 32 : index
    %c0_42 = arith.constant 0 : index
    %55 = vector.load %arg1[%c0_41, %c32, %c0_42] : memref<1x290x4xf32, #tpu.memory_space<vmem>>, vector<1x256x4xf32>
    %56 = vector.shape_cast %55 : vector<1x256x4xf32> to vector<256x4xf32>
    %57 = arith.truncf %56 : vector<256x4xf32> to vector<256x4xbf16>
    %c6 = arith.constant 6 : index
    %c0_43 = arith.constant 0 : index
    %c0_44 = arith.constant 0 : index
    %58 = vector.load %arg2[%c6, %c0_43, %c0_44] : memref<9x4x8xbf16, #tpu.memory_space<vmem>>, vector<1x4x8xbf16>
    %59 = vector.shape_cast %58 : vector<1x4x8xbf16> to vector<4x8xbf16>
    %cst_45 = arith.constant dense<0.000000e+00> : vector<256x8xf32>
    %60 = tpu.matmul %57, %59, %cst_45 {dimension_numbers = #tpu.dot_dimension_numbers<[1], [0], [0], [1], [0, 0, 1, 1], [], []>} : vector<256x4xbf16>, vector<4x8xbf16>, vector<256x8xf32> -> vector<256x8xf32>
    %c0_46 = arith.constant 0 : index
    %c0_47 = arith.constant 0 : index
    %61 = vector.load %arg8[%c0_46, %c0_47] : memref<256x1xf32, #tpu.memory_space<vmem>>, vector<256x1xf32>
    %62 = vector.broadcast %61 : vector<256x1xf32> to vector<256x8xf32>
    %63 = arith.mulf %60, %62 : vector<256x8xf32>
    %64 = arith.addf %54, %63 : vector<256x8xf32>
    %c0_48 = arith.constant 0 : index
    %c33 = arith.constant 33 : index
    %c0_49 = arith.constant 0 : index
    %65 = vector.load %arg1[%c0_48, %c33, %c0_49] : memref<1x290x4xf32, #tpu.memory_space<vmem>>, vector<1x256x4xf32>
    %66 = vector.shape_cast %65 : vector<1x256x4xf32> to vector<256x4xf32>
    %67 = arith.truncf %66 : vector<256x4xf32> to vector<256x4xbf16>
    %c7 = arith.constant 7 : index
    %c0_50 = arith.constant 0 : index
    %c0_51 = arith.constant 0 : index
    %68 = vector.load %arg2[%c7, %c0_50, %c0_51] : memref<9x4x8xbf16, #tpu.memory_space<vmem>>, vector<1x4x8xbf16>
    %69 = vector.shape_cast %68 : vector<1x4x8xbf16> to vector<4x8xbf16>
    %cst_52 = arith.constant dense<0.000000e+00> : vector<256x8xf32>
    %70 = tpu.matmul %67, %69, %cst_52 {dimension_numbers = #tpu.dot_dimension_numbers<[1], [0], [0], [1], [0, 0, 1, 1], [], []>} : vector<256x4xbf16>, vector<4x8xbf16>, vector<256x8xf32> -> vector<256x8xf32>
    %71 = arith.addf %64, %70 : vector<256x8xf32>
    %c0_53 = arith.constant 0 : index
    %c34 = arith.constant 34 : index
    %c0_54 = arith.constant 0 : index
    %72 = vector.load %arg1[%c0_53, %c34, %c0_54] : memref<1x290x4xf32, #tpu.memory_space<vmem>>, vector<1x256x4xf32>
    %73 = vector.shape_cast %72 : vector<1x256x4xf32> to vector<256x4xf32>
    %74 = arith.truncf %73 : vector<256x4xf32> to vector<256x4xbf16>
    %c8 = arith.constant 8 : index
    %c0_55 = arith.constant 0 : index
    %c0_56 = arith.constant 0 : index
    %75 = vector.load %arg2[%c8, %c0_55, %c0_56] : memref<9x4x8xbf16, #tpu.memory_space<vmem>>, vector<1x4x8xbf16>
    %76 = vector.shape_cast %75 : vector<1x4x8xbf16> to vector<4x8xbf16>
    %cst_57 = arith.constant dense<0.000000e+00> : vector<256x8xf32>
    %77 = tpu.matmul %74, %76, %cst_57 {dimension_numbers = #tpu.dot_dimension_numbers<[1], [0], [0], [1], [0, 0, 1, 1], [], []>} : vector<256x4xbf16>, vector<4x8xbf16>, vector<256x8xf32> -> vector<256x8xf32>
    %c0_58 = arith.constant 0 : index
    %c0_59 = arith.constant 0 : index
    %78 = vector.load %arg9[%c0_58, %c0_59] : memref<256x1xf32, #tpu.memory_space<vmem>>, vector<256x1xf32>
    %79 = vector.broadcast %78 : vector<256x1xf32> to vector<256x8xf32>
    %80 = arith.mulf %77, %79 : vector<256x8xf32>
    %81 = arith.addf %71, %80 : vector<256x8xf32>
    %c0_60 = arith.constant 0 : index
    %c0_61 = arith.constant 0 : index
    %82 = vector.load %arg5[%c0_60, %c0_61] : memref<1x8xf32, #tpu.memory_space<vmem>>, vector<1x8xf32>
    %83 = vector.broadcast %82 : vector<1x8xf32> to vector<256x8xf32>
    %84 = arith.addf %81, %83 : vector<256x8xf32>
    %cst_62 = arith.constant 0.000000e+00 : f32
    %85 = vector.broadcast %cst_62 : f32 to vector<256x8xf32>
    %86 = arith.maximumf %84, %85 : vector<256x8xf32>
    %cst_63 = arith.constant 0.000000e+00 : f32
    %87 = vector.broadcast %cst_63 : f32 to vector<290x8xf32>
    %c0_64 = arith.constant 0 : index
    %c0_65 = arith.constant 0 : index
    %88 = vector.load %arg11[%c0_64, %c0_65] : memref<290x8xf32, #tpu.memory_space<vmem>>, vector<290x8xf32>
    tpu.vector_store %arg11[%c0_64, %c0_65], %87 {strides = array<i32>} : memref<290x8xf32, #tpu.memory_space<vmem>>, vector<290x8xf32>,
    %c17_66 = arith.constant 17 : index
    %c0_67 = arith.constant 0 : index
    %89 = vector.load %arg11[%c17_66, %c0_67] : memref<290x8xf32, #tpu.memory_space<vmem>>, vector<256x8xf32>
    tpu.vector_store %arg11[%c17_66, %c0_67], %86 {strides = array<i32>} : memref<290x8xf32, #tpu.memory_space<vmem>>, vector<256x8xf32>,
    %cst_68 = arith.constant 0.000000e+00 : f32
    %90 = vector.broadcast %cst_68 : f32 to vector<256x8xf32>
    %c0_69 = arith.constant 0 : index
    %c0_70 = arith.constant 0 : index
    %91 = vector.load %arg11[%c0_69, %c0_70] : memref<290x8xf32, #tpu.memory_space<vmem>>, vector<256x8xf32>
    %92 = arith.truncf %91 : vector<256x8xf32> to vector<256x8xbf16>
    %c0_71 = arith.constant 0 : index
    %c0_72 = arith.constant 0 : index
    %c0_73 = arith.constant 0 : index
    %93 = vector.load %arg3[%c0_71, %c0_72, %c0_73] : memref<9x8x8xbf16, #tpu.memory_space<vmem>>, vector<1x8x8xbf16>
    %94 = vector.shape_cast %93 : vector<1x8x8xbf16> to vector<8x8xbf16>
    %cst_74 = arith.constant dense<0.000000e+00> : vector<256x8xf32>
    %95 = tpu.matmul %92, %94, %cst_74 {dimension_numbers = #tpu.dot_dimension_numbers<[1], [0], [0], [1], [0, 0, 1, 1], [], []>} : vector<256x8xbf16>, vector<8x8xbf16>, vector<256x8xf32> -> vector<256x8xf32>
    %c0_75 = arith.constant 0 : index
    %c0_76 = arith.constant 0 : index
    %96 = vector.load %arg8[%c0_75, %c0_76] : memref<256x1xf32, #tpu.memory_space<vmem>>, vector<256x1xf32>
    %97 = vector.broadcast %96 : vector<256x1xf32> to vector<256x8xf32>
    %98 = arith.mulf %95, %97 : vector<256x8xf32>
    %99 = arith.addf %90, %98 : vector<256x8xf32>
    %c1_77 = arith.constant 1 : index
    %c0_78 = arith.constant 0 : index
    %100 = vector.load %arg11[%c1_77, %c0_78] : memref<290x8xf32, #tpu.memory_space<vmem>>, vector<256x8xf32>
    %101 = arith.truncf %100 : vector<256x8xf32> to vector<256x8xbf16>
    %c1_79 = arith.constant 1 : index
    %c0_80 = arith.constant 0 : index
    %c0_81 = arith.constant 0 : index
    %102 = vector.load %arg3[%c1_79, %c0_80, %c0_81] : memref<9x8x8xbf16, #tpu.memory_space<vmem>>, vector<1x8x8xbf16>
    %103 = vector.shape_cast %102 : vector<1x8x8xbf16> to vector<8x8xbf16>
    %cst_82 = arith.constant dense<0.000000e+00> : vector<256x8xf32>
    %104 = tpu.matmul %101, %103, %cst_82 {dimension_numbers = #tpu.dot_dimension_numbers<[1], [0], [0], [1], [0, 0, 1, 1], [], []>} : vector<256x8xbf16>, vector<8x8xbf16>, vector<256x8xf32> -> vector<256x8xf32>
    %105 = arith.addf %99, %104 : vector<256x8xf32>
    %c2_83 = arith.constant 2 : index
    %c0_84 = arith.constant 0 : index
    %106 = vector.load %arg11[%c2_83, %c0_84] : memref<290x8xf32, #tpu.memory_space<vmem>>, vector<256x8xf32>
    %107 = arith.truncf %106 : vector<256x8xf32> to vector<256x8xbf16>
    %c2_85 = arith.constant 2 : index
    %c0_86 = arith.constant 0 : index
    %c0_87 = arith.constant 0 : index
    %108 = vector.load %arg3[%c2_85, %c0_86, %c0_87] : memref<9x8x8xbf16, #tpu.memory_space<vmem>>, vector<1x8x8xbf16>
    %109 = vector.shape_cast %108 : vector<1x8x8xbf16> to vector<8x8xbf16>
    %cst_88 = arith.constant dense<0.000000e+00> : vector<256x8xf32>
    %110 = tpu.matmul %107, %109, %cst_88 {dimension_numbers = #tpu.dot_dimension_numbers<[1], [0], [0], [1], [0, 0, 1, 1], [], []>} : vector<256x8xbf16>, vector<8x8xbf16>, vector<256x8xf32> -> vector<256x8xf32>
    %c0_89 = arith.constant 0 : index
    %c0_90 = arith.constant 0 : index
    %111 = vector.load %arg9[%c0_89, %c0_90] : memref<256x1xf32, #tpu.memory_space<vmem>>, vector<256x1xf32>
    %112 = vector.broadcast %111 : vector<256x1xf32> to vector<256x8xf32>
    %113 = arith.mulf %110, %112 : vector<256x8xf32>
    %114 = arith.addf %105, %113 : vector<256x8xf32>
    %c16_91 = arith.constant 16 : index
    %c0_92 = arith.constant 0 : index
    %115 = vector.load %arg11[%c16_91, %c0_92] : memref<290x8xf32, #tpu.memory_space<vmem>>, vector<256x8xf32>
    %116 = arith.truncf %115 : vector<256x8xf32> to vector<256x8xbf16>
    %c3_93 = arith.constant 3 : index
    %c0_94 = arith.constant 0 : index
    %c0_95 = arith.constant 0 : index
    %117 = vector.load %arg3[%c3_93, %c0_94, %c0_95] : memref<9x8x8xbf16, #tpu.memory_space<vmem>>, vector<1x8x8xbf16>
    %118 = vector.shape_cast %117 : vector<1x8x8xbf16> to vector<8x8xbf16>
    %cst_96 = arith.constant dense<0.000000e+00> : vector<256x8xf32>
    %119 = tpu.matmul %116, %118, %cst_96 {dimension_numbers = #tpu.dot_dimension_numbers<[1], [0], [0], [1], [0, 0, 1, 1], [], []>} : vector<256x8xbf16>, vector<8x8xbf16>, vector<256x8xf32> -> vector<256x8xf32>
    %c0_97 = arith.constant 0 : index
    %c0_98 = arith.constant 0 : index
    %120 = vector.load %arg8[%c0_97, %c0_98] : memref<256x1xf32, #tpu.memory_space<vmem>>, vector<256x1xf32>
    %121 = vector.broadcast %120 : vector<256x1xf32> to vector<256x8xf32>
    %122 = arith.mulf %119, %121 : vector<256x8xf32>
    %123 = arith.addf %114, %122 : vector<256x8xf32>
    %c17_99 = arith.constant 17 : index
    %c0_100 = arith.constant 0 : index
    %124 = vector.load %arg11[%c17_99, %c0_100] : memref<290x8xf32, #tpu.memory_space<vmem>>, vector<256x8xf32>
    %125 = arith.truncf %124 : vector<256x8xf32> to vector<256x8xbf16>
    %c4_101 = arith.constant 4 : index
    %c0_102 = arith.constant 0 : index
    %c0_103 = arith.constant 0 : index
    %126 = vector.load %arg3[%c4_101, %c0_102, %c0_103] : memref<9x8x8xbf16, #tpu.memory_space<vmem>>, vector<1x8x8xbf16>
    %127 = vector.shape_cast %126 : vector<1x8x8xbf16> to vector<8x8xbf16>
    %cst_104 = arith.constant dense<0.000000e+00> : vector<256x8xf32>
    %128 = tpu.matmul %125, %127, %cst_104 {dimension_numbers = #tpu.dot_dimension_numbers<[1], [0], [0], [1], [0, 0, 1, 1], [], []>} : vector<256x8xbf16>, vector<8x8xbf16>, vector<256x8xf32> -> vector<256x8xf32>
    %129 = arith.addf %123, %128 : vector<256x8xf32>
    %c18_105 = arith.constant 18 : index
    %c0_106 = arith.constant 0 : index
    %130 = vector.load %arg11[%c18_105, %c0_106] : memref<290x8xf32, #tpu.memory_space<vmem>>, vector<256x8xf32>
    %131 = arith.truncf %130 : vector<256x8xf32> to vector<256x8xbf16>
    %c5_107 = arith.constant 5 : index
    %c0_108 = arith.constant 0 : index
    %c0_109 = arith.constant 0 : index
    %132 = vector.load %arg3[%c5_107, %c0_108, %c0_109] : memref<9x8x8xbf16, #tpu.memory_space<vmem>>, vector<1x8x8xbf16>
    %133 = vector.shape_cast %132 : vector<1x8x8xbf16> to vector<8x8xbf16>
    %cst_110 = arith.constant dense<0.000000e+00> : vector<256x8xf32>
    %134 = tpu.matmul %131, %133, %cst_110 {dimension_numbers = #tpu.dot_dimension_numbers<[1], [0], [0], [1], [0, 0, 1, 1], [], []>} : vector<256x8xbf16>, vector<8x8xbf16>, vector<256x8xf32> -> vector<256x8xf32>
    %c0_111 = arith.constant 0 : index
    %c0_112 = arith.constant 0 : index
    %135 = vector.load %arg9[%c0_111, %c0_112] : memref<256x1xf32, #tpu.memory_space<vmem>>, vector<256x1xf32>
    %136 = vector.broadcast %135 : vector<256x1xf32> to vector<256x8xf32>
    %137 = arith.mulf %134, %136 : vector<256x8xf32>
    %138 = arith.addf %129, %137 : vector<256x8xf32>
    %c32_113 = arith.constant 32 : index
    %c0_114 = arith.constant 0 : index
    %139 = vector.load %arg11[%c32_113, %c0_114] : memref<290x8xf32, #tpu.memory_space<vmem>>, vector<256x8xf32>
    %140 = arith.truncf %139 : vector<256x8xf32> to vector<256x8xbf16>
    %c6_115 = arith.constant 6 : index
    %c0_116 = arith.constant 0 : index
    %c0_117 = arith.constant 0 : index
    %141 = vector.load %arg3[%c6_115, %c0_116, %c0_117] : memref<9x8x8xbf16, #tpu.memory_space<vmem>>, vector<1x8x8xbf16>
    %142 = vector.shape_cast %141 : vector<1x8x8xbf16> to vector<8x8xbf16>
    %cst_118 = arith.constant dense<0.000000e+00> : vector<256x8xf32>
    %143 = tpu.matmul %140, %142, %cst_118 {dimension_numbers = #tpu.dot_dimension_numbers<[1], [0], [0], [1], [0, 0, 1, 1], [], []>} : vector<256x8xbf16>, vector<8x8xbf16>, vector<256x8xf32> -> vector<256x8xf32>
    %c0_119 = arith.constant 0 : index
    %c0_120 = arith.constant 0 : index
    %144 = vector.load %arg8[%c0_119, %c0_120] : memref<256x1xf32, #tpu.memory_space<vmem>>, vector<256x1xf32>
    %145 = vector.broadcast %144 : vector<256x1xf32> to vector<256x8xf32>
    %146 = arith.mulf %143, %145 : vector<256x8xf32>
    %147 = arith.addf %138, %146 : vector<256x8xf32>
    %c33_121 = arith.constant 33 : index
    %c0_122 = arith.constant 0 : index
    %148 = vector.load %arg11[%c33_121, %c0_122] : memref<290x8xf32, #tpu.memory_space<vmem>>, vector<256x8xf32>
    %149 = arith.truncf %148 : vector<256x8xf32> to vector<256x8xbf16>
    %c7_123 = arith.constant 7 : index
    %c0_124 = arith.constant 0 : index
    %c0_125 = arith.constant 0 : index
    %150 = vector.load %arg3[%c7_123, %c0_124, %c0_125] : memref<9x8x8xbf16, #tpu.memory_space<vmem>>, vector<1x8x8xbf16>
    %151 = vector.shape_cast %150 : vector<1x8x8xbf16> to vector<8x8xbf16>
    %cst_126 = arith.constant dense<0.000000e+00> : vector<256x8xf32>
    %152 = tpu.matmul %149, %151, %cst_126 {dimension_numbers = #tpu.dot_dimension_numbers<[1], [0], [0], [1], [0, 0, 1, 1], [], []>} : vector<256x8xbf16>, vector<8x8xbf16>, vector<256x8xf32> -> vector<256x8xf32>
    %153 = arith.addf %147, %152 : vector<256x8xf32>
    %c34_127 = arith.constant 34 : index
    %c0_128 = arith.constant 0 : index
    %154 = vector.load %arg11[%c34_127, %c0_128] : memref<290x8xf32, #tpu.memory_space<vmem>>, vector<256x8xf32>
    %155 = arith.truncf %154 : vector<256x8xf32> to vector<256x8xbf16>
    %c8_129 = arith.constant 8 : index
    %c0_130 = arith.constant 0 : index
    %c0_131 = arith.constant 0 : index
    %156 = vector.load %arg3[%c8_129, %c0_130, %c0_131] : memref<9x8x8xbf16, #tpu.memory_space<vmem>>, vector<1x8x8xbf16>
    %157 = vector.shape_cast %156 : vector<1x8x8xbf16> to vector<8x8xbf16>
    %cst_132 = arith.constant dense<0.000000e+00> : vector<256x8xf32>
    %158 = tpu.matmul %155, %157, %cst_132 {dimension_numbers = #tpu.dot_dimension_numbers<[1], [0], [0], [1], [0, 0, 1, 1], [], []>} : vector<256x8xbf16>, vector<8x8xbf16>, vector<256x8xf32> -> vector<256x8xf32>
    %c0_133 = arith.constant 0 : index
    %c0_134 = arith.constant 0 : index
    %159 = vector.load %arg9[%c0_133, %c0_134] : memref<256x1xf32, #tpu.memory_space<vmem>>, vector<256x1xf32>
    %160 = vector.broadcast %159 : vector<256x1xf32> to vector<256x8xf32>
    %161 = arith.mulf %158, %160 : vector<256x8xf32>
    %162 = arith.addf %153, %161 : vector<256x8xf32>
    %c0_135 = arith.constant 0 : index
    %c0_136 = arith.constant 0 : index
    %163 = vector.load %arg6[%c0_135, %c0_136] : memref<1x8xf32, #tpu.memory_space<vmem>>, vector<1x8xf32>
    %164 = vector.broadcast %163 : vector<1x8xf32> to vector<256x8xf32>
    %165 = arith.addf %162, %164 : vector<256x8xf32>
    %c0_137 = arith.constant 0 : index
    %c17_138 = arith.constant 17 : index
    %c0_139 = arith.constant 0 : index
    %166 = vector.load %arg1[%c0_137, %c17_138, %c0_139] : memref<1x290x4xf32, #tpu.memory_space<vmem>>, vector<1x256x4xf32>
    %167 = vector.shape_cast %166 : vector<1x256x4xf32> to vector<256x4xf32>
    %168 = arith.truncf %167 : vector<256x4xf32> to vector<256x4xbf16>
    %c0_140 = arith.constant 0 : index
    %c0_141 = arith.constant 0 : index
    %169 = vector.load %arg4[%c0_140, %c0_141] : memref<4x8xbf16, #tpu.memory_space<vmem>>, vector<4x8xbf16>
    %cst_142 = arith.constant dense<0.000000e+00> : vector<256x8xf32>
    %170 = tpu.matmul %168, %169, %cst_142 {dimension_numbers = #tpu.dot_dimension_numbers<[1], [0], [0], [1], [0, 0, 1, 1], [], []>} : vector<256x4xbf16>, vector<4x8xbf16>, vector<256x8xf32> -> vector<256x8xf32>
    %171 = arith.addf %165, %170 : vector<256x8xf32>
    %c0_143 = arith.constant 0 : index
    %c0_144 = arith.constant 0 : index
    %172 = vector.load %arg7[%c0_143, %c0_144] : memref<1x8xf32, #tpu.memory_space<vmem>>, vector<1x8xf32>
    %173 = vector.broadcast %172 : vector<1x8xf32> to vector<256x8xf32>
    %174 = arith.addf %171, %173 : vector<256x8xf32>
    %cst_145 = arith.constant 0.000000e+00 : f32
    %175 = vector.broadcast %cst_145 : f32 to vector<256x8xf32>
    %176 = arith.maximumf %174, %175 : vector<256x8xf32>
    %c0_146 = arith.constant 0 : index
    %c0_147 = arith.constant 0 : index
    %c0_148 = arith.constant 0 : index
    %177 = vector.load %arg10[%c0_146, %c0_147, %c0_148] : memref<1x256x8xf32, #tpu.memory_space<vmem>>, vector<1x256x8xf32>
    %178 = vector.shape_cast %177 : vector<1x256x8xf32> to vector<256x8xf32>
    %179 = vector.shape_cast %176 : vector<256x8xf32> to vector<1x256x8xf32>
    tpu.vector_store %arg10[%c0_146, %c0_147, %c0_148], %179 {strides = array<i32>} : memref<1x256x8xf32, #tpu.memory_space<vmem>>, vector<1x256x8xf32>,
    return
  }
  func.func @transform_0(%arg0: i32) -> (i32, i32, i32) {
    %c0_i32 = arith.constant 0 : i32
    %c0_i32_0 = arith.constant 0 : i32
    %c0_i32_1 = arith.constant 0 : i32
    return %arg0, %c0_i32, %c0_i32_0 : i32, i32, i32
  }
  func.func @transform_1(%arg0: i32) -> (i32, i32, i32) {
    %c0_i32 = arith.constant 0 : i32
    %c0_i32_0 = arith.constant 0 : i32
    %c0_i32_1 = arith.constant 0 : i32
    %c0_i32_2 = arith.constant 0 : i32
    return %c0_i32, %c0_i32_0, %c0_i32_1 : i32, i32, i32
  }
  func.func @transform_2(%arg0: i32) -> (i32, i32, i32) {
    %c0_i32 = arith.constant 0 : i32
    %c0_i32_0 = arith.constant 0 : i32
    %c0_i32_1 = arith.constant 0 : i32
    %c0_i32_2 = arith.constant 0 : i32
    return %c0_i32, %c0_i32_0, %c0_i32_1 : i32, i32, i32
  }
  func.func @transform_3(%arg0: i32) -> (i32, i32) {
    %c0_i32 = arith.constant 0 : i32
    %c0_i32_0 = arith.constant 0 : i32
    %c0_i32_1 = arith.constant 0 : i32
    return %c0_i32, %c0_i32_0 : i32, i32
  }
  func.func @transform_4(%arg0: i32) -> (i32, i32) {
    %c0_i32 = arith.constant 0 : i32
    %c0_i32_0 = arith.constant 0 : i32
    %c0_i32_1 = arith.constant 0 : i32
    return %c0_i32, %c0_i32_0 : i32, i32
  }
  func.func @transform_5(%arg0: i32) -> (i32, i32) {
    %c0_i32 = arith.constant 0 : i32
    %c0_i32_0 = arith.constant 0 : i32
    %c0_i32_1 = arith.constant 0 : i32
    return %c0_i32, %c0_i32_0 : i32, i32
  }
  func.func @transform_6(%arg0: i32) -> (i32, i32) {
    %c0_i32 = arith.constant 0 : i32
    %c0_i32_0 = arith.constant 0 : i32
    %c0_i32_1 = arith.constant 0 : i32
    return %c0_i32, %c0_i32_0 : i32, i32
  }
  func.func @transform_7(%arg0: i32) -> (i32, i32) {
    %c0_i32 = arith.constant 0 : i32
    %c0_i32_0 = arith.constant 0 : i32
    %c0_i32_1 = arith.constant 0 : i32
    return %c0_i32, %c0_i32_0 : i32, i32
  }
  func.func @transform_8(%arg0: i32) -> (i32, i32) {
    %c0_i32 = arith.constant 0 : i32
    %c0_i32_0 = arith.constant 0 : i32
    %c0_i32_1 = arith.constant 0 : i32
    return %c0_i32, %c0_i32_0 : i32, i32
  }
  func.func @transform_9(%arg0: i32) -> (i32, i32, i32) {
    %c0_i32 = arith.constant 0 : i32
    %c0_i32_0 = arith.constant 0 : i32
    %c0_i32_1 = arith.constant 0 : i32
    return %arg0, %c0_i32, %c0_i32_0 : i32, i32, i32
  }
}

</mosaic_0001>

<bundles_post_ra>
// kernel: residual_block_pallas.1
= control target key start
LH: loop header
LB: loop body
LE: loop exit
PB: predicated region body
PF: predicated region fallthrough
CT: control target
= control target key end

     0   :  { %s9353_s30 = smov 0   ;;  %s12569_s0 = inlined_call_operand.vmem [shape: f32[2,290,4], index: 0, kind: input, shape index: {}]   ;;  %s12570_s1 = inlined_call_operand.vmem [shape: bf16[9,4,8], index: 1, kind: input, shape index: {}]   ;;  %s12571_s2 = inlined_call_operand.vmem [shape: bf16[9,8,8], index: 2, kind: input, shape index: {}]   ;;  %s12572_s3 = inlined_call_operand.vmem [shape: bf16[4,8], index: 3, kind: input, shape index: {}]   ;;  %s12573_s4 = inlined_call_operand.vmem [shape: f32[1,8], index: 4, kind: input, shape index: {}]   ;;  %s12574_s5 = inlined_call_operand.vmem [shape: f32[1,8], index: 5, kind: input, shape index: {}]   ;;  %s12575_s6 = inlined_call_operand.vmem [shape: f32[1,8], index: 6, kind: input, shape index: {}]   ;;  %s12576_s7 = inlined_call_operand.vmem [shape: f32[256,1], index: 7, kind: input, shape index: {}]   ;;  %s12577_s8 = inlined_call_operand.vmem [shape: f32[256,1], index: 8, kind: input, shape index: {}]   ;;  %s12578_s9 = inlined_call_operand.vmem [shape: f32[2,256,8], index: 9, kind: output, shape index: {}]  }
   0x1 LB: > { %s7411_s10 = sadd.s32 4294967295, %s9299_s30   ;;  %p7415_p0 = scmp.ge.s32.totalorder %s9299_s30, 1  ;;  %s9299_s30 = sphi %s9353_s30, %s19_s30  }
   0x2   : > { %p287_p1 = scmp.lt.s32.totalorder %s9299_s30, 3 }
   0x4   : > { %p288_p2 = pnand %p7415_p0, %p287_p1 }
   0x6   : > { %291 = sbr.rel (%p288_p2) target bundleno = 1022 (0x3fe), region = 56 }
   0xd   : > { %v1409_v0 = vld [vmem:[%s12577_s8] sm:$0xff]  ;;  %vm432_vm0 = vcmask 1041408   ;;  %p323_p3 = scmp.lt.s32.totalorder %s7411_s10, 1  ;;  %v9301_v2 = vmov 0   ;;  %v1410_v6 = vld [vmem:[%s12577_s8 + $0x8] sm:$0xff]  ;;  %v9399_v9 = vld [vmem:[%s12576_s7 + $0x18] sm:$0xff] }
   0xe   : > { %v9367_v1 = vld [vmem:[%s12576_s7] sm:$0xff]  ;;  %9292 = vset.pattern.permute.xlu1 %v9301_v2  ;;  %9291 = vset.pattern.permute.xlu0 %v9301_v2  ;;  %v9385_v7 = vld [vmem:[%s12576_s7 + $0x8] sm:$0xff]  ;;  %v9404_v10 = vld [vmem:[%s12576_s7 + $0x10] sm:$0xff]  ;;  %vm383_vm1 = vcmask 31744   ;;  %vm3796_vm2 = vcmask 1043456   ;;  %vm3628_vm3 = vcmask 64512  }
   0xf   : > { %v382_v3 = vld [vmem:[%s12570_s1] sm:$0x3]  ;;  %1443 = vperm.xlu1 %9292, %v1409_v0   ;;  %631 = vperm.xlu0 %9291, %v9367_v1   ;;  %s13208_s10 = smov (!%p323_p3, %s7411_s10), 1  ;;  %v7435_v5 = vld [vmem:[%s12570_s1 + $0x2] sm:$0x3]  ;;  %v1412_v29 = vld [vmem:[%s12577_s8 + $0x18] sm:$0xff] }
  0x10   : > { %v434_v4 = vsel %vm432_vm0, %v382_v3, 0  ;;  %9260 = vmatprep.subr.msk.bf16.mxu0 %vm432_vm0, %v382_v3  ;;  %9261 = vmatprep.subr.msk.bf16.mxu1 %vm432_vm0, %v382_v3  ;;  %v7452_v8 = vld [vmem:[%s12570_s1 + $0x4] sm:$0x3]  ;;  %s9280_s25 = smul.u32 296, %s13208_s10  ;;  %v952_v24 = vsel %vm432_vm0, %v7435_v5, 0  ;;  %v1411_v30 = vld [vmem:[%s12577_s8 + $0x10] sm:$0xff] }
  0x11   : > { %8069 = vmatpush3.bf16.msra.mxu0 %v434_v4  ;;  %8715 = vmatpush3.bf16.msra.mxu1 %v434_v4  ;;  %v1246_v25 = vsel %vm432_vm0, %v7452_v8, 0  ;;  %v9461_v41 = vld [vmem:[%s12576_s7 + $0x28] sm:$0xff]  ;;  %v9466_v42 = vld [vmem:[%s12576_s7 + $0x20] sm:$0xff]  ;;  %v9517_v59 = vld [vmem:[%s12576_s7 + $0x38] sm:$0xff]  ;;  %vm3665_vm4 = vcmask 58368   ;;  %s7744_s15 = sshll.u32 %s13208_s10, 8 }
  0x12   : > { %9262 = vmatprep.subr.msk.bf16.mxu1 %vm432_vm0, %v7435_v5  ;;  %9263 = vmatprep.subr.msk.bf16.mxu0 %vm432_vm0, %v7452_v8  ;;  %s9409_s13 = scalar_lea.vmem %s12569_s0, %s9280_s25  ;;  %v1414_v47 = vld [vmem:[%s12577_s8 + $0x28] sm:$0xff]  ;;  %v1413_v48 = vld [vmem:[%s12577_s8 + $0x20] sm:$0xff]  ;;  %v9522_v60 = vld [vmem:[%s12576_s7 + $0x30] sm:$0xff]  ;;  %s12386_s18 = scalar_lea.vmem %s12578_s9, %s7744_s15 }
  0x13   : > { %1448 = vperm.xlu1 %9292, %v1410_v6   ;;  %636 = vperm.xlu0 %9291, %v9385_v7   ;;  %v334_v11 = vld [vmem:[%s9409_s13] sm:$0xff]  ;;  %v335_v12 = vld [vmem:[%s9409_s13 + $0x8] sm:$0xff]  ;;  %v336_v16 = vld [vmem:[%s9409_s13 + $0x10] sm:$0xff] }
  0x14   : > { %v350_v13 = vld [vmem:[%s9409_s13 + $0x80] sm:$0xff]  ;;  %v366_v14 = vpack.c.bf16 %v335_v12, %v334_v11  ;;  %v351_v15 = vld [vmem:[%s9409_s13 + $0x88] sm:$0xff]  ;;  %v337_v17 = vld [vmem:[%s9409_s13 + $0x18] sm:$0xff] }
  0x15   : > { %v9417_v18 = vpack.c.bf16 %v351_v15, %v350_v13  ;;  %v9419_v19 = vpack.c.bf16 %v337_v17, %v336_v16  ;;  %v352_v20 = vld [vmem:[%s9409_s13 + $0x90] sm:$0xff]  ;;  %v353_v21 = vld [vmem:[%s9409_s13 + $0x98] sm:$0xff]  ;;  %v338_v22 = vld [vmem:[%s9409_s13 + $0x20] sm:$0xff] }
  0x16   : > { %v9426_v23 = vpack.c.bf16 %v353_v21, %v352_v20  ;;  %v339_v26 = vld [vmem:[%s9409_s13 + $0x28] sm:$0xff]  ;;  %v354_v27 = vld [vmem:[%s9409_s13 + $0xa0] sm:$0xff]  ;;  %8070 = vmatprep.mubr.msk.bf16.mxu0 %vm383_vm1, %v366_v14  ;;  %v340_v33 = vld [vmem:[%s9409_s13 + $0x30] sm:$0xff] }
  0x17   : > { %646 = vperm.xlu1 %9292, %v9399_v9   ;;  %641 = vperm.xlu0 %9291, %v9404_v10   ;;  %v355_v28 = vld [vmem:[%s9409_s13 + $0xa8] sm:$0xff]  ;;  %v9442_v31 = vpack.c.bf16 %v339_v26, %v338_v22  ;;  %v341_v34 = vld [vmem:[%s9409_s13 + $0x38] sm:$0xff]  ;;  %v356_v35 = vld [vmem:[%s9409_s13 + $0xb0] sm:$0xff] }
  0x18   : > { %8086 = vmatprep.mubr.msk.bf16.mxu1 %vm383_vm1, %v9417_v18  ;;  %v9444_v32 = vpack.c.bf16 %v355_v28, %v354_v27  ;;  %8071 = vmatmul.mubr.msk.bf16.vlgmr.msra.gmra.mrb[0].mxu0 %vm383_vm1, %v9419_v19  ;;  %v357_v36 = vld [vmem:[%s9409_s13 + $0xb8] sm:$0xff]  ;;  %v342_v37 = vld [vmem:[%s9409_s13 + $0x40] sm:$0xff]  ;;  %v343_v38 = vld [vmem:[%s9409_s13 + $0x48] sm:$0xff]  ;;  %v9472_v43 = vpack.c.bf16 %v341_v34, %v340_v33 }
  0x19   : > { %8087 = vmatmul.mubr.msk.bf16.vlgmr.msra.gmra.mrb[0].mxu1 %vm383_vm1, %v9426_v23  ;;  %8137 = vmatpush3.bf16.msra.mxu0 %v1246_v25  ;;  %v358_v39 = vld [vmem:[%s9409_s13 + $0xc0] sm:$0xff]  ;;  %v359_v40 = vld [vmem:[%s9409_s13 + $0xc8] sm:$0xff]  ;;  %v9474_v44 = vpack.c.bf16 %v357_v36, %v356_v35  ;;  %v9476_v45 = vpack.c.bf16 %v343_v38, %v342_v37  ;;  %v344_v49 = vld [vmem:[%s9409_s13 + $0x50] sm:$0xff] }
  0x1a   : > { %8103 = vmatpush3.bf16.msra.mxu1 %v952_v24  ;;  %8074 = vmatprep.mubr.msk.bf16.mxu0 %vm383_vm1, %v9442_v31  ;;  %v9478_v46 = vpack.c.bf16 %v359_v40, %v358_v39  ;;  %v345_v50 = vld [vmem:[%s9409_s13 + $0x58] sm:$0xff]  ;;  %v9497_v51 = vld [vmem:[%s12570_s1 + $0x6] sm:$0x3]  ;;  %v9502_v52 = vld [vmem:[%s12570_s1 + $0xa] sm:$0x3] }
  0x1b   : > { %1458 = vperm.xlu1 %9292, %v1412_v29   ;;  %1453 = vperm.xlu0 %9291, %v1411_v30   ;;  %v360_v53 = vld [vmem:[%s9409_s13 + $0xd0] sm:$0xff]  ;;  %v361_v54 = vld [vmem:[%s9409_s13 + $0xd8] sm:$0xff]  ;;  %v346_v55 = vld [vmem:[%s9409_s13 + $0x60] sm:$0xff]  ;;  %v9528_v61 = vpack.c.bf16 %v345_v50, %v344_v49  ;;  %v1764_v40 = vsel %vm432_vm0, %v9497_v51, 0 }
  0x1c   : > { %8090 = vmatprep.mubr.msk.bf16.mxu1 %vm383_vm1, %v9444_v32  ;;  %v347_v56 = vld [vmem:[%s9409_s13 + $0x68] sm:$0xff]  ;;  %v362_v57 = vld [vmem:[%s9409_s13 + $0xe0] sm:$0xff]  ;;  %9264 = vmatprep.subr.msk.bf16.mxu1 %vm432_vm0, %v9497_v51  ;;  %v9530_v62 = vpack.c.bf16 %v361_v54, %v360_v53  ;;  %v1416_v2 = vld [vmem:[%s12577_s8 + $0x38] sm:$0xff] }
  0x1d   : > { %v363_v58 = vld [vmem:[%s9409_s13 + $0xe8] sm:$0xff]  ;;  %9266 = vmatprep.subr.msk.bf16.mxu0 %vm432_vm0, %v9502_v52  ;;  %v9532_v63 = vpack.c.bf16 %v347_v56, %v346_v55  ;;  %v1415_v3 = vld [vmem:[%s12577_s8 + $0x30] sm:$0xff]  ;;  %v349_v5 = vld [vmem:[%s9409_s13 + $0x78] sm:$0xff] }
  0x1e   : > { %v9534_v0 = vpack.c.bf16 %v363_v58, %v362_v57  ;;  %v348_v4 = vld [vmem:[%s9409_s13 + $0x70] sm:$0xff]  ;;  %v365_v8 = vld [vmem:[%s9409_s13 + $0xf8] sm:$0xff]  ;;  %v853_v11 = vld [vmem:[%s9409_s13 + $0x1] sm:$0xff] }
  0x1f   : > { %656 = vperm.xlu1 %9292, %v9461_v41   ;;  %651 = vperm.xlu0 %9291, %v9466_v42   ;;  %v364_v6 = vld [vmem:[%s9409_s13 + $0xf0] sm:$0xff]  ;;  %v1147_v13 = vld [vmem:[%s9409_s13 + $0x2] sm:$0xff]  ;;  %v9570_v17 = vpack.c.bf16 %v349_v5, %v348_v4  ;;  %v856_v27 = vld [vmem:[%s9409_s13 + $0x19] sm:$0xff] }
  0x20   : > { %8075 = vmatmul.mubr.msk.bf16.gmra.mrb[4].mxu0 %vm383_vm1, %v9472_v43  ;;  %v854_v12 = vld [vmem:[%s9409_s13 + $0x9] sm:$0xff]  ;;  %v9568_v16 = vld [vmem:[%s12576_s7 + $0x40] sm:$0xff]  ;;  %v9572_v20 = vpack.c.bf16 %v365_v8, %v364_v6  ;;  %v855_v26 = vld [vmem:[%s9409_s13 + $0x11] sm:$0xff] }
  0x21   : > { %8091 = vmatmul.mubr.msk.bf16.gmra.mrb[4].mxu1 %vm383_vm1, %v9474_v44  ;;  %8078 = vmatprep.mubr.msk.bf16.mxu0 %vm383_vm1, %v9476_v45  ;;  %v1148_v14 = vld [vmem:[%s9409_s13 + $0xa] sm:$0xff]  ;;  %v885_v21 = vpack.c.bf16 %v854_v12, %v853_v11  ;;  %v1417_v25 = vld [vmem:[%s12577_s8 + $0x40] sm:$0xff]  ;;  %v1149_v28 = vld [vmem:[%s9409_s13 + $0x12] sm:$0xff]  ;;  %v9603_v35 = vpack.c.bf16 %v856_v27, %v855_v26 }
  0x22   : > { %8094 = vmatprep.mubr.msk.bf16.mxu1 %vm383_vm1, %v9478_v46  ;;  %v9563_v15 = vld [vmem:[%s12576_s7 + $0x48] sm:$0xff]  ;;  %v1179_v22 = vpack.c.bf16 %v1148_v14, %v1147_v13  ;;  %v1150_v29 = vld [vmem:[%s9409_s13 + $0x1a] sm:$0xff]  ;;  %v9600_v33 = vld [vmem:[%s12576_s7 + $0x50] sm:$0xff] }
  0x23   : > { %1468 = vperm.xlu1 %9292, %v1414_v47   ;;  %1463 = vperm.xlu0 %9291, %v1413_v48   ;;  %v1418_v24 = vld [vmem:[%s12577_s8 + $0x48] sm:$0xff]  ;;  %v9595_v30 = vld [vmem:[%s12576_s7 + $0x58] sm:$0xff]  ;;  %v9605_v36 = vpack.c.bf16 %v1150_v29, %v1149_v28  ;;  %v2384_v47 = vsel %vm432_vm0, %v9502_v52, 0  ;;  %v1419_v49 = vld [vmem:[%s12577_s8 + $0x50] sm:$0xff] }
  0x24   : > { %v857_v34 = vld [vmem:[%s9409_s13 + $0x21] sm:$0xff]  ;;  %v858_v37 = vld [vmem:[%s9409_s13 + $0x29] sm:$0xff]  ;;  %v1420_v48 = vld [vmem:[%s12577_s8 + $0x58] sm:$0xff] }
  0x25   : > { %v1151_v38 = vld [vmem:[%s9409_s13 + $0x22] sm:$0xff]  ;;  %v1152_v39 = vld [vmem:[%s9409_s13 + $0x2a] sm:$0xff]  ;;  %v9622_v50 = vpack.c.bf16 %v858_v37, %v857_v34  ;;  %v860_v52 = vld [vmem:[%s9409_s13 + $0x39] sm:$0xff] }
  0x26   : > { %v9624_v53 = vpack.c.bf16 %v1152_v39, %v1151_v38  ;;  %v859_v51 = vld [vmem:[%s9409_s13 + $0x31] sm:$0xff]  ;;  %v1154_v55 = vld [vmem:[%s9409_s13 + $0x3a] sm:$0xff]  ;;  %v862_v57 = vld [vmem:[%s9409_s13 + $0x49] sm:$0xff] }
  0x27   : > { %666 = vperm.xlu1 %9292, %v9517_v59   ;;  %661 = vperm.xlu0 %9291, %v9522_v60   ;;  %12761 = vst [vmem:[#allocation3_spill] sm:$0xff] %v9622_v50  ;;  %v1153_v54 = vld [vmem:[%s9409_s13 + $0x32] sm:$0xff]  ;;  %v861_v56 = vld [vmem:[%s9409_s13 + $0x41] sm:$0xff]  ;;  %v9652_v5 = vpack.c.bf16 %v860_v52, %v859_v51  ;;  %v866_v28 = vld [vmem:[%s9409_s13 + $0x69] sm:$0xff] }
  0x28   : > { %8079 = vmatmul.mubr.msk.bf16.gmra.mrb[8].mxu0 %vm383_vm1, %v9528_v61  ;;  %v1155_v58 = vld [vmem:[%s9409_s13 + $0x42] sm:$0xff]  ;;  %v9654_v6 = vpack.c.bf16 %v1154_v55, %v1153_v54  ;;  %v9656_v8 = vpack.c.bf16 %v862_v57, %v861_v56  ;;  %v863_v14 = vld [vmem:[%s9409_s13 + $0x51] sm:$0xff]  ;;  %v1158_v26 = vld [vmem:[%s9409_s13 + $0x5a] sm:$0xff] }
  0x29   : > { %8095 = vmatmul.mubr.msk.bf16.gmra.mrb[8].mxu1 %vm383_vm1, %v9530_v62  ;;  %8082 = vmatprep.mubr.msk.bf16.mxu0 %vm383_vm1, %v9532_v63  ;;  %v9646_v4 = vld [vmem:[%s12576_s7 + $0x60] sm:$0xff]  ;;  %12762 = vst [vmem:[#allocation4_spill] sm:$0xff] %v9652_v5  ;;  %v1422_v12 = vld [vmem:[%s12577_s8 + $0x68] sm:$0xff]  ;;  %v9697_v37 = vld [vmem:[%s12576_s7 + $0x78] sm:$0xff] }
  0x2a   : > { %8098 = vmatprep.mubr.msk.bf16.mxu1 %vm383_vm1, %v9534_v0  ;;  %12763 = vst [vmem:[#allocation5_spill] sm:$0xff] %v9656_v8  ;;  %v1421_v13 = vld [vmem:[%s12577_s8 + $0x60] sm:$0xff]  ;;  %v1160_v34 = vld [vmem:[%s9409_s13 + $0x6a] sm:$0xff]  ;;  %v1161_v55 = vld [vmem:[%s9409_s13 + $0x72] sm:$0xff] }
  0x2b   : > { %1478 = vperm.xlu1 %9292, %v1416_v2   ;;  %1473 = vperm.xlu0 %9291, %v1415_v3   ;;  %v1156_v2 = vld [vmem:[%s9409_s13 + $0x4a] sm:$0xff]  ;;  %v865_v27 = vld [vmem:[%s9409_s13 + $0x61] sm:$0xff]  ;;  %v868_v54 = vld [vmem:[%s9409_s13 + $0x79] sm:$0xff] }
  0x2c   : > { %v9641_v3 = vld [vmem:[%s12576_s7 + $0x68] sm:$0xff]  ;;  %v9658_v11 = vpack.c.bf16 %v1156_v2, %v1155_v58  ;;  %v9702_v38 = vld [vmem:[%s12576_s7 + $0x70] sm:$0xff]  ;;  %v1162_v56 = vld [vmem:[%s9409_s13 + $0x7a] sm:$0xff] }
  0x2d   : > { %v1159_v29 = vld [vmem:[%s9409_s13 + $0x62] sm:$0xff]  ;;  %v1423_v51 = vld [vmem:[%s12577_s8 + $0x70] sm:$0xff] }
  0x2e   : > { %v867_v52 = vld [vmem:[%s9409_s13 + $0x71] sm:$0xff]  ;;  %v869_v57 = vld [vmem:[%s9409_s13 + $0x81] sm:$0xff]  ;;  %v870_v58 = vld [vmem:[%s9409_s13 + $0x89] sm:$0xff] }
  0x2f   : > { %676 = vperm.xlu1 %9292, %v9563_v15   ;;  %671 = vperm.xlu0 %9291, %v9568_v16   ;;  %v1163_v2 = vld [vmem:[%s9409_s13 + $0x82] sm:$0xff] }
  0x30   : > { %8083 = vmatmul.mubr.msk.bf16.gmra.mrb[12].mxu0 %vm383_vm1, %v9570_v17 }
  0x31   : > { %8099 = vmatmul.mubr.msk.bf16.gmra.mrb[12].mxu1 %vm383_vm1, %v9572_v20  ;;  %8138 = vmatprep.mubr.msk.bf16.mxu0 %vm383_vm1, %v1179_v22  ;;  %v9677_v22 = vld [vmem:[%s12570_s1 + $0x8] sm:$0x3] }
  0x32   : > { %8104 = vmatprep.mubr.msk.bf16.mxu1 %vm383_vm1, %v885_v21  ;;  %v864_v21 = vld [vmem:[%s9409_s13 + $0x59] sm:$0xff] }
  0x33   : > { %1488 = vperm.xlu1 %9292, %v1418_v24   ;;  %1483 = vperm.xlu0 %9291, %v1417_v25   ;;  %v9682_v24 = vld [vmem:[%s12570_s1 + $0xc] sm:$0x3]  ;;  %v1157_v25 = vld [vmem:[%s9409_s13 + $0x52] sm:$0xff]  ;;  %v9708_v39 = vpack.c.bf16 %v864_v21, %v863_v14  ;;  %v9748_v14 = vld [vmem:[%s12576_s7 + $0x80] sm:$0xff]  ;;  %v9750_v21 = vpack.c.bf16 %v868_v54, %v867_v52 }
  0x34   : > { %v1166_v52 = vld [vmem:[%s9409_s13 + $0x9a] sm:$0xff] }
  0x35   : > { %12764 = vst [vmem:[#allocation6_spill] sm:$0xff] %v9708_v39  ;;  %12766 = vst [vmem:[#allocation8_spill] sm:$0xff] %v9750_v21  ;;  %v873_v54 = vld [vmem:[%s9409_s13 + $0xa1] sm:$0xff] }
  0x37   : > { %686 = vperm.xlu1 %9292, %v9595_v30   ;;  %681 = vperm.xlu0 %9291, %v9600_v33  }
  0x38   : > { %8139 = vmatmul.mubr.msk.bf16.vlgmr.msra.gmra.mrb[16].mxu0 %vm383_vm1, %v9605_v36 }
  0x39   : > { %8105 = vmatmul.mubr.msk.bf16.vlgmr.msra.gmra.mrb[16].mxu1 %vm383_vm1, %v9603_v35  ;;  %8239 = vmatpush3.bf16.msra.mxu0 %v2384_v47  ;;  %v9712_v47 = vpack.c.bf16 %v866_v28, %v865_v27  ;;  %v1426_v28 = vld [vmem:[%s12577_s8 + $0x88] sm:$0xff] }
  0x3a   : > { %8171 = vmatpush3.bf16.msra.mxu1 %v1764_v40  ;;  %8108 = vmatprep.mubr.msk.bf16.mxu1 %vm383_vm1, %v9622_v50  ;;  %v9710_v40 = vpack.c.bf16 %v1158_v26, %v1157_v25  ;;  %v9752_v25 = vpack.c.bf16 %v1162_v56, %v1161_v55  ;;  %v9754_v26 = vpack.c.bf16 %v870_v58, %v869_v57  ;;  %v874_v55 = vld [vmem:[%s9409_s13 + $0xa9] sm:$0xff]  ;;  %v9785_v58 = vld [vmem:[%s12576_s7 + $0x98] sm:$0xff] }
  0x3b   : > { %1498 = vperm.xlu1 %9292, %v1420_v48   ;;  %1493 = vperm.xlu0 %9291, %v1419_v49   ;;  %12765 = vst [vmem:[#allocation7_spill] sm:$0xff] %v9712_v47  ;;  %v9714_v48 = vpack.c.bf16 %v1160_v34, %v1159_v29  ;;  %v1424_v49 = vld [vmem:[%s12577_s8 + $0x78] sm:$0xff]  ;;  %v1425_v29 = vld [vmem:[%s12577_s8 + $0x80] sm:$0xff]  ;;  %v1168_v57 = vld [vmem:[%s9409_s13 + $0xaa] sm:$0xff] }
  0x3c   : > { %8142 = vmatprep.mubr.msk.bf16.mxu0 %vm383_vm1, %v9624_v53  ;;  %9265 = vmatprep.subr.msk.bf16.mxu1 %vm432_vm0, %v9677_v22  ;;  %12767 = vst [vmem:[#allocation9_spill] sm:$0xff] %v9754_v26  ;;  %v871_v34 = vld [vmem:[%s9409_s13 + $0x91] sm:$0xff]  ;;  %v1167_v56 = vld [vmem:[%s9409_s13 + $0xa2] sm:$0xff]  ;;  %12768 = vst [vmem:[#allocation10_spill] sm:$0xff] %v9785_v58 }
  0x3d   : > { %9267 = vmatprep.subr.msk.bf16.mxu0 %vm432_vm0, %v9682_v24  ;;  %v9869_v50 = vld [vmem:[%s12576_s7 + $0xb8] sm:$0xff] }
  0x3f   : > { %696 = vperm.xlu1 %9292, %v9641_v3   ;;  %691 = vperm.xlu0 %9291, %v9646_v4  }
  0x40   : > { %8143 = vmatmul.mubr.msk.bf16.gmra.mrb[20].mxu0 %vm383_vm1, %v9654_v6 }
  0x41   : > { %8109 = vmatmul.mubr.msk.bf16.gmra.mrb[20].mxu1 %vm383_vm1, %v9652_v5  ;;  %8146 = vmatprep.mubr.msk.bf16.mxu0 %vm383_vm1, %v9658_v11  ;;  %v1430_v5 = vld [vmem:[%s12577_s8 + $0xa8] sm:$0xff] }
  0x42   : > { %8112 = vmatprep.mubr.msk.bf16.mxu1 %vm383_vm1, %v9656_v8 }
  0x43   : > { %1508 = vperm.xlu1 %9292, %v1422_v12   ;;  %1503 = vperm.xlu0 %9291, %v1421_v13   ;;  %v1164_v12 = vld [vmem:[%s9409_s13 + $0x8a] sm:$0xff] }
  0x44   : > { %v9743_v13 = vld [vmem:[%s12576_s7 + $0x88] sm:$0xff]  ;;  %v9756_v27 = vpack.c.bf16 %v1164_v12, %v1163_v2  ;;  %v9790_v2 = vld [vmem:[%s12576_s7 + $0x90] sm:$0xff] }
  0x45   : > { %12769 = vst [vmem:[#allocation11_spill] sm:$0xff] %v9790_v2 }
  0x47   : > { %706 = vperm.xlu1 %9292, %v9697_v37   ;;  %701 = vperm.xlu0 %9291, %v9702_v38  }
  0x48   : > { %8147 = vmatmul.mubr.msk.bf16.gmra.mrb[24].mxu0 %vm383_vm1, %v9710_v40 }
  0x49   : > { %8113 = vmatmul.mubr.msk.bf16.gmra.mrb[24].mxu1 %vm383_vm1, %v9708_v39  ;;  %8150 = vmatprep.mubr.msk.bf16.mxu0 %vm383_vm1, %v9714_v48 }
  0x4a   : > { %8116 = vmatprep.mubr.msk.bf16.mxu1 %vm383_vm1, %v9712_v47  ;;  %v9827_v47 = vld [vmem:[%s12576_s7 + $0xa8] sm:$0xff] }
  0x4b   : > { %1518 = vperm.xlu1 %9292, %v1424_v49   ;;  %1513 = vperm.xlu0 %9291, %v1423_v51   ;;  %v872_v49 = vld [vmem:[%s9409_s13 + $0x99] sm:$0xff]  ;;  %12772 = vst [vmem:[#allocation14_spill] sm:$0xff] %v9827_v47 }
  0x4c   : > { %v1165_v51 = vld [vmem:[%s9409_s13 + $0x92] sm:$0xff]  ;;  %v9792_v12 = vpack.c.bf16 %v872_v49, %v871_v34 }
  0x4d   : > { %v1427_v34 = vld [vmem:[%s12577_s8 + $0x90] sm:$0xff] }
  0x4e   : > { %12770 = vst [vmem:[#allocation12_spill] sm:$0xff] %v9792_v12  ;;  %v875_v49 = vld [vmem:[%s9409_s13 + $0xb1] sm:$0xff] }
  0x4f   : > { %716 = vperm.xlu1 %9292, %v9743_v13   ;;  %711 = vperm.xlu0 %9291, %v9748_v14  }
  0x50   : > { %8151 = vmatmul.mubr.msk.bf16.gmra.mrb[28].mxu0 %vm383_vm1, %v9752_v25 }
  0x51   : > { %8117 = vmatmul.mubr.msk.bf16.gmra.mrb[28].mxu1 %vm383_vm1, %v9750_v21  ;;  %8154 = vmatprep.mubr.msk.bf16.mxu0 %vm383_vm1, %v9756_v27  ;;  %v1428_v21 = vld [vmem:[%s12577_s8 + $0x98] sm:$0xff] }
  0x52   : > { %8120 = vmatprep.mubr.msk.bf16.mxu1 %vm383_vm1, %v9754_v26  ;;  %v9798_v26 = vpack.c.bf16 %v1168_v57, %v1167_v56  ;;  %v878_v56 = vld [vmem:[%s9409_s13 + $0xc9] sm:$0xff] }
  0x53   : > { %1528 = vperm.xlu1 %9292, %v1426_v28   ;;  %1523 = vperm.xlu0 %9291, %v1425_v29   ;;  %v9794_v28 = vpack.c.bf16 %v1166_v52, %v1165_v51  ;;  %v9796_v29 = vpack.c.bf16 %v874_v55, %v873_v54  ;;  %v876_v51 = vld [vmem:[%s9409_s13 + $0xb9] sm:$0xff]  ;;  %v877_v55 = vld [vmem:[%s9409_s13 + $0xc1] sm:$0xff] }
  0x54   : > { %v1169_v52 = vld [vmem:[%s9409_s13 + $0xb2] sm:$0xff]  ;;  %v1170_v54 = vld [vmem:[%s9409_s13 + $0xba] sm:$0xff]  ;;  %v1171_v57 = vld [vmem:[%s9409_s13 + $0xc2] sm:$0xff]  ;;  %v9834_v39 = vpack.c.bf16 %v876_v51, %v875_v49 }
  0x55   : > { %12771 = vst [vmem:[#allocation13_spill] sm:$0xff] %v9796_v29  ;;  %v1429_v49 = vld [vmem:[%s12577_s8 + $0xa0] sm:$0xff] }
  0x56   : > { %12774 = vst [vmem:[#allocation16_spill] sm:$0xff] %v9834_v39  ;;  %v880_v51 = vld [vmem:[%s9409_s13 + $0xd9] sm:$0xff] }
  0x57   : > { %726 = vperm.xlu1 %9292, %v9785_v58   ;;  %721 = vperm.xlu0 %9291, %v9790_v2   ;;  %v1432_v2 = vld [vmem:[%s12577_s8 + $0xb8] sm:$0xff]  ;;  %v1431_v58 = vld [vmem:[%s12577_s8 + $0xb0] sm:$0xff] }
  0x58   : > { %8155 = vmatmul.mubr.msk.bf16.gmra.mrb[32].mxu0 %vm383_vm1, %v9794_v28 }
  0x59   : > { %8121 = vmatmul.mubr.msk.bf16.gmra.mrb[32].mxu1 %vm383_vm1, %v9792_v12  ;;  %8158 = vmatprep.mubr.msk.bf16.mxu0 %vm383_vm1, %v9798_v26  ;;  %v1172_v12 = vld [vmem:[%s9409_s13 + $0xca] sm:$0xff] }
  0x5a   : > { %8124 = vmatprep.mubr.msk.bf16.mxu1 %vm383_vm1, %v9796_v29  ;;  %v9832_v29 = vld [vmem:[%s12576_s7 + $0xa0] sm:$0xff]  ;;  %v9840_v8 = vpack.c.bf16 %v1172_v12, %v1171_v57  ;;  %v879_v12 = vld [vmem:[%s9409_s13 + $0xd1] sm:$0xff] }
  0x5b   : > { %1538 = vperm.xlu1 %9292, %v1428_v21   ;;  %1533 = vperm.xlu0 %9291, %v1427_v34   ;;  %12773 = vst [vmem:[#allocation15_spill] sm:$0xff] %v9832_v29  ;;  %v9836_v21 = vpack.c.bf16 %v1170_v54, %v1169_v52  ;;  %v9838_v34 = vpack.c.bf16 %v878_v56, %v877_v55  ;;  %v1173_v52 = vld [vmem:[%s9409_s13 + $0xd2] sm:$0xff]  ;;  %v1174_v54 = vld [vmem:[%s9409_s13 + $0xda] sm:$0xff]  ;;  %v882_v56 = vld [vmem:[%s9409_s13 + $0xe9] sm:$0xff] }
  0x5c   : > { %v881_v55 = vld [vmem:[%s9409_s13 + $0xe1] sm:$0xff] }
  0x5d   : > { %12775 = vst [vmem:[#allocation17_spill] sm:$0xff] %v9838_v34  ;;  %v1175_v57 = vld [vmem:[%s9409_s13 + $0xe2] sm:$0xff] }
  0x5f   : > { %736 = vperm.xlu1 %9292, %v9827_v47   ;;  %731 = vperm.xlu0 %9291, %v9832_v29   ;;  %v9876_v29 = vpack.c.bf16 %v880_v51, %v879_v12  ;;  %v884_v12 = vld [vmem:[%s9409_s13 + $0xf9] sm:$0xff] }
  0x60   : > { %8159 = vmatmul.mubr.msk.bf16.gmra.mrb[36].mxu0 %vm383_vm1, %v9836_v21  ;;  %v1177_v51 = vld [vmem:[%s9409_s13 + $0xf2] sm:$0xff] }
  0x61   : > { %8125 = vmatmul.mubr.msk.bf16.gmra.mrb[36].mxu1 %vm383_vm1, %v9834_v39  ;;  %8162 = vmatprep.mubr.msk.bf16.mxu0 %vm383_vm1, %v9840_v8  ;;  %v1176_v39 = vld [vmem:[%s9409_s13 + $0xea] sm:$0xff] }
  0x62   : > { %8128 = vmatprep.mubr.msk.bf16.mxu1 %vm383_vm1, %v9838_v34  ;;  %v9874_v34 = vld [vmem:[%s12576_s7 + $0xb0] sm:$0xff]  ;;  %v9882_v47 = vpack.c.bf16 %v1176_v39, %v1175_v57 }
  0x63   : > { %1548 = vperm.xlu1 %9292, %v1430_v5   ;;  %1543 = vperm.xlu0 %9291, %v1429_v49   ;;  %v9878_v5 = vpack.c.bf16 %v1174_v54, %v1173_v52  ;;  %v9880_v49 = vpack.c.bf16 %v882_v56, %v881_v55  ;;  %v883_v39 = vld [vmem:[%s9409_s13 + $0xf1] sm:$0xff]  ;;  %v1178_v52 = vld [vmem:[%s9409_s13 + $0xfa] sm:$0xff]  ;;  %v9907_v54 = vld [vmem:[%s12576_s7 + $0xc8] sm:$0xff] }
  0x64   : > { %v9912_v55 = vld [vmem:[%s12576_s7 + $0xc0] sm:$0xff]  ;;  %v9914_v56 = vpack.c.bf16 %v884_v12, %v883_v39  ;;  %v9916_v57 = vpack.c.bf16 %v1178_v52, %v1177_v51  ;;  %v9937_v39 = vld [vmem:[%s12576_s7 + $0xd8] sm:$0xff]  ;;  %v9942_v12 = vld [vmem:[%s12576_s7 + $0xd0] sm:$0xff] }
  0x65   : > { %v1436_v51 = vld [vmem:[%s12577_s8 + $0xd8] sm:$0xff]  ;;  %v1435_v52 = vld [vmem:[%s12577_s8 + $0xd0] sm:$0xff] }
  0x67   : > { %746 = vperm.xlu1 %9292, %v9869_v50   ;;  %741 = vperm.xlu0 %9291, %v9874_v34  }
  0x68   : > { %8163 = vmatmul.mubr.msk.bf16.gmra.mrb[40].mxu0 %vm383_vm1, %v9878_v5 }
  0x69   : > { %8129 = vmatmul.mubr.msk.bf16.gmra.mrb[40].mxu1 %vm383_vm1, %v9876_v29  ;;  %8166 = vmatprep.mubr.msk.bf16.mxu0 %vm383_vm1, %v9882_v47 }
  0x6a   : > { %8132 = vmatprep.mubr.msk.bf16.mxu1 %vm383_vm1, %v9880_v49 }
  0x6b   : > { %1558 = vperm.xlu1 %9292, %v1432_v2   ;;  %1553 = vperm.xlu0 %9291, %v1431_v58   ;;  %v1434_v58 = vld [vmem:[%s12577_s8 + $0xc8] sm:$0xff]  ;;  %v1433_v2 = vld [vmem:[%s12577_s8 + $0xc0] sm:$0xff] }
  0x6f   : > { %756 = vperm.xlu1 %9292, %v9907_v54   ;;  %751 = vperm.xlu0 %9291, %v9912_v55  }
  0x70   : > { %8167 = vmatmul.mubr.msk.bf16.gmra.mrb[44].mxu0 %vm383_vm1, %v9916_v57 }
  0x71   : > { %8133 = vmatmul.mubr.msk.bf16.gmra.mrb[44].mxu1 %vm383_vm1, %v9914_v56  ;;  %8240 = vmatprep.mubr.msk.bf16.mxu0 %vm383_vm1, %v9605_v36  ;;  %v2710_v36 = vsel %vm432_vm0, %v9682_v24, 0  ;;  %v9968_v24 = vld [vmem:[%s12570_s1 + $0x10] sm:$0x3] }
  0x72   : > { %8172 = vmatprep.mubr.msk.bf16.mxu1 %vm383_vm1, %v9419_v19  ;;  %v2090_v19 = vsel %vm432_vm0, %v9677_v22, 0  ;;  %v9963_v22 = vld [vmem:[%s12570_s1 + $0xe] sm:$0x3] }
  0x73   : > { %1568 = vperm.xlu1 %9292, %v1434_v58   ;;  %1563 = vperm.xlu0 %9291, %v1433_v2   ;;  %v9973_v58 = vld [vmem:[%s12576_s7 + $0xe8] sm:$0xff] }
  0x74   : > { %v1438_v2 = vld [vmem:[%s12577_s8 + $0xe8] sm:$0xff] }
  0x77   : > { %766 = vperm.xlu1 %9292, %v9937_v39   ;;  %761 = vperm.xlu0 %9291, %v9942_v12  }
  0x78   : > { %8241 = vmatmul.mubr.msk.bf16.vlgmr.msra.gmra.mrb[48].mxu0 %vm383_vm1, %v9624_v53  ;;  %v9978_v53 = vld [vmem:[%s12576_s7 + $0xe0] sm:$0xff] }
  0x79   : > { %8173 = vmatmul.mubr.msk.bf16.vlgmr.msra.gmra.mrb[48].mxu1 %vm383_vm1, %v9442_v31  ;;  %8273 = vmatpush3.bf16.msra.mxu0 %v2710_v36  ;;  %v10010_v36 = vld [vmem:[%s12576_s7 + $0xf0] sm:$0xff] }
  0x7a   : > { %8205 = vmatpush3.bf16.msra.mxu1 %v2090_v19  ;;  %8176 = vmatprep.mubr.msk.bf16.mxu1 %vm383_vm1, %v9472_v43  ;;  %v1437_v19 = vld [vmem:[%s12577_s8 + $0xe0] sm:$0xff] }
  0x7b   : > { %1578 = vperm.xlu1 %9292, %v1436_v51   ;;  %1573 = vperm.xlu0 %9291, %v1435_v52  }
  0x7c   : > { %8244 = vmatprep.mubr.msk.bf16.mxu0 %vm383_vm1, %v9654_v6  ;;  %9268 = vmatprep.subr.msk.bf16.mxu1 %vm432_vm0, %v9963_v22  ;;  %v1439_v6 = vld [vmem:[%s12577_s8 + $0xf0] sm:$0xff] }
  0x7d   : > { %9269 = vmatprep.subr.msk.bf16.mxu0 %vm432_vm0, %v9968_v24 }
  0x7f   : > { %776 = vperm.xlu1 %9292, %v9973_v58   ;;  %771 = vperm.xlu0 %9291, %v9978_v53  }
  0x80   : > { %8245 = vmatmul.mubr.msk.bf16.gmra.mrb[52].mxu0 %vm383_vm1, %v9658_v11  ;;  %v1440_v11 = vld [vmem:[%s12577_s8 + $0xf8] sm:$0xff] }
  0x81   : > { %8177 = vmatmul.mubr.msk.bf16.gmra.mrb[52].mxu1 %vm383_vm1, %v9476_v45  ;;  %8248 = vmatprep.mubr.msk.bf16.mxu0 %vm383_vm1, %v9710_v40  ;;  %v10019_v40 = vld [vmem:[%s12576_s7 + $0xf8] sm:$0xff] }
  0x82   : > { %8180 = vmatprep.mubr.msk.bf16.mxu1 %vm383_vm1, %v9528_v61 }
  0x83   : > { %1588 = vperm.xlu1 %9292, %v1438_v2   ;;  %1583 = vperm.xlu0 %9291, %v1437_v19   ;;  %v2627_v2 = vld [vmem:[%s9409_s13 + $0xa0] sm:$0xff] }
  0x84   : > { %v4773_v19 = vld [vmem:[%s12577_s8] sm:$0xff] }
  0x87   : > { %1593 = vperm.xlu1 %9292, %v1439_v6   ;;  %781 = vperm.xlu0 %9291, %v10010_v36  }
  0x88   : > { %8249 = vmatmul.mubr.msk.bf16.gmra.mrb[56].mxu0 %vm383_vm1, %v9714_v48 }
  0x89   : > { %8181 = vmatmul.mubr.msk.bf16.gmra.mrb[56].mxu1 %vm383_vm1, %v9532_v63  ;;  %8252 = vmatprep.mubr.msk.bf16.mxu0 %vm383_vm1, %v9752_v25  ;;  %v12795_v25 = vld [vmem:[#allocation4_spill] sm:$0xff] }
  0x8a   : > { %8184 = vmatprep.mubr.msk.bf16.mxu1 %vm383_vm1, %v9570_v17 }
  0x8b   : > { %1598 = vperm.xlu1 %9292, %v1440_v11   ;;  %786 = vperm.xlu0 %9291, %v10019_v40  }
  0x8e   : > { %v10030_v51 = vpop.permute.xlu1 %1443  ;;  %v10032_v52 = vpop.permute.xlu0 %631 }
  0x8f   : > { %12776 = vst [vmem:[#allocation18_spill] sm:$0xff] %v10030_v51  ;;  %12777 = vst [vmem:[#allocation19_spill] sm:$0xff] %v10032_v52  ;;  %4000 = vperm.xlu1 %9292, %v9385_v7   ;;  %3995 = vperm.xlu0 %9291, %v9367_v1  }
  0x90   : > { %8253 = vmatmul.mubr.msk.bf16.gmra.mrb[60].mxu0 %vm383_vm1, %v9756_v27  ;;  %v12796_v27 = vld [vmem:[#allocation5_spill] sm:$0xff] }
  0x91   : > { %8185 = vmatmul.mubr.msk.bf16.gmra.mrb[60].mxu1 %vm383_vm1, %v9417_v18  ;;  %8256 = vmatprep.mubr.msk.bf16.mxu0 %vm383_vm1, %v9794_v28  ;;  %v12797_v28 = vld [vmem:[#allocation6_spill] sm:$0xff] }
  0x92   : > { %v10040_v63 = vpop.permute.xlu1 %1448  ;;  %v10042_v17 = vpop.permute.xlu0 %636  ;;  %8188 = vmatprep.mubr.msk.bf16.mxu1 %vm383_vm1, %v9426_v23 }
  0x93   : > { %12778 = vst [vmem:[#allocation20_spill] sm:$0xff] %v10040_v63  ;;  %12779 = vst [vmem:[#allocation21_spill] sm:$0xff] %v10042_v17  ;;  %4010 = vperm.xlu1 %9292, %v9399_v9   ;;  %4005 = vperm.xlu0 %9291, %v9404_v10  }
  0x96   : > { %v10050_v1 = vpop.permute.xlu1 %646  ;;  %v10052_v7 = vpop.permute.xlu0 %641 }
  0x97   : > { %12780 = vst [vmem:[#allocation22_spill] sm:$0xff] %v10052_v7  ;;  %4020 = vperm.xlu1 %9292, %v9461_v41   ;;  %4015 = vperm.xlu0 %9291, %v9466_v42  }
  0x98   : > { %8257 = vmatmul.mubr.msk.bf16.gmra.mrb[64].mxu0 %vm383_vm1, %v9798_v26 }
  0x99   : > { %8189 = vmatmul.mubr.msk.bf16.gmra.mrb[64].mxu1 %vm383_vm1, %v9444_v32  ;;  %8260 = vmatprep.mubr.msk.bf16.mxu0 %vm383_vm1, %v9836_v21  ;;  %v2622_v21 = vld [vmem:[%s9409_s13 + $0x78] sm:$0xff] }
  0x9a   : > { %v10060_v18 = vpop.permute.xlu1 %1458  ;;  %v10062_v23 = vpop.permute.xlu0 %1453  ;;  %8192 = vmatprep.mubr.msk.bf16.mxu1 %vm383_vm1, %v9474_v44 }
  0x9b   : > { %12781 = vst [vmem:[#allocation23_spill] sm:$0xff] %v10060_v18  ;;  %12782 = vst [vmem:[#allocation24_spill] sm:$0xff] %v10062_v23  ;;  %4030 = vperm.xlu1 %9292, %v9517_v59   ;;  %4025 = vperm.xlu0 %9291, %v9522_v60   ;;  %v1696_v59 = vld [vmem:[%s9409_s13 + $0x108] sm:$0xff] }
  0x9c   : > { %v2315_v60 = vld [vmem:[%s9409_s13 + $0x102] sm:$0xff] }
  0x9e   : > { %v10070_v9 = vpop.permute.xlu1 %656  ;;  %v10072_v10 = vpop.permute.xlu0 %651 }
  0x9f   : > { %12783 = vst [vmem:[#allocation25_spill] sm:$0xff] %v10070_v9  ;;  %4040 = vperm.xlu1 %9292, %v9563_v15   ;;  %4035 = vperm.xlu0 %9291, %v9568_v16  }
  0xa0   : > { %8261 = vmatmul.mubr.msk.bf16.gmra.mrb[68].mxu0 %vm383_vm1, %v9840_v8  ;;  %v12790_v8 = vld [vmem:[#allocation14_spill] sm:$0xff] }
  0xa1   : > { %8193 = vmatmul.mubr.msk.bf16.gmra.mrb[68].mxu1 %vm383_vm1, %v9478_v46  ;;  %8264 = vmatprep.mubr.msk.bf16.mxu0 %vm383_vm1, %v9878_v5  ;;  %v1695_v46 = vld [vmem:[%s9409_s13 + $0x100] sm:$0xff]  ;;  %v2624_v5 = vld [vmem:[%s9409_s13 + $0x88] sm:$0xff] }
  0xa2   : > { %8196 = vmatprep.mubr.msk.bf16.mxu1 %vm383_vm1, %v9530_v62  ;;  %v10084_v32 = vpop.permute.xlu1 %1468  ;;  %v10086_v41 = vpop.permute.xlu0 %1463  ;;  %v2316_v62 = vld [vmem:[%s9409_s13 + $0x10a] sm:$0xff]  ;;  %v10110_v15 = vpack.c.bf16 %v1696_v59, %v1695_v46 }
  0xa3   : > { %12784 = vst [vmem:[#allocation26_spill] sm:$0xff] %v10084_v32  ;;  %12785 = vst [vmem:[#allocation27_spill] sm:$0xff] %v10086_v41  ;;  %4050 = vperm.xlu1 %9292, %v9595_v30   ;;  %4045 = vperm.xlu0 %9291, %v9600_v33   ;;  %v12789_v33 = vld [vmem:[#allocation11_spill] sm:$0xff]  ;;  %v4775_v59 = vld [vmem:[%s12577_s8 + $0x10] sm:$0xff] }
  0xa6   : > { %v10092_v42 = vpop.permute.xlu1 %666  ;;  %v10094_v44 = vpop.permute.xlu0 %661 }
  0xa7   : > { %4060 = vperm.xlu1 %9292, %v9641_v3   ;;  %4055 = vperm.xlu0 %9291, %v9646_v4  }
  0xa8   : > { %8265 = vmatmul.mubr.msk.bf16.gmra.mrb[72].mxu0 %vm383_vm1, %v9882_v47 }
  0xa9   : > { %8197 = vmatmul.mubr.msk.bf16.gmra.mrb[72].mxu1 %vm383_vm1, %v9534_v0  ;;  %8268 = vmatprep.mubr.msk.bf16.mxu0 %vm383_vm1, %v9916_v57  ;;  %v2332_v0 = vpack.c.bf16 %v2316_v62, %v2315_v60  ;;  %v12804_v60 = vld [vmem:[#allocation9_spill] sm:$0xff]  ;;  %v12805_v62 = vld [vmem:[#allocation12_spill] sm:$0xff] }
  0xaa   : > { %8200 = vmatprep.mubr.msk.bf16.mxu1 %vm383_vm1, %v9572_v20  ;;  %v10112_v16 = vpop.permute.xlu1 %1478  ;;  %v10114_v30 = vpop.permute.xlu0 %1473  ;;  %v12788_v20 = vld [vmem:[#allocation10_spill] sm:$0xff] }
  0xab   : > { %4070 = vperm.xlu1 %9292, %v9697_v37   ;;  %4065 = vperm.xlu0 %9291, %v9702_v38   ;;  %12786 = vst [vmem:[#allocation28_spill] sm:$0xff] %v10112_v16  ;;  %12787 = vst [vmem:[#allocation29_spill] sm:$0xff] %v10114_v30  ;;  %v12791_v37 = vld [vmem:[#allocation15_spill] sm:$0xff] }
  0xac   : > { %v12792_v38 = vld [vmem:[#allocation3_spill] sm:$0xff] }
  0xae   : > { %v10127_v3 = vpop.permute.xlu1 %676  ;;  %v10129_v4 = vpop.permute.xlu0 %671 }
  0xaf   : > { %4080 = vperm.xlu1 %9292, %v9743_v13   ;;  %4075 = vperm.xlu0 %9291, %v9748_v14   ;;  %v2619_v13 = vld [vmem:[%s9409_s13 + $0x60] sm:$0xff]  ;;  %v2620_v14 = vld [vmem:[%s9409_s13 + $0x68] sm:$0xff] }
  0xb0   : > { %8269 = vmatmul.mubr.msk.bf16.gmra.mrb[76].mxu0 %vm383_vm1, %v2332_v0  ;;  %v2629_v0 = vld [vmem:[%s9409_s13 + $0xb0] sm:$0xff] }
  0xb1   : > { %8201 = vmatmul.mubr.msk.bf16.gmra.mrb[76].mxu1 %vm383_vm1, %v10110_v15  ;;  %8274 = vmatprep.mubr.msk.bf16.mxu0 %vm383_vm1, %v9442_v31  ;;  %v3330_v31 = vsel %vm432_vm0, %v9968_v24, 0  ;;  %v2626_v24 = vld [vmem:[%s9409_s13 + $0x98] sm:$0xff] }
  0xb2   : > { %8206 = vmatprep.mubr.msk.bf16.mxu1 %vm383_vm1, %v9603_v35  ;;  %v3036_v35 = vsel %vm432_vm0, %v9963_v22, 0  ;;  %v10141_v47 = vpop.permute.xlu1 %1488  ;;  %v10143_v48 = vpop.permute.xlu0 %1483  ;;  %v12800_v22 = vld [vmem:[#allocation7_spill] sm:$0xff] }
  0xb3   : > { %4090 = vperm.xlu1 %9292, %v12788_v20   ;;  %4085 = vperm.xlu0 %9291, %v12789_v33   ;;  %12793 = vst [vmem:[#allocation10_spill] sm:$0xff] %v10141_v47  ;;  %12794 = vst [vmem:[#allocation11_spill] sm:$0xff] %v10143_v48  ;;  %v2630_v20 = vld [vmem:[%s9409_s13 + $0xb8] sm:$0xff] }
  0xb6   : > { %v10155_v26 = vpop.permute.xlu1 %686 }
  0xb7   : > { %4100 = vperm.xlu1 %9292, %v12790_v8   ;;  %4095 = vperm.xlu0 %9291, %v12791_v37   ;;  %v2631_v37 = vld [vmem:[%s9409_s13 + $0xc0] sm:$0xff] }
  0xb8   : > { %8275 = vmatmul.mubr.msk.bf16.vlgmr.msra.gmra.mrb[80].mxu0 %vm383_vm1, %v9472_v43  ;;  %v2647_v43 = vpack.c.bf16 %v2620_v14, %v2619_v13  ;;  %v2652_v13 = vpack.c.bf16 %v2630_v20, %v2629_v0  ;;  %v4788_v20 = vld [vmem:[%s12577_s8 + $0x78] sm:$0xff] }
  0xb9   : > { %8207 = vmatmul.mubr.msk.bf16.vlgmr.msra.gmra.mrb[16].mxu1 %vm383_vm1, %v12792_v38  ;;  %8341 = vmatpush3.bf16.msra.mxu0 %v3330_v31  ;;  %v4778_v31 = vld [vmem:[%s12577_s8 + $0x28] sm:$0xff]  ;;  %v4777_v38 = vld [vmem:[%s12577_s8 + $0x20] sm:$0xff] }
  0xba   : > { %8307 = vmatpush3.bf16.msra.mxu1 %v3036_v35  ;;  %8210 = vmatprep.mubr.msk.bf16.mxu1 %vm383_vm1, %v12795_v25  ;;  %v2632_v35 = vld [vmem:[%s9409_s13 + $0xc8] sm:$0xff]  ;;  %v4780_v25 = vld [vmem:[%s12577_s8 + $0x38] sm:$0xff] }
  0xbb   : > { %4110 = vperm.xlu1 %9292, %v9869_v50   ;;  %4105 = vperm.xlu0 %9291, %v9874_v34   ;;  %v10157_v50 = vpop.permute.xlu0 %681  ;;  %v2623_v34 = vld [vmem:[%s9409_s13 + $0x80] sm:$0xff]  ;;  %v2653_v14 = vpack.c.bf16 %v2632_v35, %v2631_v37  ;;  %v4787_v37 = vld [vmem:[%s12577_s8 + $0x70] sm:$0xff] }
  0xbc   : > { %8278 = vmatprep.mubr.msk.bf16.mxu0 %vm383_vm1, %v9476_v45  ;;  %v2621_v45 = vld [vmem:[%s9409_s13 + $0x70] sm:$0xff]  ;;  %v2021_v35 = vld [vmem:[%s9409_s13 + $0x101] sm:$0xff] }
  0xbf   : > { %4120 = vperm.xlu1 %9292, %v9907_v54   ;;  %4115 = vperm.xlu0 %9291, %v9912_v55   ;;  %v2648_v54 = vpack.c.bf16 %v2622_v21, %v2621_v45  ;;  %v2649_v55 = vpack.c.bf16 %v2624_v5, %v2623_v34  ;;  %v10174_v57 = vpop.permute.xlu0 %1493  ;;  %v12810_v45 = vld [vmem:[#allocation13_spill] sm:$0xff]  ;;  %v12811_v21 = vld [vmem:[#allocation16_spill] sm:$0xff] }
  0xc0   : > { %8279 = vmatmul.mubr.msk.bf16.gmra.mrb[84].mxu0 %vm383_vm1, %v9528_v61  ;;  %v10172_v61 = vpop.permute.xlu1 %1498  ;;  %12799 = vst [vmem:[#allocation15_spill] sm:$0xff] %v10174_v57  ;;  %v2633_v34 = vld [vmem:[%s9409_s13 + $0xd0] sm:$0xff]  ;;  %v2634_v5 = vld [vmem:[%s9409_s13 + $0xd8] sm:$0xff] }
  0xc1   : > { %8211 = vmatmul.mubr.msk.bf16.gmra.mrb[20].mxu1 %vm383_vm1, %v12796_v27  ;;  %8282 = vmatprep.mubr.msk.bf16.mxu0 %vm383_vm1, %v2647_v43  ;;  %12798 = vst [vmem:[#allocation14_spill] sm:$0xff] %v10172_v61  ;;  %v4779_v43 = vld [vmem:[%s12577_s8 + $0x30] sm:$0xff] }
  0xc2   : > { %8214 = vmatprep.mubr.msk.bf16.mxu1 %vm383_vm1, %v12797_v28 }
  0xc3   : > { %4130 = vperm.xlu1 %9292, %v9937_v39   ;;  %4125 = vperm.xlu0 %9291, %v9942_v12   ;;  %v12801_v39 = vld [vmem:[#allocation8_spill] sm:$0xff]  ;;  %v10198_v11 = vpop.permute.xlu0 %691 }
  0xc4   : > { %v2625_v12 = vld [vmem:[%s9409_s13 + $0x90] sm:$0xff]  ;;  %v10196_v6 = vpop.permute.xlu1 %696  ;;  %12803 = vst [vmem:[#allocation4_spill] sm:$0xff] %v10198_v11 }
  0xc5   : > { %12802 = vst [vmem:[#allocation3_spill] sm:$0xff] %v10196_v6  ;;  %v2650_v46 = vpack.c.bf16 %v2626_v24, %v2625_v12  ;;  %v2654_v12 = vpack.c.bf16 %v2634_v5, %v2633_v34 }
  0xc7   : > { %4140 = vperm.xlu1 %9292, %v9973_v58   ;;  %4135 = vperm.xlu0 %9291, %v9978_v53   ;;  %v2628_v58 = vld [vmem:[%s9409_s13 + $0xa8] sm:$0xff]  ;;  %v10216_v8 = vpop.permute.xlu0 %1503 }
  0xc8   : > { %8283 = vmatmul.mubr.msk.bf16.gmra.mrb[88].mxu0 %vm383_vm1, %v2648_v54  ;;  %v4774_v53 = vld [vmem:[%s12577_s8 + $0x8] sm:$0xff]  ;;  %v10214_v33 = vpop.permute.xlu1 %1508  ;;  %12807 = vst [vmem:[#allocation6_spill] sm:$0xff] %v10216_v8  ;;  %v2635_v54 = vld [vmem:[%s9409_s13 + $0xe0] sm:$0xff] }
  0xc9   : > { %8215 = vmatmul.mubr.msk.bf16.gmra.mrb[24].mxu1 %vm383_vm1, %v12800_v22  ;;  %8286 = vmatprep.mubr.msk.bf16.mxu0 %vm383_vm1, %v2649_v55  ;;  %12806 = vst [vmem:[#allocation5_spill] sm:$0xff] %v10214_v33  ;;  %v2636_v55 = vld [vmem:[%s9409_s13 + $0xe8] sm:$0xff] }
  0xca   : > { %8218 = vmatprep.mubr.msk.bf16.mxu1 %vm383_vm1, %v12801_v39  ;;  %v4782_v22 = vld [vmem:[%s12577_s8 + $0x48] sm:$0xff]  ;;  %v4781_v39 = vld [vmem:[%s12577_s8 + $0x40] sm:$0xff]  ;;  %v2655_v24 = vpack.c.bf16 %v2636_v55, %v2635_v54 }
  0xcb   : > { %4150 = vperm.xlu1 %9292, %v10019_v40   ;;  %4145 = vperm.xlu0 %9291, %v10010_v36   ;;  %v2651_v40 = vpack.c.bf16 %v2628_v58, %v2627_v2  ;;  %v4776_v36 = vld [vmem:[%s12577_s8 + $0x18] sm:$0xff]  ;;  %v10234_v28 = vpop.permute.xlu0 %701 }
  0xcc   : > { %v10232_v27 = vpop.permute.xlu1 %706  ;;  %12809 = vst [vmem:[#allocation8_spill] sm:$0xff] %v10234_v28 }
  0xcd   : > { %12808 = vst [vmem:[#allocation7_spill] sm:$0xff] %v10232_v27 }
  0xcf   : > { %4812 = vperm.xlu1 %9292, %v4774_v53   ;;  %4807 = vperm.xlu0 %9291, %v4773_v19   ;;  %v10254_v58 = vpop.permute.xlu0 %1513  ;;  %v4784_v53 = vld [vmem:[%s12577_s8 + $0x58] sm:$0xff]  ;;  %v4783_v19 = vld [vmem:[%s12577_s8 + $0x50] sm:$0xff] }
  0xd0   : > { %8287 = vmatmul.mubr.msk.bf16.gmra.mrb[92].mxu0 %vm383_vm1, %v2650_v46  ;;  %v10252_v2 = vpop.permute.xlu1 %1518  ;;  %12813 = vst [vmem:[#allocation12_spill] sm:$0xff] %v10254_v58  ;;  %v12814_v46 = vld [vmem:[#allocation17_spill] sm:$0xff] }
  0xd1   : > { %8219 = vmatmul.mubr.msk.bf16.gmra.mrb[28].mxu1 %vm383_vm1, %v12804_v60  ;;  %8290 = vmatprep.mubr.msk.bf16.mxu0 %vm383_vm1, %v2651_v40  ;;  %12812 = vst [vmem:[#allocation9_spill] sm:$0xff] %v10252_v2  ;;  %v2637_v40 = vld [vmem:[%s9409_s13 + $0xf0] sm:$0xff]  ;;  %v4785_v60 = vld [vmem:[%s12577_s8 + $0x60] sm:$0xff] }
  0xd2   : > { %8222 = vmatprep.mubr.msk.bf16.mxu1 %vm383_vm1, %v12805_v62 }
  0xd3   : > { %4822 = vperm.xlu1 %9292, %v4776_v36   ;;  %4817 = vperm.xlu0 %9291, %v4775_v59   ;;  %v2638_v36 = vld [vmem:[%s9409_s13 + $0xf8] sm:$0xff]  ;;  %v4786_v59 = vld [vmem:[%s12577_s8 + $0x68] sm:$0xff]  ;;  %v10278_v62 = vpop.permute.xlu0 %711 }
  0xd4   : > { %12816 = vst [vmem:[#allocation16_spill] sm:$0xff] %v10278_v62  ;;  %v2656_v0 = vpack.c.bf16 %v2638_v36, %v2637_v40  ;;  %v4792_v36 = vld [vmem:[%s12577_s8 + $0x98] sm:$0xff] }
  0xd7   : > { %4832 = vperm.xlu1 %9292, %v4778_v31   ;;  %4827 = vperm.xlu0 %9291, %v4777_v38   ;;  %v2022_v31 = vld [vmem:[%s9409_s13 + $0x109] sm:$0xff] }
  0xd8   : > { %8291 = vmatmul.mubr.msk.bf16.gmra.mrb[96].mxu0 %vm383_vm1, %v2652_v13  ;;  %v2641_v38 = vld [vmem:[%s9409_s13 + $0x110] sm:$0xff]  ;;  %v2642_v13 = vld [vmem:[%s9409_s13 + $0x118] sm:$0xff] }
  0xd9   : > { %8223 = vmatmul.mubr.msk.bf16.gmra.mrb[32].mxu1 %vm383_vm1, %v12810_v45  ;;  %8294 = vmatprep.mubr.msk.bf16.mxu0 %vm383_vm1, %v2653_v14  ;;  %v2937_v14 = vld [vmem:[%s9409_s13 + $0x21] sm:$0xff] }
  0xda   : > { %8226 = vmatprep.mubr.msk.bf16.mxu1 %vm383_vm1, %v12811_v21  ;;  %v3231_v45 = vld [vmem:[%s9409_s13 + $0x22] sm:$0xff]  ;;  %v3232_v21 = vld [vmem:[%s9409_s13 + $0x2a] sm:$0xff] }
  0xdb   : > { %4842 = vperm.xlu1 %9292, %v4780_v25   ;;  %4837 = vperm.xlu0 %9291, %v4779_v43   ;;  %v10300_v43 = vpop.permute.xlu0 %1523 }
  0xdc   : > { %12818 = vst [vmem:[#allocation30_spill] sm:$0xff] %v10300_v43 }
  0xdf   : > { %4852 = vperm.xlu1 %9292, %v4782_v22   ;;  %4847 = vperm.xlu0 %9291, %v4781_v39   ;;  %v10319_v22 = vpack.c.bf16 %v2022_v31, %v2021_v35  ;;  %v2658_v39 = vpack.c.bf16 %v2642_v13, %v2641_v38  ;;  %v2941_v35 = vld [vmem:[%s9409_s13 + $0x41] sm:$0xff]  ;;  %v10347_v38 = vpop.permute.xlu0 %721  ;;  %v2942_v13 = vld [vmem:[%s9409_s13 + $0x49] sm:$0xff] }
  0xe0   : > { %8295 = vmatmul.mubr.msk.bf16.gmra.mrb[100].mxu0 %vm383_vm1, %v2654_v12  ;;  %12825 = vst [vmem:[#allocation37_spill] sm:$0xff] %v10347_v38 }
  0xe1   : > { %8227 = vmatmul.mubr.msk.bf16.gmra.mrb[36].mxu1 %vm383_vm1, %v12814_v46  ;;  %8298 = vmatprep.mubr.msk.bf16.mxu0 %vm383_vm1, %v2655_v24  ;;  %12821 = vst [vmem:[#allocation33_spill] sm:$0xff] %v10319_v22 }
  0xe2   : > { %8230 = vmatprep.mubr.msk.bf16.mxu1 %vm383_vm1, %v9876_v29  ;;  %v10276_v29 = vpop.permute.xlu1 %716 }
  0xe3   : > { %4862 = vperm.xlu1 %9292, %v4784_v53   ;;  %4857 = vperm.xlu0 %9291, %v4783_v19   ;;  %12815 = vst [vmem:[#allocation13_spill] sm:$0xff] %v10276_v29  ;;  %v3263_v19 = vpack.c.bf16 %v3232_v21, %v3231_v45 }
  0xe6   : > { %v10298_v25 = vpop.permute.xlu1 %1528 }
  0xe7   : > { %4872 = vperm.xlu1 %9292, %v4786_v59   ;;  %4867 = vperm.xlu0 %9291, %v4785_v60   ;;  %12817 = vst [vmem:[#allocation17_spill] sm:$0xff] %v10298_v25  ;;  %v4791_v59 = vld [vmem:[%s12577_s8 + $0x90] sm:$0xff]  ;;  %v2971_v25 = vpack.c.bf16 %v2942_v13, %v2941_v35  ;;  %v3238_v13 = vld [vmem:[%s9409_s13 + $0x5a] sm:$0xff] }
  0xe8   : > { %8299 = vmatmul.mubr.msk.bf16.gmra.mrb[104].mxu0 %vm383_vm1, %v2656_v0  ;;  %v2939_v60 = vld [vmem:[%s9409_s13 + $0x31] sm:$0xff]  ;;  %v2940_v0 = vld [vmem:[%s9409_s13 + $0x39] sm:$0xff] }
  0xe9   : > { %8231 = vmatmul.mubr.msk.bf16.gmra.mrb[40].mxu1 %vm383_vm1, %v9880_v49  ;;  %8302 = vmatprep.mubr.msk.bf16.mxu0 %vm383_vm1, %v10110_v15  ;;  %v2938_v49 = vld [vmem:[%s9409_s13 + $0x29] sm:$0xff]  ;;  %v4789_v15 = vld [vmem:[%s12577_s8 + $0x80] sm:$0xff]  ;;  %v3237_v35 = vld [vmem:[%s9409_s13 + $0x52] sm:$0xff] }
  0xea   : > { %8234 = vmatprep.mubr.msk.bf16.mxu1 %vm383_vm1, %v9914_v56  ;;  %v4790_v56 = vld [vmem:[%s12577_s8 + $0x88] sm:$0xff]  ;;  %v2969_v53 = vpack.c.bf16 %v2938_v49, %v2937_v14  ;;  %v10345_v31 = vpop.permute.xlu1 %726 }
  0xeb   : > { %4882 = vperm.xlu1 %9292, %v4788_v20   ;;  %4877 = vperm.xlu0 %9291, %v4787_v37   ;;  %v10305_v34 = vpop.f32.mrb[0].mxu0  ;;  %v3233_v20 = vld [vmem:[%s9409_s13 + $0x32] sm:$0xff]  ;;  %v3234_v37 = vld [vmem:[%s9409_s13 + $0x3a] sm:$0xff]  ;;  %12824 = vst [vmem:[#allocation36_spill] sm:$0xff] %v10345_v31  ;;  %v3235_v14 = vld [vmem:[%s9409_s13 + $0x42] sm:$0xff] }
  0xec   : > { %v10307_v5 = vpop.f32.mrb[0].mxu1  ;;  %v10315_v54 = vpop.f32.mrb[1].mxu0  ;;  %v3236_v49 = vld [vmem:[%s9409_s13 + $0x4a] sm:$0xff] }
  0xed   : > { %12819 = vst [vmem:[#allocation31_spill] sm:$0xff] %v10307_v5  ;;  %v10317_v55 = vpop.f32.mrb[1].mxu1  ;;  %v10321_v12 = vpop.f32.mrb[2].mxu0  ;;  %v3265_v29 = vpack.c.bf16 %v3236_v49, %v3235_v14  ;;  %v2945_v14 = vld [vmem:[%s9409_s13 + $0x61] sm:$0xff] }
  0xee   : > { %12820 = vst [vmem:[#allocation32_spill] sm:$0xff] %v10317_v55  ;;  %v10323_v24 = vpop.f32.mrb[2].mxu1  ;;  %v10325_v46 = vpop.f32.mrb[3].mxu0 }
  0xef   : > { %12822 = vst [vmem:[#allocation34_spill] sm:$0xff] %v10323_v24  ;;  %4892 = vperm.xlu1 %9292, %v4790_v56   ;;  %4887 = vperm.xlu0 %9291, %v4789_v15   ;;  %v10327_v40 = vpop.f32.mrb[3].mxu1  ;;  %v4794_v56 = vld [vmem:[%s12577_s8 + $0xa8] sm:$0xff]  ;;  %v4793_v15 = vld [vmem:[%s12577_s8 + $0xa0] sm:$0xff]  ;;  %v10389_v49 = vpop.permute.xlu1 %1538 }
  0xf0   : > { %12823 = vst [vmem:[#allocation35_spill] sm:$0xff] %v10327_v40  ;;  %8303 = vmatmul.mubr.msk.bf16.gmra.mrb[108].mxu0 %vm383_vm1, %v2658_v39  ;;  %12830 = vst [vmem:[#allocation42_spill] sm:$0xff] %v10389_v49 }
  0xf1   : > { %8235 = vmatmul.mubr.msk.bf16.gmra.mrb[44].mxu1 %vm383_vm1, %v10319_v22  ;;  %8342 = vmatprep.mubr.msk.bf16.mxu0 %vm383_vm1, %v3263_v19  ;;  %v2970_v19 = vpack.c.bf16 %v2940_v0, %v2939_v60  ;;  %v4796_v60 = vld [vmem:[%s12577_s8 + $0xb8] sm:$0xff]  ;;  %v4795_v0 = vld [vmem:[%s12577_s8 + $0xb0] sm:$0xff] }
  0xf2   : > { %8308 = vmatprep.mubr.msk.bf16.mxu1 %vm383_vm1, %v2969_v53 }
  0xf3   : > { %4902 = vperm.xlu1 %9292, %v4792_v36   ;;  %4897 = vperm.xlu0 %9291, %v4791_v59   ;;  %v10352_v45 = vpop.f32.mrb[4].mxu0  ;;  %v3264_v36 = vpack.c.bf16 %v3234_v37, %v3233_v20  ;;  %v2943_v20 = vld [vmem:[%s9409_s13 + $0x51] sm:$0xff]  ;;  %v2944_v37 = vld [vmem:[%s9409_s13 + $0x59] sm:$0xff] }
  0xf4   : > { %v10354_v21 = vpop.f32.mrb[4].mxu1  ;;  %v10362_v39 = vpop.f32.mrb[5].mxu0 }
  0xf5   : > { %12826 = vst [vmem:[#allocation38_spill] sm:$0xff] %v10354_v21  ;;  %v10364_v53 = vpop.f32.mrb[5].mxu1  ;;  %v10366_v59 = vpop.f32.mrb[6].mxu0 }
  0xf6   : > { %12827 = vst [vmem:[#allocation39_spill] sm:$0xff] %v10364_v53  ;;  %v10368_v21 = vpop.f32.mrb[6].mxu1  ;;  %v10370_v40 = vpop.f32.mrb[7].mxu0 }
  0xf7   : > { %12828 = vst [vmem:[#allocation40_spill] sm:$0xff] %v10368_v21  ;;  %4912 = vperm.xlu1 %9292, %v4794_v56   ;;  %4907 = vperm.xlu0 %9291, %v4793_v15   ;;  %v10372_v24 = vpop.f32.mrb[7].mxu1  ;;  %v10391_v56 = vpop.permute.xlu0 %1533  ;;  %v2946_v15 = vld [vmem:[%s9409_s13 + $0x69] sm:$0xff] }
  0xf8   : > { %12829 = vst [vmem:[#allocation41_spill] sm:$0xff] %v10372_v24  ;;  %8343 = vmatmul.mubr.msk.bf16.vlgmr.msra.gmra.mrb[112].mxu0 %vm383_vm1, %v3264_v36  ;;  %12831 = vst [vmem:[#allocation43_spill] sm:$0xff] %v10391_v56  ;;  %v3239_v24 = vld [vmem:[%s9409_s13 + $0x62] sm:$0xff] }
  0xf9   : > { %8309 = vmatmul.mubr.msk.bf16.vlgmr.msra.gmra.mrb[16].mxu1 %vm383_vm1, %v2970_v19  ;;  %8346 = vmatprep.mubr.msk.bf16.mxu0 %vm383_vm1, %v3265_v29  ;;  %v3240_v19 = vld [vmem:[%s9409_s13 + $0x6a] sm:$0xff] }
  0xfa   : > { %8312 = vmatprep.mubr.msk.bf16.mxu1 %vm383_vm1, %v2971_v25  ;;  %v4798_v29 = vld [vmem:[%s12577_s8 + $0xc8] sm:$0xff]  ;;  %v4797_v25 = vld [vmem:[%s12577_s8 + $0xc0] sm:$0xff]  ;;  %v3267_v62 = vpack.c.bf16 %v3240_v19, %v3239_v24  ;;  %v2947_v24 = vld [vmem:[%s9409_s13 + $0x71] sm:$0xff] }
  0xfb   : > { %4922 = vperm.xlu1 %9292, %v4796_v60   ;;  %4917 = vperm.xlu0 %9291, %v4795_v0   ;;  %v10396_v21 = vpop.f32.mrb[8].mxu0  ;;  %v2972_v60 = vpack.c.bf16 %v2944_v37, %v2943_v20  ;;  %v3266_v0 = vpack.c.bf16 %v3238_v13, %v3237_v35  ;;  %v4800_v20 = vld [vmem:[%s12577_s8 + $0xd8] sm:$0xff]  ;;  %v4799_v37 = vld [vmem:[%s12577_s8 + $0xd0] sm:$0xff]  ;;  %v10424_v35 = vpop.permute.xlu0 %731  ;;  %v2949_v19 = vld [vmem:[%s9409_s13 + $0x81] sm:$0xff] }
  0xfc   : > { %v10398_v36 = vpop.f32.mrb[8].mxu1  ;;  %v10406_v53 = vpop.f32.mrb[9].mxu0  ;;  %12836 = vst [vmem:[#allocation48_spill] sm:$0xff] %v10424_v35  ;;  %v2948_v13 = vld [vmem:[%s9409_s13 + $0x79] sm:$0xff] }
  0xfd   : > { %12832 = vst [vmem:[#allocation44_spill] sm:$0xff] %v10398_v36  ;;  %v10408_v49 = vpop.f32.mrb[9].mxu1  ;;  %v10410_v31 = vpop.f32.mrb[10].mxu0  ;;  %v2973_v36 = vpack.c.bf16 %v2946_v15, %v2945_v14  ;;  %v3241_v14 = vld [vmem:[%s9409_s13 + $0x72] sm:$0xff]  ;;  %v3242_v15 = vld [vmem:[%s9409_s13 + $0x7a] sm:$0xff] }
  0xfe   : > { %12833 = vst [vmem:[#allocation45_spill] sm:$0xff] %v10408_v49  ;;  %v10412_v43 = vpop.f32.mrb[10].mxu1  ;;  %v10414_v55 = vpop.f32.mrb[11].mxu0 }
  0xff   : > { %12834 = vst [vmem:[#allocation46_spill] sm:$0xff] %v10412_v43  ;;  %4932 = vperm.xlu1 %9292, %v4798_v29   ;;  %4927 = vperm.xlu0 %9291, %v4797_v25   ;;  %v10416_v56 = vpop.f32.mrb[11].mxu1  ;;  %v10435_v29 = vpop.permute.xlu1 %736  ;;  %v2950_v25 = vld [vmem:[%s9409_s13 + $0x89] sm:$0xff] }
 0x100   : > { %12835 = vst [vmem:[#allocation47_spill] sm:$0xff] %v10416_v56  ;;  %8347 = vmatmul.mubr.msk.bf16.gmra.mrb[116].mxu0 %vm383_vm1, %v3266_v0  ;;  %12837 = vst [vmem:[#allocation49_spill] sm:$0xff] %v10435_v29  ;;  %v3243_v56 = vld [vmem:[%s9409_s13 + $0x82] sm:$0xff]  ;;  %v3244_v43 = vld [vmem:[%s9409_s13 + $0x8a] sm:$0xff]  ;;  %v10458_v22 = vpop.permute.xlu0 %1543 }
 0x101   : > { %8313 = vmatmul.mubr.msk.bf16.gmra.mrb[20].mxu1 %vm383_vm1, %v2972_v60  ;;  %8350 = vmatprep.mubr.msk.bf16.mxu0 %vm383_vm1, %v3267_v62  ;;  %v4801_v62 = vld [vmem:[%s12577_s8 + $0xe0] sm:$0xff]  ;;  %v3269_v38 = vpack.c.bf16 %v3244_v43, %v3243_v56  ;;  %12841 = vst [vmem:[#allocation53_spill] sm:$0xff] %v10458_v22  ;;  %v4803_v43 = vld [vmem:[%s12577_s8 + $0xf0] sm:$0xff] }
 0x102   : > { %8316 = vmatprep.mubr.msk.bf16.mxu1 %vm383_vm1, %v2973_v36  ;;  %v4802_v36 = vld [vmem:[%s12577_s8 + $0xe8] sm:$0xff]  ;;  %v2951_v56 = vld [vmem:[%s9409_s13 + $0x91] sm:$0xff] }
 0x103   : > { %4942 = vperm.xlu1 %9292, %v4800_v20   ;;  %4937 = vperm.xlu0 %9291, %v4799_v37   ;;  %v10440_v49 = vpop.f32.mrb[12].mxu0  ;;  %v2974_v20 = vpack.c.bf16 %v2948_v13, %v2947_v24  ;;  %v3268_v37 = vpack.c.bf16 %v3242_v15, %v3241_v14  ;;  %v4804_v24 = vld [vmem:[%s12577_s8 + $0xf8] sm:$0xff]  ;;  %v10474_v14 = vpop.permute.xlu1 %1548 }
 0x104   : > { %v10442_v60 = vpop.f32.mrb[12].mxu1  ;;  %v10450_v0 = vpop.f32.mrb[13].mxu0  ;;  %v2952_v13 = vld [vmem:[%s9409_s13 + $0x99] sm:$0xff]  ;;  %12844 = vst [vmem:[#allocation56_spill] sm:$0xff] %v10474_v14 }
 0x105   : > { %12838 = vst [vmem:[#allocation50_spill] sm:$0xff] %v10442_v60  ;;  %v10452_v29 = vpop.f32.mrb[13].mxu1  ;;  %v10454_v35 = vpop.f32.mrb[14].mxu0  ;;  %v2975_v60 = vpack.c.bf16 %v2950_v25, %v2949_v19  ;;  %v3245_v15 = vld [vmem:[%s9409_s13 + $0x92] sm:$0xff]  ;;  %v3246_v19 = vld [vmem:[%s9409_s13 + $0x9a] sm:$0xff]  ;;  %v2976_v14 = vpack.c.bf16 %v2952_v13, %v2951_v56 }
 0x106   : > { %12839 = vst [vmem:[#allocation51_spill] sm:$0xff] %v10452_v29  ;;  %v10456_v5 = vpop.f32.mrb[14].mxu1  ;;  %v10460_v33 = vpop.f32.mrb[15].mxu0  ;;  %v2953_v25 = vld [vmem:[%s9409_s13 + $0xa1] sm:$0xff]  ;;  %v3270_v6 = vpack.c.bf16 %v3246_v19, %v3245_v15  ;;  %v2955_v19 = vld [vmem:[%s9409_s13 + $0xb1] sm:$0xff] }
 0x107   : > { %12840 = vst [vmem:[#allocation52_spill] sm:$0xff] %v10456_v5  ;;  %4952 = vperm.xlu1 %9292, %v4802_v36   ;;  %4947 = vperm.xlu0 %9291, %v4801_v62   ;;  %12842 = vst [vmem:[#allocation54_spill] sm:$0xff] %v10460_v33  ;;  %v10462_v29 = vpop.f32.mrb[15].mxu1  ;;  %v2954_v36 = vld [vmem:[%s9409_s13 + $0xa9] sm:$0xff]  ;;  %v10497_v13 = vpop.permute.xlu1 %746 }
 0x108   : > { %12843 = vst [vmem:[#allocation55_spill] sm:$0xff] %v10462_v29  ;;  %8351 = vmatmul.mubr.msk.bf16.gmra.mrb[120].mxu0 %vm383_vm1, %v3268_v37  ;;  %v3247_v62 = vld [vmem:[%s9409_s13 + $0xa2] sm:$0xff]  ;;  %v3248_v29 = vld [vmem:[%s9409_s13 + $0xaa] sm:$0xff]  ;;  %v2977_v33 = vpack.c.bf16 %v2954_v36, %v2953_v25  ;;  %v2956_v25 = vld [vmem:[%s9409_s13 + $0xb9] sm:$0xff] }
 0x109   : > { %8317 = vmatmul.mubr.msk.bf16.gmra.mrb[24].mxu1 %vm383_vm1, %v2974_v20  ;;  %8354 = vmatprep.mubr.msk.bf16.mxu0 %vm383_vm1, %v3269_v38  ;;  %v791_v20 = vmul.f32 %v10305_v34, %v10052_v7  ;;  %v789_v38 = vmul.f32 %v10032_v52, %v10315_v54  ;;  %v3271_v2 = vpack.c.bf16 %v3248_v29, %v3247_v62  ;;  %v3249_v36 = vld [vmem:[%s9409_s13 + $0xb2] sm:$0xff]  ;;  %v3250_v62 = vld [vmem:[%s9409_s13 + $0xba] sm:$0xff] }
 0x10a   : > { %8320 = vmatprep.mubr.msk.bf16.mxu1 %vm383_vm1, %v2975_v60  ;;  %v10487_v60 = vpop.permute.xlu0 %741  ;;  %v792_v34 = vmul.f32 %v10321_v12, %v10050_v1  ;;  %v790_v29 = vmul.f32 %v10042_v17, %v10325_v46  ;;  %v2958_v46 = vld [vmem:[%s9409_s13 + $0xc9] sm:$0xff] }
 0x10b   : > { %4962 = vperm.xlu1 %9292, %v4804_v24   ;;  %4957 = vperm.xlu0 %9291, %v4803_v43   ;;  %v8140_v5 = vpop.f32.mrb[16].mxu0  ;;  %12845 = vst [vmem:[#allocation57_spill] sm:$0xff] %v10487_v60 }
 0x10c   : > { %v1603_v37 = vmul.f32 %v8140_v5, %v10062_v23  ;;  %v1282_v22 = vpop.f32.mrb[17].mxu0 }
 0x10d   : > { %v1601_v24 = vmul.f32 %v10030_v51, %v1282_v22  ;;  %v8141_v43 = vpop.f32.mrb[18].mxu0 }
 0x10e   : > { %v10494_v5 = vadd.f32 %v1603_v37, %v791_v20  ;;  %v1604_v56 = vmul.f32 %v8141_v43, %v10060_v18  ;;  %v1285_v22 = vpop.f32.mrb[19].mxu0  ;;  %v2957_v20 = vld [vmem:[%s9409_s13 + $0xc1] sm:$0xff]  ;;  %v10520_v43 = vpop.permute.xlu0 %1553 }
 0x10f   : > { %v10499_v54 = vadd.f32 %v1601_v24, %v789_v38  ;;  %v1602_v12 = vmul.f32 %v10040_v63, %v1285_v22  ;;  %v3251_v38 = vld [vmem:[%s9409_s13 + $0xc2] sm:$0xff]  ;;  %v3252_v24 = vld [vmem:[%s9409_s13 + $0xca] sm:$0xff]  ;;  %12847 = vst [vmem:[#allocation59_spill] sm:$0xff] %v10520_v43  ;;  %v3272_v22 = vpack.c.bf16 %v3250_v62, %v3249_v36  ;;  %v2979_v63 = vpack.c.bf16 %v2958_v46, %v2957_v20  ;;  %v2960_v46 = vld [vmem:[%s9409_s13 + $0xd9] sm:$0xff] }
 0x110   : > { %v10503_v15 = vadd.f32 %v1604_v56, %v792_v34  ;;  %8355 = vmatmul.mubr.msk.bf16.gmra.mrb[124].mxu0 %vm383_vm1, %v3270_v6  ;;  %v795_v6 = vmul.f32 %v10352_v45, %v10094_v44  ;;  %v3273_v17 = vpack.c.bf16 %v3252_v24, %v3251_v38  ;;  %v796_v45 = vmul.f32 %v10366_v59, %v10092_v42  ;;  %v2959_v59 = vld [vmem:[%s9409_s13 + $0xd1] sm:$0xff]  ;;  %v3254_v24 = vld [vmem:[%s9409_s13 + $0xda] sm:$0xff] }
 0x111   : > { %8321 = vmatmul.mubr.msk.bf16.gmra.mrb[28].mxu1 %vm383_vm1, %v2976_v14  ;;  %8358 = vmatprep.mubr.msk.bf16.mxu0 %vm383_vm1, %v3271_v2  ;;  %v10515_v37 = vadd.f32 %v1602_v12, %v790_v29  ;;  %v10525_v2 = vpop.permute.xlu1 %1558  ;;  %v793_v29 = vmul.f32 %v10072_v10, %v10362_v39  ;;  %v794_v36 = vmul.f32 %v10070_v9, %v10370_v40  ;;  %v3253_v38 = vld [vmem:[%s9409_s13 + $0xd2] sm:$0xff]  ;;  %v2961_v40 = vld [vmem:[%s9409_s13 + $0xe1] sm:$0xff] }
 0x112   : > { %8324 = vmatprep.mubr.msk.bf16.mxu1 %vm383_vm1, %v2977_v33  ;;  %v2978_v33 = vpack.c.bf16 %v2956_v25, %v2955_v19  ;;  %12848 = vst [vmem:[#allocation60_spill] sm:$0xff] %v10525_v2  ;;  %v800_v9 = vmul.f32 %v10410_v31, %v10155_v26  ;;  %v798_v31 = vmul.f32 %v10127_v3, %v10414_v55  ;;  %v3258_v55 = vld [vmem:[%s9409_s13 + $0xfa] sm:$0xff] }
 0x113   : > { %12846 = vst [vmem:[#allocation58_spill] sm:$0xff] %v10515_v37  ;;  %v8144_v34 = vpop.f32.mrb[20].mxu0 }
 0x114   : > { %v1607_v14 = vmul.f32 %v8144_v34, %v10114_v30  ;;  %v1298_v56 = vpop.f32.mrb[21].mxu0 }
 0x115   : > { %v1605_v12 = vmul.f32 %v10086_v41, %v1298_v56  ;;  %v8145_v37 = vpop.f32.mrb[22].mxu0  ;;  %v3255_v56 = vld [vmem:[%s9409_s13 + $0xe2] sm:$0xff] }
 0x116   : > { %v10532_v34 = vadd.f32 %v1607_v14, %v795_v6  ;;  %v1608_v19 = vmul.f32 %v8145_v37, %v10112_v16  ;;  %v1301_v39 = vpop.f32.mrb[23].mxu0  ;;  %v10546_v37 = vpop.permute.xlu0 %751  ;;  %v2962_v14 = vld [vmem:[%s9409_s13 + $0xe9] sm:$0xff] }
 0x117   : > { %v10535_v25 = vadd.f32 %v1605_v12, %v793_v29  ;;  %v1606_v20 = vmul.f32 %v10084_v32, %v1301_v39  ;;  %12849 = vst [vmem:[#allocation61_spill] sm:$0xff] %v10546_v37  ;;  %v3256_v29 = vld [vmem:[%s9409_s13 + $0xea] sm:$0xff]  ;;  %v10558_v12 = vpop.permute.xlu1 %756  ;;  %v3274_v39 = vpack.c.bf16 %v3254_v24, %v3253_v38  ;;  %v2981_v32 = vpack.c.bf16 %v2962_v14, %v2961_v40 }
 0x118   : > { %v10539_v62 = vadd.f32 %v1608_v19, %v796_v45  ;;  %8359 = vmatmul.mubr.msk.bf16.gmra.mrb[128].mxu0 %vm383_vm1, %v3272_v22  ;;  %v799_v22 = vmul.f32 %v10396_v21, %v10157_v50  ;;  %v2963_v40 = vld [vmem:[%s9409_s13 + $0xf1] sm:$0xff] }
 0x119   : > { %8325 = vmatmul.mubr.msk.bf16.gmra.mrb[32].mxu1 %vm383_vm1, %v2978_v33  ;;  %8362 = vmatprep.mubr.msk.bf16.mxu0 %vm383_vm1, %v3273_v17  ;;  %v10553_v6 = vadd.f32 %v1606_v20, %v794_v36  ;;  %v797_v17 = vmul.f32 %v10129_v4, %v10406_v53 }
 0x11a   : > { %8328 = vmatprep.mubr.msk.bf16.mxu1 %vm383_vm1, %v2979_v63  ;;  %v2980_v63 = vpack.c.bf16 %v2960_v46, %v2959_v59  ;;  %v3747_v46 = vld [vmem:[%s12571_s2] sm:$0xf] }
 0x11b   : > { %12850 = vst [vmem:[#allocation62_spill] sm:$0xff] %v10553_v6  ;;  %v8148_v33 = vpop.f32.mrb[24].mxu0  ;;  %v3275_v6 = vpack.c.bf16 %v3256_v29, %v3255_v56  ;;  %v3798_v14 = vsel %vm3796_vm2, %v3747_v46, 0  ;;  %v10587_v56 = vpop.permute.xlu1 %1568  ;;  %v2964_v29 = vld [vmem:[%s9409_s13 + $0xf9] sm:$0xff]  ;;  %9270 = vmatprep.subr.msk.bf16.mxu1 %vm3796_vm2, %v3747_v46 }
 0x11c   : > { %v1611_v45 = vmul.f32 %v8148_v33, %v10174_v57  ;;  %v1314_v19 = vpop.f32.mrb[25].mxu0  ;;  %v10571_v33 = vpop.permute.xlu0 %1563  ;;  %12852 = vst [vmem:[#allocation64_spill] sm:$0xff] %v10587_v56  ;;  %8375 = vmatpush3.bf16.msra.mxu1 %v3798_v14  ;;  %v12855_v14 = vld [vmem:[#allocation9_spill] sm:$0xff] }
 0x11d   : > { %v1609_v36 = vmul.f32 %v10143_v48, %v1314_v19  ;;  %v8149_v20 = vpop.f32.mrb[26].mxu0  ;;  %12851 = vst [vmem:[#allocation63_spill] sm:$0xff] %v10571_v33  ;;  %v3260_v19 = vld [vmem:[%s9409_s13 + $0x10a] sm:$0xff] }
 0x11e   : > { %v10568_v16 = vadd.f32 %v1611_v45, %v799_v22  ;;  %v1612_v21 = vmul.f32 %v8149_v20, %v10172_v61  ;;  %v1317_v53 = vpop.f32.mrb[27].mxu0  ;;  %v3257_v22 = vld [vmem:[%s9409_s13 + $0xf2] sm:$0xff]  ;;  %v3259_v45 = vld [vmem:[%s9409_s13 + $0x102] sm:$0xff] }
 0x11f   : > { %v10573_v59 = vadd.f32 %v1609_v36, %v797_v17  ;;  %v1610_v24 = vmul.f32 %v10141_v47, %v1317_v53  ;;  %v3276_v20 = vpack.c.bf16 %v3258_v55, %v3257_v22  ;;  %v3277_v46 = vpack.c.bf16 %v3260_v19, %v3259_v45  ;;  %v7588_v55 = vld [vmem:[%s12571_s2 + $0x4] sm:$0xf]  ;;  %v12858_v19 = vld [vmem:[#allocation3_spill] sm:$0xff] }
 0x120   : > { %v10580_v38 = vadd.f32 %v1612_v21, %v800_v9  ;;  %8363 = vmatmul.mubr.msk.bf16.gmra.mrb[132].mxu0 %vm383_vm1, %v3274_v39  ;;  %v803_v39 = vmul.f32 %v10440_v49, %v10234_v28  ;;  %v801_v21 = vmul.f32 %v10198_v11, %v10450_v0  ;;  %v12857_v45 = vld [vmem:[#allocation54_spill] sm:$0xff]  ;;  %9271 = vmatprep.subr.msk.bf16.mxu0 %vm3796_vm2, %v7588_v55 }
 0x121   : > { %8329 = vmatmul.mubr.msk.bf16.gmra.mrb[36].mxu1 %vm383_vm1, %v2980_v63  ;;  %8366 = vmatprep.mubr.msk.bf16.mxu0 %vm383_vm1, %v3275_v6  ;;  %v10594_v9 = vadd.f32 %v1610_v24, %v798_v31  ;;  %v10602_v6 = vpop.permute.xlu0 %761  ;;  %v804_v24 = vmul.f32 %v10454_v35, %v10232_v27  ;;  %v12868_v27 = vld [vmem:[#allocation16_spill] sm:$0xff]  ;;  %v12872_v11 = vld [vmem:[#allocation34_spill] sm:$0xff] }
 0x122   : > { %8332 = vmatprep.mubr.msk.bf16.mxu1 %vm383_vm1, %v2981_v32  ;;  %v2982_v32 = vpack.c.bf16 %v2964_v29, %v2963_v40  ;;  %12853 = vst [vmem:[#allocation65_spill] sm:$0xff] %v10602_v6  ;;  %v10612_v29 = vpop.permute.xlu1 %766  ;;  %v12873_v47 = vld [vmem:[#allocation42_spill] sm:$0xff] }
 0x123   : > { %v8152_v63 = vpop.f32.mrb[28].mxu0 }
 0x124   : > { %v1615_v17 = vmul.f32 %v8152_v63, %v10254_v58  ;;  %v1330_v36 = vpop.f32.mrb[29].mxu0  ;;  %v802_v63 = vmul.f32 %v12858_v19, %v12857_v45 }
 0x125   : > { %v1613_v53 = vmul.f32 %v10216_v8, %v1330_v36  ;;  %v8153_v31 = vpop.f32.mrb[30].mxu0  ;;  %v2967_v36 = vld [vmem:[%s9409_s13 + $0x111] sm:$0xff]  ;;  %v3262_v8 = vld [vmem:[%s9409_s13 + $0x11a] sm:$0xff] }
 0x126   : > { %v10609_v49 = vadd.f32 %v1615_v17, %v803_v39  ;;  %v1616_v40 = vmul.f32 %v8153_v31, %v12855_v14  ;;  %v1333_v0 = vpop.f32.mrb[31].mxu0  ;;  %v12860_v39 = vld [vmem:[#allocation5_spill] sm:$0xff] }
 0x127   : > { %v10614_v22 = vadd.f32 %v1613_v53, %v801_v21  ;;  %v1614_v17 = vmul.f32 %v12860_v39, %v1333_v0  ;;  %v4316_v21 = vsel %vm3796_vm2, %v7588_v55, 0  ;;  %v12861_v53 = vld [vmem:[#allocation33_spill] sm:$0xff]  ;;  %v12866_v39 = vld [vmem:[#allocation43_spill] sm:$0xff] }
 0x128   : > { %12854 = vst [vmem:[#allocation66_spill] sm:$0xff] %v10609_v49  ;;  %v10621_v35 = vadd.f32 %v1616_v40, %v804_v24  ;;  %8367 = vmatmul.mubr.msk.bf16.gmra.mrb[136].mxu0 %vm383_vm1, %v3276_v20  ;;  %v2968_v31 = vld [vmem:[%s9409_s13 + $0x119] sm:$0xff]  ;;  %v10637_v24 = vpop.permute.xlu0 %1573  ;;  %v12865_v40 = vld [vmem:[#allocation31_spill] sm:$0xff]  ;;  %v10644_v49 = vpop.permute.xlu1 %1578 }
 0x129   : > { %12856 = vst [vmem:[#allocation67_spill] sm:$0xff] %v10614_v22  ;;  %8333 = vmatmul.mubr.msk.bf16.gmra.mrb[40].mxu1 %vm383_vm1, %v2982_v32  ;;  %8370 = vmatprep.mubr.msk.bf16.mxu0 %vm383_vm1, %v3277_v46  ;;  %v3261_v14 = vld [vmem:[%s9409_s13 + $0x112] sm:$0xff]  ;;  %v10634_v45 = vadd.f32 %v1614_v17, %v802_v63  ;;  %12863 = vst [vmem:[#allocation68_spill] sm:$0xff] %v10637_v24  ;;  %v12870_v63 = vld [vmem:[#allocation30_spill] sm:$0xff] }
 0x12a   : > { %12859 = vst [vmem:[#allocation54_spill] sm:$0xff] %v10621_v35  ;;  %8336 = vmatprep.mubr.msk.bf16.mxu1 %vm383_vm1, %v12861_v53  ;;  %8409 = vmatpush3.bf16.msra.mxu0 %v4316_v21  ;;  %v12864_v20 = vld [vmem:[#allocation37_spill] sm:$0xff]  ;;  %v2984_v53 = vpack.c.bf16 %v2968_v31, %v2967_v36  ;;  %v3278_v22 = vpack.c.bf16 %v3262_v8, %v3261_v14  ;;  %v12867_v46 = vld [vmem:[#allocation32_spill] sm:$0xff]  ;;  %12869 = vst [vmem:[#allocation31_spill] sm:$0xff] %v10644_v49 }
 0x12b   : > { %12862 = vst [vmem:[#allocation33_spill] sm:$0xff] %v10634_v45  ;;  %v8156_v32 = vpop.f32.mrb[32].mxu0  ;;  %v807_v0 = vmul.f32 %v12865_v40, %v12864_v20  ;;  %v805_v58 = vmul.f32 %v12868_v27, %v12867_v46  ;;  %v12871_v45 = vld [vmem:[#allocation36_spill] sm:$0xff]  ;;  %v12874_v36 = vld [vmem:[#allocation35_spill] sm:$0xff]  ;;  %v12875_v8 = vld [vmem:[#allocation13_spill] sm:$0xff] }
 0x12c   : > { %v1619_v19 = vmul.f32 %v8156_v32, %v12866_v39  ;;  %v1346_v35 = vpop.f32.mrb[33].mxu0  ;;  %v808_v28 = vmul.f32 %v12872_v11, %v12871_v45  ;;  %v806_v14 = vmul.f32 %v12875_v8, %v12874_v36  ;;  %v12877_v46 = vld [vmem:[#allocation17_spill] sm:$0xff]  ;;  %v12882_v36 = vld [vmem:[#allocation48_spill] sm:$0xff] }
 0x12d   : > { %v1617_v17 = vmul.f32 %v12870_v63, %v1346_v35  ;;  %v8157_v55 = vpop.f32.mrb[34].mxu0  ;;  %v10661_v35 = vpop.permute.xlu0 %771 }
 0x12e   : > { %v10649_v21 = vadd.f32 %v1619_v19, %v807_v0  ;;  %v1620_v40 = vmul.f32 %v8157_v55, %v12873_v47  ;;  %v1349_v32 = vpop.f32.mrb[35].mxu0  ;;  %12878 = vst [vmem:[#allocation34_spill] sm:$0xff] %v10661_v35  ;;  %v10665_v19 = vpop.permute.xlu1 %776  ;;  %v12880_v0 = vld [vmem:[#allocation38_spill] sm:$0xff] }
 0x12f   : > { %v10652_v20 = vadd.f32 %v1617_v17, %v805_v58  ;;  %v1618_v39 = vmul.f32 %v12877_v46, %v1349_v32  ;;  %v811_v17 = vmul.f32 %v12880_v0, %v10487_v60  ;;  %v12883_v46 = vld [vmem:[#allocation53_spill] sm:$0xff] }
 0x130   : > { %v10656_v31 = vadd.f32 %v1620_v40, %v808_v28  ;;  %8371 = vmatmul.mubr.msk.bf16.gmra.mrb[140].mxu0 %vm383_vm1, %v3278_v22  ;;  %v12881_v40 = vld [vmem:[#allocation39_spill] sm:$0xff]  ;;  %v12884_v22 = vld [vmem:[#allocation40_spill] sm:$0xff] }
 0x131   : > { %8337 = vmatmul.mubr.msk.bf16.gmra.mrb[44].mxu1 %vm383_vm1, %v2984_v53  ;;  %v10663_v11 = vadd.f32 %v1618_v39, %v806_v14  ;;  %v809_v32 = vmul.f32 %v12882_v36, %v12881_v40  ;;  %v812_v47 = vmul.f32 %v12884_v22, %v10497_v13  ;;  %v12889_v40 = vld [vmem:[#allocation56_spill] sm:$0xff] }
 0x132   : > { %12876 = vst [vmem:[#allocation32_spill] sm:$0xff] %v10656_v31 }
 0x133   : > { %12879 = vst [vmem:[#allocation35_spill] sm:$0xff] %v10663_v11  ;;  %v8160_v58 = vpop.f32.mrb[36].mxu0  ;;  %v10678_v11 = vpop.permute.xlu0 %1583 }
 0x134   : > { %v1623_v55 = vmul.f32 %v8160_v58, %v10520_v43  ;;  %v1362_v28 = vpop.f32.mrb[37].mxu0  ;;  %12885 = vst [vmem:[#allocation38_spill] sm:$0xff] %v10678_v11  ;;  %v12887_v58 = vld [vmem:[#allocation41_spill] sm:$0xff] }
 0x135   : > { %v1621_v53 = vmul.f32 %v12883_v46, %v1362_v28  ;;  %v8161_v8 = vpop.f32.mrb[38].mxu0  ;;  %v12888_v43 = vld [vmem:[#allocation49_spill] sm:$0xff]  ;;  %v10687_v46 = vpop.permute.xlu1 %1588 }
 0x136   : > { %v10675_v39 = vadd.f32 %v1623_v55, %v811_v17  ;;  %v1624_v14 = vmul.f32 %v8161_v8, %v10525_v2  ;;  %v1365_v0 = vpop.f32.mrb[39].mxu0  ;;  %v810_v60 = vmul.f32 %v12888_v43, %v12887_v58  ;;  %12890 = vst [vmem:[#allocation40_spill] sm:$0xff] %v10687_v46  ;;  %v12891_v55 = vld [vmem:[#allocation44_spill] sm:$0xff] }
 0x137   : > { %v10680_v31 = vadd.f32 %v1621_v53, %v809_v32  ;;  %v1622_v28 = vmul.f32 %v12889_v40, %v1365_v0  ;;  %v815_v8 = vmul.f32 %v12891_v55, %v10602_v6  ;;  %v12892_v53 = vld [vmem:[#allocation45_spill] sm:$0xff]  ;;  %v12894_v0 = vld [vmem:[#allocation46_spill] sm:$0xff] }
 0x138   : > { %v10684_v63 = vadd.f32 %v1624_v14, %v812_v47  ;;  %v813_v2 = vmul.f32 %v10546_v37, %v12892_v53  ;;  %v816_v58 = vmul.f32 %v12894_v0, %v10612_v29 }
 0x139   : > { %12886 = vst [vmem:[#allocation39_spill] sm:$0xff] %v10680_v31  ;;  %v10689_v36 = vadd.f32 %v1622_v28, %v810_v60  ;;  %v10696_v31 = vpop.permute.xlu0 %781  ;;  %v10704_v40 = vpop.permute.xlu1 %1593 }
 0x13a   : > { %12893 = vst [vmem:[#allocation41_spill] sm:$0xff] %v10696_v31  ;;  %12895 = vst [vmem:[#allocation49_spill] sm:$0xff] %v10704_v40 }
 0x13b   : > { %v8164_v17 = vpop.f32.mrb[40].mxu0 }
 0x13c   : > { %v1627_v22 = vmul.f32 %v8164_v17, %v10637_v24  ;;  %v1378_v32 = vpop.f32.mrb[41].mxu0  ;;  %v12897_v24 = vld [vmem:[#allocation47_spill] sm:$0xff] }
 0x13d   : > { %v1625_v47 = vmul.f32 %v10571_v33, %v1378_v32  ;;  %v8165_v14 = vpop.f32.mrb[42].mxu0  ;;  %v814_v53 = vmul.f32 %v10558_v12, %v12897_v24  ;;  %v10715_v6 = vpop.permute.xlu0 %786 }
 0x13e   : > { %v10701_v60 = vadd.f32 %v1627_v22, %v815_v8  ;;  %v1628_v28 = vmul.f32 %v8165_v14, %v10644_v49  ;;  %v1381_v17 = vpop.f32.mrb[43].mxu0  ;;  %v12898_v22 = vld [vmem:[#allocation50_spill] sm:$0xff] }
 0x13f   : > { %v10706_v55 = vadd.f32 %v1625_v47, %v813_v2  ;;  %v1626_v32 = vmul.f32 %v10587_v56, %v1381_v17  ;;  %v819_v14 = vmul.f32 %v12898_v22, %v10696_v31  ;;  %v12899_v47 = vld [vmem:[#allocation51_spill] sm:$0xff] }
 0x140   : > { %v10710_v37 = vadd.f32 %v1628_v28, %v816_v58  ;;  %v817_v49 = vmul.f32 %v10661_v35, %v12899_v47  ;;  %v12901_v28 = vld [vmem:[#allocation52_spill] sm:$0xff] }
 0x141   : > { %12896 = vst [vmem:[#allocation44_spill] sm:$0xff] %v10706_v55  ;;  %v10713_v33 = vadd.f32 %v1626_v32, %v814_v53  ;;  %v10722_v55 = vpop.permute.xlu1 %1598  ;;  %v820_v17 = vmul.f32 %v12901_v28, %v10715_v6 }
 0x142   : > { %12900 = vst [vmem:[#allocation45_spill] sm:$0xff] %v10722_v55 }
 0x143   : > { %v8168_v8 = vpop.f32.mrb[44].mxu0 }
 0x144   : > { %v1631_v0 = vmul.f32 %v8168_v8, %v10704_v40  ;;  %v1394_v2 = vpop.f32.mrb[45].mxu0  ;;  %v12902_v8 = vld [vmem:[#allocation55_spill] sm:$0xff] }
 0x145   : > { %v1629_v24 = vmul.f32 %v10678_v11, %v1394_v2  ;;  %v8169_v58 = vpop.f32.mrb[46].mxu0  ;;  %v818_v40 = vmul.f32 %v10665_v19, %v12902_v8 }
 0x146   : > { %v10727_v53 = vadd.f32 %v1631_v0, %v819_v14  ;;  %v1632_v32 = vmul.f32 %v8169_v58, %v10722_v55  ;;  %v1397_v22 = vpop.f32.mrb[47].mxu0 }
 0x147   : > { %v10730_v56 = vadd.f32 %v1629_v24, %v817_v49  ;;  %v1630_v47 = vmul.f32 %v10687_v46, %v1397_v22 }
 0x148   : > { %v10734_v31 = vadd.f32 %v1632_v32, %v820_v17 }
 0x149   : > { %v10737_v35 = vadd.f32 %v1630_v47, %v818_v40 }
 0x14b   : > { %12903 = vst [vmem:[#allocation46_spill] sm:$0xff] %v10737_v35  ;;  %v8242_v11 = vpop.f32.mrb[48].mxu0 }
 0x14c   : > { %v8174_v2 = vpop.f32.mrb[48].mxu1  ;;  %v2420_v0 = vpop.f32.mrb[49].mxu0  ;;  %v2549_v8 = vmul.f32 %v8242_v11, %v10062_v23 }
 0x14d   : > { %v1929_v28 = vmul.f32 %v8174_v2, %v10052_v7  ;;  %v1800_v14 = vpop.f32.mrb[49].mxu1  ;;  %v8243_v24 = vpop.f32.mrb[50].mxu0  ;;  %v2547_v40 = vmul.f32 %v2420_v0, %v10030_v51  ;;  %v12665_v51 = vmov 0.0  }
 0x14e   : > { %v1927_v58 = vmul.f32 %v1800_v14, %v10032_v52  ;;  %v8175_v49 = vpop.f32.mrb[50].mxu1  ;;  %v2423_v47 = vpop.f32.mrb[51].mxu0  ;;  %v2550_v14 = vmul.f32 %v8243_v24, %v10060_v18  ;;  %v12904_v52 = vld [vmem:[#allocation21_spill] sm:$0xff]  ;;  %3633 = vst.msk [vmem:[#allocation2 + $0x20] sm:$0xff] %vm3628_vm3, %v12665_v51  ;;  %3634 = vst.msk [vmem:[#allocation2 + $0x28] sm:$0xff] %vm3628_vm3, %v12665_v51 }
 0x14f   : > { %v8717_v55 = vadd.f32 %v10494_v5, %v1929_v28  ;;  %v1930_v17 = vmul.f32 %v8175_v49, %v10050_v1  ;;  %v1803_v22 = vpop.f32.mrb[51].mxu1  ;;  %v12905_v5 = vld [vmem:[#allocation20_spill] sm:$0xff]  ;;  %v12906_v49 = vld [vmem:[#allocation58_spill] sm:$0xff]  ;;  %3629 = vst.msk [vmem:[#allocation2] sm:$0xff] %vm3628_vm3, %v12665_v51  ;;  %3630 = vst.msk [vmem:[#allocation2 + $0x8] sm:$0xff] %vm3628_vm3, %v12665_v51 }
 0x150   : > { %v8722_v32 = vadd.f32 %v10499_v54, %v1927_v58  ;;  %v1928_v7 = vmul.f32 %v1803_v22, %v12904_v52  ;;  %v2548_v11 = vmul.f32 %v2423_v47, %v12905_v5  ;;  %3631 = vst.msk [vmem:[#allocation2 + $0x10] sm:$0xff] %vm3628_vm3, %v12665_v51  ;;  %3632 = vst.msk [vmem:[#allocation2 + $0x18] sm:$0xff] %vm3628_vm3, %v12665_v51  ;;  %v12908_v5 = vld [vmem:[#allocation25_spill] sm:$0xff] }
 0x151   : > { %v10746_v46 = vadd.f32 %v8717_v55, %v2549_v8  ;;  %v8727_v2 = vadd.f32 %v10503_v15, %v1930_v17  ;;  %3635 = vst.msk [vmem:[#allocation2 + $0x30] sm:$0xff] %vm3628_vm3, %v12665_v51  ;;  %3636 = vst.msk [vmem:[#allocation2 + $0x38] sm:$0xff] %vm3628_vm3, %v12665_v51 }
 0x152   : > { %v10751_v35 = vadd.f32 %v8722_v32, %v2547_v40  ;;  %v8732_v54 = vadd.f32 %v12906_v49, %v1928_v7  ;;  %3637 = vst.msk [vmem:[#allocation2 + $0x40] sm:$0xff] %vm3628_vm3, %v12665_v51  ;;  %3638 = vst.msk [vmem:[#allocation2 + $0x48] sm:$0xff] %vm3628_vm3, %v12665_v51 }
 0x153   : > { %v10754_v28 = vadd.f32 %v8727_v2, %v2550_v14  ;;  %v8246_v58 = vpop.f32.mrb[52].mxu0  ;;  %3639 = vst.msk [vmem:[#allocation2 + $0x50] sm:$0xff] %vm3628_vm3, %v12665_v51  ;;  %3640 = vst.msk [vmem:[#allocation2 + $0x58] sm:$0xff] %vm3628_vm3, %v12665_v51 }
 0x154   : > { %v8178_v0 = vpop.f32.mrb[52].mxu1  ;;  %3641 = vst.msk [vmem:[#allocation2 + $0x60] sm:$0xff] %vm3628_vm3, %v12665_v51  ;;  %3642 = vst.msk [vmem:[#allocation2 + $0x68] sm:$0xff] %vm3628_vm3, %v12665_v51  ;;  %v10829_v7 = vadd.f32 %v8732_v54, %v2548_v11  ;;  %v2436_v24 = vpop.f32.mrb[53].mxu0  ;;  %v2553_v22 = vmul.f32 %v8246_v58, %v10114_v30  ;;  %v12909_v58 = vld [vmem:[#allocation62_spill] sm:$0xff] }
 0x155   : > { %3643 = vst.msk [vmem:[#allocation2 + $0x70] sm:$0xff] %vm3628_vm3, %v12665_v51  ;;  %3644 = vst.msk [vmem:[#allocation2 + $0x78] sm:$0xff] %vm3628_vm3, %v12665_v51  ;;  %v1933_v15 = vmul.f32 %v8178_v0, %v10094_v44  ;;  %v1816_v55 = vpop.f32.mrb[53].mxu1  ;;  %v8247_v32 = vpop.f32.mrb[54].mxu0  ;;  %v2551_v14 = vmul.f32 %v2436_v24, %v10086_v41 }
 0x156   : > { %3645 = vst.msk [vmem:[#allocation2 + $0x80] sm:$0xff] %vm3628_vm3, %v12665_v51  ;;  %3646 = vst.msk [vmem:[#allocation2 + $0x88] sm:$0xff] %vm3628_vm3, %v12665_v51  ;;  %v1931_v8 = vmul.f32 %v1816_v55, %v10072_v10  ;;  %v8179_v17 = vpop.f32.mrb[54].mxu1  ;;  %v2439_v49 = vpop.f32.mrb[55].mxu0 }
 0x157   : > { %3647 = vst.msk [vmem:[#allocation2 + $0x90] sm:$0xff] %vm3628_vm3, %v12665_v51  ;;  %3648 = vst.msk [vmem:[#allocation2 + $0x98] sm:$0xff] %vm3628_vm3, %v12665_v51  ;;  %v8737_v40 = vadd.f32 %v10532_v34, %v1933_v15  ;;  %v1934_v47 = vmul.f32 %v8179_v17, %v10092_v42  ;;  %v1819_v11 = vpop.f32.mrb[55].mxu1  ;;  %v12910_v17 = vld [vmem:[#allocation26_spill] sm:$0xff] }
 0x158   : > { %3649 = vst.msk [vmem:[#allocation2 + $0xa0] sm:$0xff] %vm3628_vm3, %v12665_v51  ;;  %3650 = vst.msk [vmem:[#allocation2 + $0xa8] sm:$0xff] %vm3628_vm3, %v12665_v51  ;;  %v8742_v2 = vadd.f32 %v10535_v25, %v1931_v8  ;;  %v1932_v18 = vmul.f32 %v1819_v11, %v12908_v5  ;;  %v2552_v25 = vmul.f32 %v2439_v49, %v12910_v17  ;;  %v3700_v49 = vld [vmem:[#allocation2 + $0x8] sm:$0xff] }
 0x159   : > { %3651 = vst.msk [vmem:[#allocation2 + $0xb0] sm:$0xff] %vm3628_vm3, %v12665_v51  ;;  %3652 = vst.msk [vmem:[#allocation2 + $0xb8] sm:$0xff] %vm3628_vm3, %v12665_v51  ;;  %v10838_v54 = vadd.f32 %v8737_v40, %v2553_v22  ;;  %v8747_v0 = vadd.f32 %v10539_v62, %v1934_v47 }
 0x15a   : > { %3653 = vst.msk [vmem:[#allocation2 + $0xc0] sm:$0xff] %vm3628_vm3, %v12665_v51  ;;  %3654 = vst.msk [vmem:[#allocation2 + $0xc8] sm:$0xff] %vm3628_vm3, %v12665_v51  ;;  %v10843_v23 = vadd.f32 %v8742_v2, %v2551_v14  ;;  %v8752_v15 = vadd.f32 %v12909_v58, %v1932_v18 }
 0x15b   : > { %3655 = vst.msk [vmem:[#allocation2 + $0xd0] sm:$0xff] %vm3628_vm3, %v12665_v51  ;;  %3656 = vst.msk [vmem:[#allocation2 + $0xd8] sm:$0xff] %vm3628_vm3, %v12665_v51  ;;  %v8250_v24 = vpop.f32.mrb[56].mxu0 }
 0x15c   : > { %3657 = vst.msk [vmem:[#allocation2 + $0xe0] sm:$0xff] %vm3628_vm3, %v12665_v51  ;;  %3658 = vst.msk [vmem:[#allocation2 + $0xe8] sm:$0xff] %vm3628_vm3, %v12665_v51  ;;  %v8182_v8 = vpop.f32.mrb[56].mxu1  ;;  %v10849_v41 = vadd.f32 %v8752_v15, %v2552_v25  ;;  %v2452_v62 = vpop.f32.mrb[57].mxu0  ;;  %v2557_v14 = vmul.f32 %v8250_v24, %v10174_v57  ;;  %v12920_v57 = vld [vmem:[#allocation54_spill] sm:$0xff] }
 0x15d   : > { %3659 = vst.msk [vmem:[#allocation2 + $0xf0] sm:$0xff] %vm3628_vm3, %v12665_v51  ;;  %3660 = vst.msk [vmem:[#allocation2 + $0xf8] sm:$0xff] %vm3628_vm3, %v12665_v51  ;;  %v1937_v40 = vmul.f32 %v8182_v8, %v10157_v50  ;;  %v1832_v22 = vpop.f32.mrb[57].mxu1  ;;  %v8251_v11 = vpop.f32.mrb[58].mxu0  ;;  %v2555_v15 = vmul.f32 %v2452_v62, %v10143_v48  ;;  %v12918_v48 = vld [vmem:[#allocation6_spill] sm:$0xff] }
 0x15e   : > { %3661 = vst.msk [vmem:[#allocation2 + $0x100] sm:$0xff] %vm3628_vm3, %v12665_v51  ;;  %3662 = vst.msk [vmem:[#allocation2 + $0x108] sm:$0xff] %vm3628_vm3, %v12665_v51  ;;  %v8183_v47 = vpop.f32.mrb[58].mxu1  ;;  %v2455_v8 = vpop.f32.mrb[59].mxu0 }
 0x15f   : > { %3663 = vst.msk [vmem:[#allocation2 + $0x110] sm:$0xff] %vm3628_vm3, %v12665_v51  ;;  %3664 = vst.msk [vmem:[#allocation2 + $0x118] sm:$0xff] %vm3628_vm3, %v12665_v51  ;;  %v12907_v51 = vld [vmem:[#allocation28_spill] sm:$0xff]  ;;  %v8757_v2 = vadd.f32 %v10568_v16, %v1937_v40  ;;  %v1938_v18 = vmul.f32 %v8183_v47, %v10155_v26  ;;  %v1835_v25 = vpop.f32.mrb[59].mxu1  ;;  %v2558_v16 = vmul.f32 %v8251_v11, %v10172_v61 }
 0x160   : > { %v2554_v55 = vmul.f32 %v8247_v32, %v12907_v51  ;;  %v1935_v32 = vmul.f32 %v1832_v22, %v10129_v4  ;;  %v4218_v51 = vld [vmem:[#allocation2 + $0x9] sm:$0xff]  ;;  %v1936_v24 = vmul.f32 %v1835_v25, %v10127_v3 }
 0x161   : > { %v10858_v22 = vadd.f32 %v8757_v2, %v2557_v14  ;;  %v8767_v30 = vadd.f32 %v10580_v38, %v1938_v18  ;;  %v12912_v11 = vld [vmem:[#allocation8_spill] sm:$0xff] }
 0x162   : > { %v10845_v34 = vadd.f32 %v8747_v0, %v2554_v55  ;;  %v3699_v0 = vld [vmem:[#allocation2] sm:$0xff]  ;;  %v8762_v58 = vadd.f32 %v10573_v59, %v1935_v32  ;;  %v8772_v62 = vadd.f32 %v10594_v9, %v1936_v24  ;;  %v12916_v24 = vld [vmem:[#allocation7_spill] sm:$0xff] }
 0x163   : > { %v4217_v55 = vld [vmem:[#allocation2 + $0x1] sm:$0xff]  ;;  %v3731_v17 = vpack.c.bf16 %v3700_v49, %v3699_v0  ;;  %v10866_v59 = vadd.f32 %v8767_v30, %v2558_v16  ;;  %v8254_v2 = vpop.f32.mrb[60].mxu0  ;;  %v12915_v16 = vld [vmem:[#allocation12_spill] sm:$0xff] }
 0x164   : > { %v10863_v40 = vadd.f32 %v8762_v58, %v2555_v15  ;;  %v4249_v47 = vpack.c.bf16 %v4218_v51, %v4217_v55  ;;  %v12911_v32 = vld [vmem:[#allocation10_spill] sm:$0xff]  ;;  %v8186_v49 = vpop.f32.mrb[60].mxu1  ;;  %v2468_v58 = vpop.f32.mrb[61].mxu0  ;;  %v12913_v15 = vld [vmem:[#allocation4_spill] sm:$0xff]  ;;  %v2561_v9 = vmul.f32 %v8254_v2, %v12915_v16  ;;  %v12922_v2 = vld [vmem:[#allocation3_spill] sm:$0xff] }
 0x165   : > { %8376 = vmatprep.mubr.msk.bf16.mxu1 %vm3628_vm3, %v3731_v17  ;;  %v2556_v0 = vmul.f32 %v2455_v8, %v12911_v32  ;;  %v1941_v14 = vmul.f32 %v8186_v49, %v12912_v11  ;;  %v1848_v18 = vpop.f32.mrb[61].mxu1  ;;  %v8255_v51 = vpop.f32.mrb[62].mxu0  ;;  %v12914_v30 = vld [vmem:[#allocation66_spill] sm:$0xff]  ;;  %v12917_v32 = vld [vmem:[#allocation67_spill] sm:$0xff] }
 0x166   : > { %8410 = vmatprep.mubr.msk.bf16.mxu0 %vm3628_vm3, %v4249_v47  ;;  %v1939_v25 = vmul.f32 %v1848_v18, %v12913_v15  ;;  %v8187_v17 = vpop.f32.mrb[62].mxu1  ;;  %v2559_v47 = vmul.f32 %v2468_v58, %v12918_v48  ;;  %v10883_v49 = vld [vmem:[%s12571_s2 + $0x8] sm:$0xf]  ;;  %v12924_v48 = vld [vmem:[#allocation5_spill] sm:$0xff] }
 0x167   : > { %v10871_v38 = vadd.f32 %v8772_v62, %v2556_v0  ;;  %v8777_v55 = vadd.f32 %v12914_v30, %v1941_v14  ;;  %v1942_v8 = vmul.f32 %v8187_v17, %v12916_v24  ;;  %v1851_v62 = vpop.f32.mrb[63].mxu1  ;;  %v2471_v0 = vpop.f32.mrb[63].mxu0  ;;  %12919 = vst [vmem:[#allocation47_spill] sm:$0xff] %v10883_v49  ;;  %v12921_v14 = vld [vmem:[#allocation9_spill] sm:$0xff]  ;;  %9272 = vmatprep.subr.msk.bf16.mxu1 %vm3796_vm2, %v10883_v49 }
 0x168   : > { %v8782_v61 = vadd.f32 %v12917_v32, %v1939_v25  ;;  %v2562_v30 = vmul.f32 %v8255_v51, %v12921_v14  ;;  %v1940_v16 = vmul.f32 %v1851_v62, %v12922_v2  ;;  %v12923_v25 = vld [vmem:[#allocation33_spill] sm:$0xff]  ;;  %v2560_v24 = vmul.f32 %v2471_v0, %v12924_v48  ;;  %v12930_v48 = vld [vmem:[#allocation32_spill] sm:$0xff] }
 0x169   : > { %v10885_v18 = vadd.f32 %v8777_v55, %v2561_v9  ;;  %v8787_v15 = vadd.f32 %v12920_v57, %v1942_v8  ;;  %v12925_v57 = vld [vmem:[#allocation37_spill] sm:$0xff] }
 0x16a   : > { %v10892_v32 = vadd.f32 %v8782_v61, %v2559_v47  ;;  %v8792_v17 = vadd.f32 %v12923_v25, %v1940_v16 }
 0x16b   : > { %v10894_v58 = vadd.f32 %v8787_v15, %v2562_v30  ;;  %v8258_v55 = vpop.f32.mrb[64].mxu0  ;;  %v12926_v15 = vld [vmem:[#allocation43_spill] sm:$0xff]  ;;  %v12927_v30 = vld [vmem:[#allocation30_spill] sm:$0xff] }
 0x16c   : > { %v8190_v11 = vpop.f32.mrb[64].mxu1  ;;  %v10898_v9 = vadd.f32 %v8792_v17, %v2560_v24  ;;  %v2484_v14 = vpop.f32.mrb[65].mxu0  ;;  %v2565_v47 = vmul.f32 %v8258_v55, %v12926_v15  ;;  %v12932_v55 = vld [vmem:[#allocation13_spill] sm:$0xff] }
 0x16d   : > { %v1945_v8 = vmul.f32 %v8190_v11, %v12925_v57  ;;  %v1864_v51 = vpop.f32.mrb[65].mxu1  ;;  %v8259_v49 = vpop.f32.mrb[66].mxu0  ;;  %v2563_v25 = vmul.f32 %v2484_v14, %v12927_v30  ;;  %v10910_v11 = vld [vmem:[%s12571_s2 + $0xc] sm:$0xf]  ;;  %v12935_v30 = vld [vmem:[#allocation17_spill] sm:$0xff] }
 0x16e   : > { %v1943_v62 = vmul.f32 %v1864_v51, %v12868_v27  ;;  %v8191_v2 = vpop.f32.mrb[66].mxu1  ;;  %v2487_v17 = vpop.f32.mrb[67].mxu0  ;;  %12928 = vst [vmem:[#allocation50_spill] sm:$0xff] %v10910_v11  ;;  %9273 = vmatprep.subr.msk.bf16.mxu0 %vm3796_vm2, %v10910_v11 }
 0x16f   : > { %v8797_v61 = vadd.f32 %v10649_v21, %v1945_v8  ;;  %v1946_v16 = vmul.f32 %v8191_v2, %v12871_v45  ;;  %v1867_v24 = vpop.f32.mrb[67].mxu1  ;;  %v12931_v21 = vld [vmem:[#allocation42_spill] sm:$0xff]  ;;  %v12934_v2 = vld [vmem:[#allocation35_spill] sm:$0xff]  ;;  %v2564_v45 = vmul.f32 %v2487_v17, %v12935_v30 }
 0x170   : > { %v8802_v0 = vadd.f32 %v10652_v20, %v1943_v62  ;;  %v2566_v8 = vmul.f32 %v8259_v49, %v12931_v21  ;;  %v1944_v15 = vmul.f32 %v1867_v24, %v12932_v55  ;;  %v12938_v24 = vld [vmem:[#allocation48_spill] sm:$0xff] }
 0x171   : > { %v10912_v51 = vadd.f32 %v8797_v61, %v2565_v47  ;;  %v8807_v27 = vadd.f32 %v12930_v48, %v1946_v16  ;;  %v12937_v48 = vld [vmem:[#allocation57_spill] sm:$0xff] }
 0x172   : > { %v10919_v20 = vadd.f32 %v8802_v0, %v2563_v25  ;;  %v8812_v62 = vadd.f32 %v12934_v2, %v1944_v15  ;;  %v12941_v2 = vld [vmem:[#allocation53_spill] sm:$0xff] }
 0x173   : > { %12929 = vst [vmem:[#allocation51_spill] sm:$0xff] %v10912_v51  ;;  %v10921_v14 = vadd.f32 %v8807_v27, %v2566_v8  ;;  %v8262_v61 = vpop.f32.mrb[68].mxu0  ;;  %v12939_v27 = vld [vmem:[#allocation59_spill] sm:$0xff] }
 0x174   : > { %v8194_v57 = vpop.f32.mrb[68].mxu1  ;;  %v10925_v47 = vadd.f32 %v8812_v62, %v2564_v45  ;;  %v2500_v21 = vpop.f32.mrb[69].mxu0  ;;  %v2569_v25 = vmul.f32 %v8262_v61, %v12939_v27  ;;  %v12940_v8 = vld [vmem:[#allocation39_spill] sm:$0xff]  ;;  %v12943_v61 = vld [vmem:[#allocation56_spill] sm:$0xff] }
 0x175   : > { %12933 = vst [vmem:[#allocation52_spill] sm:$0xff] %v10921_v14  ;;  %v1949_v16 = vmul.f32 %v8194_v57, %v12937_v48  ;;  %v1880_v49 = vpop.f32.mrb[69].mxu1  ;;  %v8263_v11 = vpop.f32.mrb[70].mxu0  ;;  %v2567_v30 = vmul.f32 %v2500_v21, %v12941_v2  ;;  %v12942_v48 = vld [vmem:[#allocation60_spill] sm:$0xff] }
 0x176   : > { %12936 = vst [vmem:[#allocation55_spill] sm:$0xff] %v10925_v47  ;;  %v1947_v55 = vmul.f32 %v1880_v49, %v12938_v24  ;;  %v8195_v51 = vpop.f32.mrb[70].mxu1  ;;  %v2503_v62 = vpop.f32.mrb[71].mxu0  ;;  %v2570_v49 = vmul.f32 %v8263_v11, %v12942_v48 }
 0x177   : > { %v8817_v0 = vadd.f32 %v10675_v39, %v1949_v16  ;;  %v1950_v15 = vmul.f32 %v8195_v51, %v10497_v13  ;;  %v1883_v45 = vpop.f32.mrb[71].mxu1 }
 0x178   : > { %v8822_v17 = vadd.f32 %v12940_v8, %v1947_v55  ;;  %v1948_v24 = vmul.f32 %v1883_v45, %v12888_v43  ;;  %v2568_v55 = vmul.f32 %v2503_v62, %v12943_v61 }
 0x179   : > { %v10934_v47 = vadd.f32 %v8817_v0, %v2569_v25  ;;  %v8827_v57 = vadd.f32 %v10684_v63, %v1950_v15  ;;  %v12945_v0 = vld [vmem:[#allocation65_spill] sm:$0xff] }
 0x17a   : > { %v10939_v14 = vadd.f32 %v8822_v17, %v2567_v30  ;;  %v8832_v51 = vadd.f32 %v10689_v36, %v1948_v24  ;;  %v12946_v15 = vld [vmem:[#allocation61_spill] sm:$0xff]  ;;  %v12947_v17 = vld [vmem:[#allocation68_spill] sm:$0xff] }
 0x17b   : > { %v10941_v39 = vadd.f32 %v8827_v57, %v2570_v49  ;;  %v8266_v21 = vpop.f32.mrb[72].mxu0  ;;  %v12948_v24 = vld [vmem:[#allocation44_spill] sm:$0xff]  ;;  %v12949_v49 = vld [vmem:[#allocation63_spill] sm:$0xff] }
 0x17c   : > { %v8198_v16 = vpop.f32.mrb[72].mxu1  ;;  %v10945_v8 = vadd.f32 %v8832_v51, %v2568_v55  ;;  %v2516_v63 = vpop.f32.mrb[73].mxu0  ;;  %v2573_v57 = vmul.f32 %v8266_v21, %v12947_v17  ;;  %v12951_v21 = vld [vmem:[#allocation64_spill] sm:$0xff]  ;;  %v12956_v17 = vld [vmem:[#allocation45_spill] sm:$0xff] }
 0x17d   : > { %v1953_v25 = vmul.f32 %v8198_v16, %v12945_v0  ;;  %v1896_v2 = vpop.f32.mrb[73].mxu1  ;;  %v8267_v45 = vpop.f32.mrb[74].mxu0  ;;  %v2571_v61 = vmul.f32 %v2516_v63, %v12949_v49  ;;  %v12950_v0 = vld [vmem:[#allocation31_spill] sm:$0xff] }
 0x17e   : > { %12944 = vst [vmem:[#allocation21_spill] sm:$0xff] %v10945_v8  ;;  %v1951_v11 = vmul.f32 %v1896_v2, %v12946_v15  ;;  %v8199_v48 = vpop.f32.mrb[74].mxu1  ;;  %v2519_v55 = vpop.f32.mrb[75].mxu0  ;;  %v2574_v2 = vmul.f32 %v8267_v45, %v12950_v0 }
 0x17f   : > { %v8837_v30 = vadd.f32 %v10701_v60, %v1953_v25  ;;  %v1954_v36 = vmul.f32 %v8199_v48, %v10612_v29  ;;  %v1899_v51 = vpop.f32.mrb[75].mxu1  ;;  %v2572_v25 = vmul.f32 %v2519_v55, %v12951_v21  ;;  %v12955_v55 = vld [vmem:[#allocation38_spill] sm:$0xff] }
 0x180   : > { %v8842_v62 = vadd.f32 %v12948_v24, %v1951_v11  ;;  %v1952_v15 = vmul.f32 %v1899_v51, %v10558_v12 }
 0x181   : > { %v10954_v27 = vadd.f32 %v8837_v30, %v2573_v57  ;;  %v8847_v16 = vadd.f32 %v10710_v37, %v1954_v36  ;;  %v12952_v30 = vld [vmem:[#allocation41_spill] sm:$0xff]  ;;  %v12953_v36 = vld [vmem:[#allocation34_spill] sm:$0xff] }
 0x182   : > { %v10959_v8 = vadd.f32 %v8842_v62, %v2571_v61  ;;  %v8852_v48 = vadd.f32 %v10713_v33, %v1952_v15  ;;  %v12954_v62 = vld [vmem:[#allocation49_spill] sm:$0xff] }
 0x183   : > { %v10961_v60 = vadd.f32 %v8847_v16, %v2574_v2  ;;  %v8270_v63 = vpop.f32.mrb[76].mxu0 }
 0x184   : > { %v8202_v11 = vpop.f32.mrb[76].mxu1  ;;  %v10965_v24 = vadd.f32 %v8852_v48, %v2572_v25  ;;  %v2532_v37 = vpop.f32.mrb[77].mxu0  ;;  %v2577_v16 = vmul.f32 %v8270_v63, %v12954_v62  ;;  %v12957_v63 = vld [vmem:[#allocation46_spill] sm:$0xff]  ;;  %v12960_v62 = vld [vmem:[#allocation19_spill] sm:$0xff] }
 0x185   : > { %v1957_v57 = vmul.f32 %v8202_v11, %v12952_v30  ;;  %v1912_v49 = vpop.f32.mrb[77].mxu1  ;;  %v8271_v51 = vpop.f32.mrb[78].mxu0  ;;  %v2575_v2 = vmul.f32 %v2532_v37, %v12955_v55  ;;  %v12959_v55 = vld [vmem:[#allocation22_spill] sm:$0xff] }
 0x186   : > { %v1955_v45 = vmul.f32 %v1912_v49, %v12953_v36  ;;  %v8203_v0 = vpop.f32.mrb[78].mxu1  ;;  %v2535_v25 = vpop.f32.mrb[79].mxu0  ;;  %v2578_v49 = vmul.f32 %v8271_v51, %v12956_v17 }
 0x187   : > { %v8857_v61 = vadd.f32 %v10727_v53, %v1957_v57  ;;  %v1958_v33 = vmul.f32 %v8203_v0, %v10715_v6  ;;  %v1915_v48 = vpop.f32.mrb[79].mxu1  ;;  %v12958_v57 = vld [vmem:[#allocation40_spill] sm:$0xff] }
 0x188   : > { %v8862_v15 = vadd.f32 %v10730_v56, %v1955_v45  ;;  %v1956_v36 = vmul.f32 %v1915_v48, %v10665_v19  ;;  %v2576_v56 = vmul.f32 %v2535_v25, %v12958_v57 }
 0x189   : > { %v10974_v21 = vadd.f32 %v8857_v61, %v2577_v16  ;;  %v8867_v11 = vadd.f32 %v10734_v31, %v1958_v33 }
 0x18a   : > { %v10979_v30 = vadd.f32 %v8862_v15, %v2575_v2  ;;  %v8872_v0 = vadd.f32 %v12957_v63, %v1956_v36 }
 0x18b   : > { %v10981_v53 = vadd.f32 %v8867_v11, %v2578_v49  ;;  %v8276_v45 = vpop.f32.mrb[80].mxu0 }
 0x18c   : > { %v10985_v37 = vadd.f32 %v8872_v0, %v2576_v56  ;;  %v2875_v61 = vmul.f32 %v8276_v45, %v12959_v55  ;;  %v2746_v16 = vpop.f32.mrb[81].mxu0 }
 0x18d   : > { %v2873_v31 = vmul.f32 %v2746_v16, %v12960_v62  ;;  %v8277_v33 = vpop.f32.mrb[82].mxu0 }
 0x18e   : > { %v2876_v51 = vmul.f32 %v8277_v33, %v10050_v1  ;;  %v2749_v48 = vpop.f32.mrb[83].mxu0  ;;  %v10991_v15 = vadd.f32 %v10746_v46, %v2875_v61 }
 0x18f   : > { %v2874_v2 = vmul.f32 %v2749_v48, %v12904_v52  ;;  %v10995_v36 = vadd.f32 %v10751_v35, %v2873_v31 }
 0x190   : > { %v10998_v25 = vadd.f32 %v10754_v28, %v2876_v51 }
 0x191   : > { %v11001_v55 = vadd.f32 %v10829_v7, %v2874_v2 }
 0x193   : > { %v8280_v11 = vpop.f32.mrb[84].mxu0 }
 0x194   : > { %v2879_v62 = vmul.f32 %v8280_v11, %v10094_v44  ;;  %v2762_v49 = vpop.f32.mrb[85].mxu0 }
 0x195   : > { %v2877_v1 = vmul.f32 %v2762_v49, %v10072_v10  ;;  %v8281_v63 = vpop.f32.mrb[86].mxu0 }
 0x196   : > { %v2880_v46 = vmul.f32 %v8281_v63, %v10092_v42  ;;  %v2765_v0 = vpop.f32.mrb[87].mxu0  ;;  %v11007_v52 = vadd.f32 %v10838_v54, %v2879_v62 }
 0x197   : > { %v2878_v35 = vmul.f32 %v2765_v0, %v12908_v5  ;;  %v11011_v28 = vadd.f32 %v10843_v23, %v2877_v1 }
 0x198   : > { %v11014_v7 = vadd.f32 %v10845_v34, %v2880_v46  ;;  %v12965_v46 = vld [vmem:[#allocation37_spill] sm:$0xff] }
 0x199   : > { %v11017_v44 = vadd.f32 %v10849_v41, %v2878_v35 }
 0x19b   : > { %v8284_v56 = vpop.f32.mrb[88].mxu0 }
 0x19c   : > { %v2883_v10 = vmul.f32 %v8284_v56, %v10157_v50  ;;  %v2778_v45 = vpop.f32.mrb[89].mxu0  ;;  %v12966_v56 = vld [vmem:[#allocation16_spill] sm:$0xff] }
 0x19d   : > { %v2881_v42 = vmul.f32 %v2778_v45, %v10129_v4  ;;  %v8285_v61 = vpop.f32.mrb[90].mxu0  ;;  %v12961_v4 = vld [vmem:[#allocation8_spill] sm:$0xff] }
 0x19e   : > { %v2884_v54 = vmul.f32 %v8285_v61, %v10155_v26  ;;  %v2781_v16 = vpop.f32.mrb[91].mxu0  ;;  %v11023_v5 = vadd.f32 %v10858_v22, %v2883_v10  ;;  %v12962_v26 = vld [vmem:[#allocation4_spill] sm:$0xff]  ;;  %v12963_v22 = vld [vmem:[#allocation7_spill] sm:$0xff] }
 0x19f   : > { %v2882_v23 = vmul.f32 %v2781_v16, %v10127_v3  ;;  %v11027_v34 = vadd.f32 %v10863_v40, %v2881_v42  ;;  %v12964_v40 = vld [vmem:[#allocation3_spill] sm:$0xff] }
 0x1a0   : > { %v11030_v41 = vadd.f32 %v10866_v59, %v2884_v54  ;;  %v12968_v54 = vld [vmem:[#allocation51_spill] sm:$0xff] }
 0x1a1   : > { %v11033_v50 = vadd.f32 %v10871_v38, %v2882_v23 }
 0x1a3   : > { %v8288_v31 = vpop.f32.mrb[92].mxu0 }
 0x1a4   : > { %v2887_v33 = vmul.f32 %v8288_v31, %v12961_v4  ;;  %v2794_v51 = vpop.f32.mrb[93].mxu0  ;;  %v12971_v4 = vld [vmem:[#allocation55_spill] sm:$0xff] }
 0x1a5   : > { %v2885_v48 = vmul.f32 %v2794_v51, %v12962_v26  ;;  %v8289_v2 = vpop.f32.mrb[94].mxu0  ;;  %v12972_v26 = vld [vmem:[#allocation57_spill] sm:$0xff] }
 0x1a6   : > { %v2888_v11 = vmul.f32 %v8289_v2, %v12963_v22  ;;  %v2797_v62 = vpop.f32.mrb[95].mxu0  ;;  %v11039_v3 = vadd.f32 %v10885_v18, %v2887_v33  ;;  %v12967_v18 = vld [vmem:[#allocation36_spill] sm:$0xff] }
 0x1a7   : > { %v2886_v49 = vmul.f32 %v2797_v62, %v12964_v40  ;;  %v11043_v59 = vadd.f32 %v10892_v32, %v2885_v48  ;;  %v12969_v32 = vld [vmem:[#allocation13_spill] sm:$0xff]  ;;  %v12973_v22 = vld [vmem:[#allocation48_spill] sm:$0xff] }
 0x1a8   : > { %v11046_v38 = vadd.f32 %v10894_v58, %v2888_v11 }
 0x1a9   : > { %v11049_v1 = vadd.f32 %v10898_v9, %v2886_v49  ;;  %v12970_v9 = vld [vmem:[#allocation52_spill] sm:$0xff] }
 0x1ab   : > { %v8292_v63 = vpop.f32.mrb[96].mxu0 }
 0x1ac   : > { %v2891_v0 = vmul.f32 %v8292_v63, %v12965_v46  ;;  %v2810_v35 = vpop.f32.mrb[97].mxu0 }
 0x1ad   : > { %v2889_v10 = vmul.f32 %v2810_v35, %v12966_v56  ;;  %v8293_v45 = vpop.f32.mrb[98].mxu0  ;;  %v12974_v35 = vld [vmem:[#allocation21_spill] sm:$0xff] }
 0x1ae   : > { %v2892_v42 = vmul.f32 %v8293_v45, %v12967_v18  ;;  %v2813_v61 = vpop.f32.mrb[99].mxu0  ;;  %v11055_v16 = vadd.f32 %v12968_v54, %v2891_v0  ;;  %v12975_v45 = vld [vmem:[#allocation65_spill] sm:$0xff] }
 0x1af   : > { %v2890_v23 = vmul.f32 %v2813_v61, %v12969_v32  ;;  %v11059_v58 = vadd.f32 %v10919_v20, %v2889_v10 }
 0x1b0   : > { %v11062_v31 = vadd.f32 %v12970_v9, %v2892_v42 }
 0x1b1   : > { %v11065_v33 = vadd.f32 %v12971_v4, %v2890_v23 }
 0x1b3   : > { %v8296_v51 = vpop.f32.mrb[100].mxu0 }
 0x1b4   : > { %v2895_v48 = vmul.f32 %v8296_v51, %v12972_v26  ;;  %v2826_v2 = vpop.f32.mrb[101].mxu0  ;;  %v12977_v51 = vld [vmem:[#allocation41_spill] sm:$0xff] }
 0x1b5   : > { %v2893_v11 = vmul.f32 %v2826_v2, %v12973_v22  ;;  %v8297_v62 = vpop.f32.mrb[102].mxu0 }
 0x1b6   : > { %v2896_v40 = vmul.f32 %v8297_v62, %v10497_v13  ;;  %v2829_v49 = vpop.f32.mrb[103].mxu0  ;;  %v11071_v63 = vadd.f32 %v10934_v47, %v2895_v48  ;;  %v12976_v13 = vld [vmem:[#allocation61_spill] sm:$0xff] }
 0x1b7   : > { %v2894_v20 = vmul.f32 %v2829_v49, %v12888_v43  ;;  %v11075_v46 = vadd.f32 %v10939_v14, %v2893_v11 }
 0x1b8   : > { %v11078_v0 = vadd.f32 %v10941_v39, %v2896_v40 }
 0x1b9   : > { %v11081_v56 = vadd.f32 %v12974_v35, %v2894_v20 }
 0x1bb   : > { %v8300_v10 = vpop.f32.mrb[104].mxu0 }
 0x1bc   : > { %v2899_v18 = vmul.f32 %v8300_v10, %v12975_v45  ;;  %v2842_v42 = vpop.f32.mrb[105].mxu0 }
 0x1bd   : > { %v2897_v61 = vmul.f32 %v2842_v42, %v12976_v13  ;;  %v8301_v54 = vpop.f32.mrb[106].mxu0 }
 0x1be   : > { %v2900_v47 = vmul.f32 %v8301_v54, %v10612_v29  ;;  %v2845_v32 = vpop.f32.mrb[107].mxu0  ;;  %v11087_v43 = vadd.f32 %v10954_v27, %v2899_v18  ;;  %v12978_v29 = vld [vmem:[#allocation34_spill] sm:$0xff] }
 0x1bf   : > { %v2898_v14 = vmul.f32 %v2845_v32, %v10558_v12  ;;  %v11091_v39 = vadd.f32 %v10959_v8, %v2897_v61  ;;  %v12981_v61 = vld [vmem:[#allocation23_spill] sm:$0xff] }
 0x1c0   : > { %v11094_v23 = vadd.f32 %v10961_v60, %v2900_v47 }
 0x1c1   : > { %v11097_v9 = vadd.f32 %v10965_v24, %v2898_v14 }
 0x1c3   : > { %v8304_v4 = vpop.f32.mrb[108].mxu0 }
 0x1c4   : > { %v2903_v26 = vmul.f32 %v8304_v4, %v12977_v51  ;;  %v2858_v48 = vpop.f32.mrb[109].mxu0  ;;  %v12982_v4 = vld [vmem:[#allocation20_spill] sm:$0xff] }
 0x1c5   : > { %v2901_v2 = vmul.f32 %v2858_v48, %v12978_v29  ;;  %v8305_v22 = vpop.f32.mrb[110].mxu0 }
 0x1c6   : > { %v2904_v27 = vmul.f32 %v8305_v22, %v10715_v6  ;;  %v2861_v11 = vpop.f32.mrb[111].mxu0  ;;  %v11103_v12 = vadd.f32 %v10974_v21, %v2903_v26  ;;  %v12979_v6 = vld [vmem:[#allocation24_spill] sm:$0xff] }
 0x1c7   : > { %v2902_v8 = vmul.f32 %v2861_v11, %v10665_v19  ;;  %v11107_v60 = vadd.f32 %v10979_v30, %v2901_v2  ;;  %v11120_v19 = vld [vmem:[%s12573_s4] ss:$0 sm:$0xff] }
 0x1c8   : > { %v11110_v24 = vadd.f32 %v10981_v53, %v2904_v27  ;;  %v12980_v53 = vld [vmem:[#allocation18_spill] sm:$0xff] }
 0x1c9   : > { %v11113_v62 = vadd.f32 %v10985_v37, %v2902_v8 }
 0x1cb   : > { %v8344_v49 = vpop.f32.mrb[112].mxu0 }
 0x1cc   : > { %v8310_v40 = vpop.f32.mrb[16].mxu1  ;;  %v3495_v35 = vmul.f32 %v8344_v49, %v12979_v6  ;;  %v3366_v21 = vpop.f32.mrb[113].mxu0  ;;  %v12983_v49 = vld [vmem:[#allocation29_spill] sm:$0xff] }
 0x1cd   : > { %v8720_v20 = vadd.f32 %v10991_v15, %v8310_v40  ;;  %v3072_v10 = vpop.f32.mrb[17].mxu1  ;;  %v3493_v45 = vmul.f32 %v3366_v21, %v12980_v53  ;;  %v8345_v37 = vpop.f32.mrb[114].mxu0 }
 0x1ce   : > { %v8725_v30 = vadd.f32 %v10995_v36, %v3072_v10  ;;  %v8311_v18 = vpop.f32.mrb[18].mxu1  ;;  %v3496_v15 = vmul.f32 %v8345_v37, %v12981_v61  ;;  %v3369_v47 = vpop.f32.mrb[115].mxu0 }
 0x1cf   : > { %v3527_v42 = vadd.f32 %v8720_v20, %v3495_v35  ;;  %v8730_v13 = vadd.f32 %v10998_v25, %v8311_v18  ;;  %v3075_v54 = vpop.f32.mrb[19].mxu1  ;;  %v3494_v51 = vmul.f32 %v3369_v47, %v12982_v4 }
 0x1d0   : > { %v3525_v32 = vadd.f32 %v8725_v30, %v3493_v45  ;;  %v8735_v14 = vadd.f32 %v11001_v55, %v3075_v54  ;;  %v12984_v30 = vld [vmem:[#allocation27_spill] sm:$0xff] }
 0x1d1   : > { %v3566_v26 = vadd.f32 %v11120_v19, %v3527_v42  ;;  %v3528_v48 = vadd.f32 %v8730_v13, %v3496_v15  ;;  %v12985_v13 = vld [vmem:[#allocation28_spill] sm:$0xff] }
 0x1d2   : > { %v3564_v36 = vadd.f32 %v11120_v19, %v3525_v32  ;;  %v3526_v29 = vadd.f32 %v8735_v14, %v3494_v51  ;;  %v12986_v32 = vld [vmem:[#allocation26_spill] sm:$0xff] }
 0x1d3   : > { %v3598_v2 = vmax.f32 %v3566_v26, 0.0  ;;  %v3567_v22 = vadd.f32 %v11120_v19, %v3528_v48  ;;  %v8348_v8 = vpop.f32.mrb[116].mxu0 }
 0x1d4   : > { %v3596_v27 = vmax.f32 %v3564_v36, 0.0  ;;  %v3565_v25 = vadd.f32 %v11120_v19, %v3526_v29  ;;  %v8314_v11 = vpop.f32.mrb[20].mxu1  ;;  %v3499_v20 = vmul.f32 %v8348_v8, %v12983_v49  ;;  %v3382_v35 = vpop.f32.mrb[117].mxu0 }
 0x1d5   : > { %3669 = vst.msk [vmem:[#allocation2 + $0x21] sm:$0xff] %vm3628_vm3, %v3598_v2  ;;  %v3599_v40 = vmax.f32 %v3567_v22, 0.0  ;;  %v8740_v55 = vadd.f32 %v11007_v52, %v8314_v11  ;;  %v3088_v6 = vpop.f32.mrb[21].mxu1  ;;  %v3497_v53 = vmul.f32 %v3382_v35, %v12984_v30  ;;  %v8349_v18 = vpop.f32.mrb[118].mxu0 }
 0x1d6   : > { %3667 = vst.msk [vmem:[#allocation2 + $0x11] sm:$0xff] %vm3628_vm3, %v3596_v27  ;;  %v3597_v10 = vmax.f32 %v3565_v25, 0.0  ;;  %v8745_v21 = vadd.f32 %v11011_v28, %v3088_v6  ;;  %v8315_v45 = vpop.f32.mrb[22].mxu1  ;;  %v3500_v52 = vmul.f32 %v8349_v18, %v12985_v13  ;;  %v3385_v15 = vpop.f32.mrb[119].mxu0  ;;  %v12987_v25 = vld [vmem:[#allocation15_spill] sm:$0xff]  ;;  %v12989_v18 = vld [vmem:[#allocation14_spill] sm:$0xff] }
 0x1d7   : > { %3670 = vst.msk [vmem:[#allocation2 + $0x29] sm:$0xff] %vm3628_vm3, %v3599_v40  ;;  %v3531_v37 = vadd.f32 %v8740_v55, %v3499_v20  ;;  %v8750_v42 = vadd.f32 %v11014_v7, %v8315_v45  ;;  %v3091_v61 = vpop.f32.mrb[23].mxu1  ;;  %v3498_v28 = vmul.f32 %v3385_v15, %v12986_v32  ;;  %v12988_v20 = vld [vmem:[#allocation11_spill] sm:$0xff] }
 0x1d8   : > { %3668 = vst.msk [vmem:[#allocation2 + $0x19] sm:$0xff] %vm3628_vm3, %v3597_v10  ;;  %v3529_v54 = vadd.f32 %v8745_v21, %v3497_v53  ;;  %v8755_v47 = vadd.f32 %v11017_v44, %v3091_v61  ;;  %v12990_v15 = vld [vmem:[#allocation47_spill] sm:$0xff] }
 0x1d9   : > { %v3570_v14 = vadd.f32 %v11120_v19, %v3531_v37  ;;  %v3532_v4 = vadd.f32 %v8750_v42, %v3500_v52 }
 0x1da   : > { %v3568_v51 = vadd.f32 %v11120_v19, %v3529_v54  ;;  %v3530_v26 = vadd.f32 %v8755_v47, %v3498_v28  ;;  %v12991_v28 = vld [vmem:[#allocation10_spill] sm:$0xff] }
 0x1db   : > { %v3602_v48 = vmax.f32 %v3570_v14, 0.0  ;;  %v3571_v7 = vadd.f32 %v11120_v19, %v3532_v4  ;;  %v8352_v22 = vpop.f32.mrb[120].mxu0 }
 0x1dc   : > { %v3600_v36 = vmax.f32 %v3568_v51, 0.0  ;;  %v3569_v29 = vadd.f32 %v11120_v19, %v3530_v26  ;;  %v8318_v2 = vpop.f32.mrb[24].mxu1  ;;  %v3503_v11 = vmul.f32 %v8352_v22, %v12987_v25  ;;  %v3398_v40 = vpop.f32.mrb[121].mxu0  ;;  %v12992_v22 = vld [vmem:[#allocation50_spill] sm:$0xff] }
 0x1dd   : > { %3673 = vst.msk [vmem:[#allocation2 + $0x41] sm:$0xff] %vm3628_vm3, %v3602_v48  ;;  %v3603_v27 = vmax.f32 %v3571_v7, 0.0  ;;  %v8760_v44 = vadd.f32 %v11023_v5, %v8318_v2  ;;  %v3104_v8 = vpop.f32.mrb[25].mxu1  ;;  %v3501_v6 = vmul.f32 %v3398_v40, %v12988_v20  ;;  %v8353_v10 = vpop.f32.mrb[122].mxu0  ;;  %v3701_v21 = vld [vmem:[#allocation2 + $0x10] sm:$0xff] }
 0x1de   : > { %3671 = vst.msk [vmem:[#allocation2 + $0x31] sm:$0xff] %vm3628_vm3, %v3600_v36  ;;  %v3601_v55 = vmax.f32 %v3569_v29, 0.0  ;;  %v8765_v49 = vadd.f32 %v11027_v34, %v3104_v8  ;;  %v8319_v35 = vpop.f32.mrb[26].mxu1  ;;  %v3704_v30 = vld [vmem:[#allocation2 + $0x28] sm:$0xff]  ;;  %v3504_v37 = vmul.f32 %v8353_v10, %v12989_v18  ;;  %v3401_v13 = vpop.f32.mrb[123].mxu0  ;;  %v4610_v34 = vsel %vm3796_vm2, %v12990_v15, 0 }
 0x1df   : > { %v4222_v53 = vld [vmem:[#allocation2 + $0x29] sm:$0xff]  ;;  %3674 = vst.msk [vmem:[#allocation2 + $0x49] sm:$0xff] %vm3628_vm3, %v3603_v27  ;;  %v3535_v45 = vadd.f32 %v8760_v44, %v3503_v11  ;;  %v8770_v5 = vadd.f32 %v11030_v41, %v8319_v35  ;;  %v3107_v42 = vpop.f32.mrb[27].mxu1  ;;  %v3702_v52 = vld [vmem:[#allocation2 + $0x18] sm:$0xff]  ;;  %v3703_v54 = vld [vmem:[#allocation2 + $0x20] sm:$0xff]  ;;  %v3502_v14 = vmul.f32 %v3401_v13, %v12991_v28  ;;  %v5128_v27 = vsel %vm3796_vm2, %v12992_v22, 0 }
 0x1e0   : > { %v4220_v61 = vld [vmem:[#allocation2 + $0x19] sm:$0xff]  ;;  %3672 = vst.msk [vmem:[#allocation2 + $0x39] sm:$0xff] %vm3628_vm3, %v3601_v55  ;;  %v3533_v47 = vadd.f32 %v8765_v49, %v3501_v6  ;;  %v8775_v32 = vadd.f32 %v11033_v50, %v3107_v42  ;;  %v11162_v4 = vpack.c.bf16 %v3702_v52, %v3701_v21  ;;  %v4219_v41 = vld [vmem:[#allocation2 + $0x11] sm:$0xff]  ;;  %v11167_v7 = vpack.c.bf16 %v3704_v30, %v3703_v54  ;;  %v4221_v36 = vld [vmem:[#allocation2 + $0x21] sm:$0xff] }
 0x1e1   : > { %v3574_v51 = vadd.f32 %v11120_v19, %v3535_v45  ;;  %v3536_v26 = vadd.f32 %v8770_v5, %v3504_v37  ;;  %v11165_v48 = vpack.c.bf16 %v4220_v61, %v4219_v41  ;;  %v11172_v50 = vpack.c.bf16 %v4222_v53, %v4221_v36  ;;  %v11179_v44 = vld [vmem:[%s12571_s2 + $0x14] sm:$0xf]  ;;  %v11187_v8 = vld [vmem:[%s12571_s2 + $0x10] sm:$0xf]  ;;  %v12994_v18 = vld [vmem:[#allocation6_spill] sm:$0xff] }
 0x1e2   : > { %v3572_v29 = vadd.f32 %v11120_v19, %v3533_v47  ;;  %v3534_v2 = vadd.f32 %v8775_v32, %v3502_v14  ;;  %8377 = vmatmul.mubr.msk.bf16.vlgmr.msra.gmra.mrb[80].mxu1 %vm3628_vm3, %v11162_v4  ;;  %v12993_v10 = vld [vmem:[#allocation12_spill] sm:$0xff]  ;;  %v12995_v54 = vld [vmem:[#allocation9_spill] sm:$0xff] }
 0x1e3   : > { %v3606_v25 = vmax.f32 %v3574_v51, 0.0  ;;  %v3575_v11 = vadd.f32 %v11120_v19, %v3536_v26  ;;  %8411 = vmatmul.mubr.msk.bf16.vlgmr.msra.gmra.mrb[144].mxu0 %vm3628_vm3, %v11165_v48  ;;  %8443 = vmatpush3.bf16.msra.mxu1 %v4610_v34  ;;  %v8356_v20 = vpop.f32.mrb[124].mxu0  ;;  %v12996_v36 = vld [vmem:[#allocation5_spill] sm:$0xff] }
 0x1e4   : > { %v3604_v40 = vmax.f32 %v3572_v29, 0.0  ;;  %v3573_v55 = vadd.f32 %v11120_v19, %v3534_v2  ;;  %8380 = vmatprep.mubr.msk.bf16.mxu1 %vm3628_vm3, %v11167_v7  ;;  %8414 = vmatprep.mubr.msk.bf16.mxu0 %vm3628_vm3, %v11172_v50  ;;  %v8322_v49 = vpop.f32.mrb[28].mxu1  ;;  %v3507_v21 = vmul.f32 %v8356_v20, %v12993_v10  ;;  %v3414_v53 = vpop.f32.mrb[125].mxu0 }
 0x1e5   : > { %3677 = vst.msk [vmem:[#allocation2 + $0x61] sm:$0xff] %vm3628_vm3, %v3606_v25  ;;  %v3607_v6 = vmax.f32 %v3575_v11, 0.0  ;;  %v8780_v35 = vadd.f32 %v11039_v3, %v8322_v49  ;;  %v3120_v30 = vpop.f32.mrb[29].mxu1  ;;  %8477 = vmatpush3.bf16.msra.mxu0 %v5128_v27  ;;  %9275 = vmatprep.subr.msk.bf16.mxu1 %vm3796_vm2, %v11179_v44  ;;  %v3505_v37 = vmul.f32 %v3414_v53, %v12994_v18  ;;  %v8357_v13 = vpop.f32.mrb[126].mxu0  ;;  %v3705_v52 = vld [vmem:[#allocation2 + $0x30] sm:$0xff] }
 0x1e6   : > { %3675 = vst.msk [vmem:[#allocation2 + $0x51] sm:$0xff] %vm3628_vm3, %v3604_v40  ;;  %v3605_v45 = vmax.f32 %v3573_v55, 0.0  ;;  %v8785_v5 = vadd.f32 %v11043_v59, %v3120_v30  ;;  %v8323_v42 = vpop.f32.mrb[30].mxu1  ;;  %v3708_v61 = vld [vmem:[#allocation2 + $0x48] sm:$0xff]  ;;  %9274 = vmatprep.subr.msk.bf16.mxu0 %vm3796_vm2, %v11187_v8  ;;  %v3508_v47 = vmul.f32 %v8357_v13, %v12995_v54  ;;  %v3417_v28 = vpop.f32.mrb[127].mxu0  ;;  %v4223_v22 = vld [vmem:[#allocation2 + $0x31] sm:$0xff] }
 0x1e7   : > { %v4226_v3 = vld [vmem:[#allocation2 + $0x49] sm:$0xff]  ;;  %3678 = vst.msk [vmem:[#allocation2 + $0x69] sm:$0xff] %vm3628_vm3, %v3607_v6  ;;  %v3539_v15 = vadd.f32 %v8780_v35, %v3507_v21  ;;  %v8790_v34 = vadd.f32 %v11046_v38, %v8323_v42  ;;  %v3123_v32 = vpop.f32.mrb[31].mxu1  ;;  %v3706_v59 = vld [vmem:[#allocation2 + $0x38] sm:$0xff]  ;;  %v3707_v41 = vld [vmem:[#allocation2 + $0x40] sm:$0xff]  ;;  %v3506_v29 = vmul.f32 %v3417_v28, %v12996_v36 }
 0x1e8   : > { %v4224_v14 = vld [vmem:[#allocation2 + $0x39] sm:$0xff]  ;;  %3676 = vst.msk [vmem:[#allocation2 + $0x59] sm:$0xff] %vm3628_vm3, %v3605_v45  ;;  %v3537_v51 = vadd.f32 %v8785_v5, %v3505_v37  ;;  %v8795_v26 = vadd.f32 %v11049_v1, %v3123_v32  ;;  %v11210_v2 = vpack.c.bf16 %v3706_v59, %v3705_v52  ;;  %v11215_v11 = vpack.c.bf16 %v3708_v61, %v3707_v41  ;;  %v4225_v40 = vld [vmem:[#allocation2 + $0x41] sm:$0xff] }
 0x1e9   : > { %v3578_v27 = vadd.f32 %v11120_v19, %v3539_v15  ;;  %v3540_v38 = vadd.f32 %v8790_v34, %v3508_v47  ;;  %v11213_v25 = vpack.c.bf16 %v4224_v14, %v4223_v22  ;;  %v11220_v1 = vpack.c.bf16 %v4226_v3, %v4225_v40  ;;  %v12997_v5 = vld [vmem:[#allocation43_spill] sm:$0xff]  ;;  %v12998_v61 = vld [vmem:[#allocation30_spill] sm:$0xff] }
 0x1ea   : > { %v3576_v55 = vadd.f32 %v11120_v19, %v3537_v51  ;;  %v3538_v49 = vadd.f32 %v8795_v26, %v3506_v29  ;;  %8381 = vmatmul.mubr.msk.bf16.gmra.mrb[84].mxu1 %vm3628_vm3, %v11210_v2  ;;  %v12999_v59 = vld [vmem:[#allocation42_spill] sm:$0xff] }
 0x1eb   : > { %v3610_v20 = vmax.f32 %v3578_v27, 0.0  ;;  %v3579_v6 = vadd.f32 %v11120_v19, %v3540_v38  ;;  %8415 = vmatmul.mubr.msk.bf16.gmra.mrb[148].mxu0 %vm3628_vm3, %v11213_v25  ;;  %8384 = vmatprep.mubr.msk.bf16.mxu1 %vm3628_vm3, %v11215_v11  ;;  %v8360_v30 = vpop.f32.mrb[128].mxu0  ;;  %v13000_v27 = vld [vmem:[#allocation17_spill] sm:$0xff] }
 0x1ec   : > { %v3608_v35 = vmax.f32 %v3576_v55, 0.0  ;;  %v3577_v10 = vadd.f32 %v11120_v19, %v3538_v49  ;;  %8418 = vmatprep.mubr.msk.bf16.mxu0 %vm3628_vm3, %v11220_v1  ;;  %v8326_v21 = vpop.f32.mrb[32].mxu1  ;;  %v3511_v18 = vmul.f32 %v8360_v30, %v12997_v5  ;;  %v3430_v42 = vpop.f32.mrb[129].mxu0 }
 0x1ed   : > { %3681 = vst.msk [vmem:[#allocation2 + $0x81] sm:$0xff] %vm3628_vm3, %v3610_v20  ;;  %v3611_v53 = vmax.f32 %v3579_v6, 0.0  ;;  %v8800_v45 = vadd.f32 %v11055_v16, %v8326_v21  ;;  %v3136_v37 = vpop.f32.mrb[33].mxu1  ;;  %v3509_v3 = vmul.f32 %v3430_v42, %v12998_v61  ;;  %v8361_v34 = vpop.f32.mrb[130].mxu0  ;;  %v3709_v54 = vld [vmem:[#allocation2 + $0x50] sm:$0xff] }
 0x1ee   : > { %3679 = vst.msk [vmem:[#allocation2 + $0x71] sm:$0xff] %vm3628_vm3, %v3608_v35  ;;  %v3609_v13 = vmax.f32 %v3577_v10, 0.0  ;;  %v8805_v52 = vadd.f32 %v11059_v58, %v3136_v37  ;;  %v8327_v15 = vpop.f32.mrb[34].mxu1  ;;  %v3712_v47 = vld [vmem:[#allocation2 + $0x68] sm:$0xff]  ;;  %v3512_v14 = vmul.f32 %v8361_v34, %v12999_v59  ;;  %v3433_v51 = vpop.f32.mrb[131].mxu0  ;;  %v4227_v55 = vld [vmem:[#allocation2 + $0x51] sm:$0xff] }
 0x1ef   : > { %v4230_v32 = vld [vmem:[#allocation2 + $0x69] sm:$0xff]  ;;  %3682 = vst.msk [vmem:[#allocation2 + $0x89] sm:$0xff] %vm3628_vm3, %v3611_v53  ;;  %v3543_v28 = vadd.f32 %v8800_v45, %v3511_v18  ;;  %v8810_v16 = vadd.f32 %v11062_v31, %v8327_v15  ;;  %v3139_v41 = vpop.f32.mrb[35].mxu1  ;;  %v3710_v26 = vld [vmem:[#allocation2 + $0x58] sm:$0xff]  ;;  %v3711_v29 = vld [vmem:[#allocation2 + $0x60] sm:$0xff]  ;;  %v3510_v38 = vmul.f32 %v3433_v51, %v13000_v27 }
 0x1f0   : > { %v4228_v36 = vld [vmem:[#allocation2 + $0x59] sm:$0xff]  ;;  %3680 = vst.msk [vmem:[#allocation2 + $0x79] sm:$0xff] %vm3628_vm3, %v3609_v13  ;;  %v3541_v58 = vadd.f32 %v8805_v52, %v3509_v3  ;;  %v8815_v22 = vadd.f32 %v11065_v33, %v3139_v41  ;;  %v11242_v40 = vpack.c.bf16 %v3710_v26, %v3709_v54  ;;  %v11247_v6 = vpack.c.bf16 %v3712_v47, %v3711_v29  ;;  %v4229_v35 = vld [vmem:[#allocation2 + $0x61] sm:$0xff]  ;;  %v13003_v26 = vld [vmem:[#allocation60_spill] sm:$0xff] }
 0x1f1   : > { %v3582_v49 = vadd.f32 %v11120_v19, %v3543_v28  ;;  %v3544_v31 = vadd.f32 %v8810_v16, %v3512_v14  ;;  %v11245_v20 = vpack.c.bf16 %v4228_v36, %v4227_v55  ;;  %v11252_v33 = vpack.c.bf16 %v4230_v32, %v4229_v35  ;;  %v13001_v52 = vld [vmem:[#allocation59_spill] sm:$0xff]  ;;  %v13002_v47 = vld [vmem:[#allocation53_spill] sm:$0xff] }
 0x1f2   : > { %v3580_v10 = vadd.f32 %v11120_v19, %v3541_v58  ;;  %v3542_v21 = vadd.f32 %v8815_v22, %v3510_v38  ;;  %8385 = vmatmul.mubr.msk.bf16.gmra.mrb[88].mxu1 %vm3628_vm3, %v11242_v40 }
 0x1f3   : > { %v3614_v30 = vmax.f32 %v3582_v49, 0.0  ;;  %v3583_v53 = vadd.f32 %v11120_v19, %v3544_v31  ;;  %8419 = vmatmul.mubr.msk.bf16.gmra.mrb[152].mxu0 %vm3628_vm3, %v11245_v20  ;;  %8388 = vmatprep.mubr.msk.bf16.mxu1 %vm3628_vm3, %v11247_v6  ;;  %v8364_v37 = vpop.f32.mrb[132].mxu0  ;;  %v13004_v49 = vld [vmem:[#allocation56_spill] sm:$0xff] }
 0x1f4   : > { %v3612_v45 = vmax.f32 %v3580_v10, 0.0  ;;  %v3581_v5 = vadd.f32 %v11120_v19, %v3542_v21  ;;  %8422 = vmatprep.mubr.msk.bf16.mxu0 %vm3628_vm3, %v11252_v33  ;;  %v8330_v18 = vpop.f32.mrb[36].mxu1  ;;  %v3515_v61 = vmul.f32 %v8364_v37, %v13001_v52  ;;  %v3446_v15 = vpop.f32.mrb[133].mxu0 }
 0x1f5   : > { %3685 = vst.msk [vmem:[#allocation2 + $0xa1] sm:$0xff] %vm3628_vm3, %v3614_v30  ;;  %v3615_v42 = vmax.f32 %v3583_v53, 0.0  ;;  %v8820_v13 = vadd.f32 %v11071_v63, %v8330_v18  ;;  %v3152_v3 = vpop.f32.mrb[37].mxu1  ;;  %v3513_v32 = vmul.f32 %v3446_v15, %v13002_v47  ;;  %v8365_v16 = vpop.f32.mrb[134].mxu0  ;;  %v3713_v59 = vld [vmem:[#allocation2 + $0x70] sm:$0xff] }
 0x1f6   : > { %3683 = vst.msk [vmem:[#allocation2 + $0x91] sm:$0xff] %vm3628_vm3, %v3612_v45  ;;  %v3613_v34 = vmax.f32 %v3581_v5, 0.0  ;;  %v8825_v54 = vadd.f32 %v11075_v46, %v3152_v3  ;;  %v8331_v28 = vpop.f32.mrb[38].mxu1  ;;  %v3716_v14 = vld [vmem:[#allocation2 + $0x88] sm:$0xff]  ;;  %v3516_v36 = vmul.f32 %v8365_v16, %v13003_v26  ;;  %v3449_v58 = vpop.f32.mrb[135].mxu0  ;;  %v4231_v10 = vld [vmem:[#allocation2 + $0x71] sm:$0xff] }
 0x1f7   : > { %v4234_v41 = vld [vmem:[#allocation2 + $0x89] sm:$0xff]  ;;  %3686 = vst.msk [vmem:[#allocation2 + $0xa9] sm:$0xff] %vm3628_vm3, %v3615_v42  ;;  %v3547_v51 = vadd.f32 %v8820_v13, %v3515_v61  ;;  %v8830_v63 = vadd.f32 %v11078_v0, %v8331_v28  ;;  %v3155_v29 = vpop.f32.mrb[39].mxu1  ;;  %v3714_v22 = vld [vmem:[#allocation2 + $0x78] sm:$0xff]  ;;  %v3715_v38 = vld [vmem:[#allocation2 + $0x80] sm:$0xff]  ;;  %v3514_v31 = vmul.f32 %v3449_v58, %v13004_v49 }
 0x1f8   : > { %v4232_v27 = vld [vmem:[#allocation2 + $0x79] sm:$0xff]  ;;  %3684 = vst.msk [vmem:[#allocation2 + $0x99] sm:$0xff] %vm3628_vm3, %v3613_v34  ;;  %v3545_v46 = vadd.f32 %v8825_v54, %v3513_v32  ;;  %v8835_v55 = vadd.f32 %v11081_v56, %v3155_v29  ;;  %v11274_v35 = vpack.c.bf16 %v3714_v22, %v3713_v59  ;;  %v11279_v53 = vpack.c.bf16 %v3716_v14, %v3715_v38  ;;  %v4233_v45 = vld [vmem:[#allocation2 + $0x81] sm:$0xff]  ;;  %v13005_v54 = vld [vmem:[#allocation68_spill] sm:$0xff] }
 0x1f9   : > { %v3586_v21 = vadd.f32 %v11120_v19, %v3547_v51  ;;  %v3548_v0 = vadd.f32 %v8830_v63, %v3516_v36  ;;  %v11277_v30 = vpack.c.bf16 %v4232_v27, %v4231_v10  ;;  %v11284_v56 = vpack.c.bf16 %v4234_v41, %v4233_v45  ;;  %v13006_v14 = vld [vmem:[#allocation63_spill] sm:$0xff] }
 0x1fa   : > { %v3584_v5 = vadd.f32 %v11120_v19, %v3545_v46  ;;  %v3546_v18 = vadd.f32 %v8835_v55, %v3514_v31  ;;  %8389 = vmatmul.mubr.msk.bf16.gmra.mrb[92].mxu1 %vm3628_vm3, %v11274_v35  ;;  %v13007_v22 = vld [vmem:[#allocation31_spill] sm:$0xff] }
 0x1fb   : > { %v3618_v37 = vmax.f32 %v3586_v21, 0.0  ;;  %v3587_v42 = vadd.f32 %v11120_v19, %v3548_v0  ;;  %8423 = vmatmul.mubr.msk.bf16.gmra.mrb[156].mxu0 %vm3628_vm3, %v11277_v30  ;;  %8392 = vmatprep.mubr.msk.bf16.mxu1 %vm3628_vm3, %v11279_v53  ;;  %v8368_v3 = vpop.f32.mrb[136].mxu0  ;;  %v13008_v21 = vld [vmem:[#allocation64_spill] sm:$0xff] }
 0x1fc   : > { %v3616_v13 = vmax.f32 %v3584_v5, 0.0  ;;  %v3585_v52 = vadd.f32 %v11120_v19, %v3546_v18  ;;  %8426 = vmatprep.mubr.msk.bf16.mxu0 %vm3628_vm3, %v11284_v56  ;;  %v8334_v61 = vpop.f32.mrb[40].mxu1  ;;  %v3519_v47 = vmul.f32 %v8368_v3, %v13005_v54  ;;  %v3462_v28 = vpop.f32.mrb[137].mxu0 }
 0x1fd   : > { %3689 = vst.msk [vmem:[#allocation2 + $0xc1] sm:$0xff] %vm3628_vm3, %v3618_v37  ;;  %v3619_v15 = vmax.f32 %v3587_v42, 0.0  ;;  %v8840_v34 = vadd.f32 %v11087_v43, %v8334_v61  ;;  %v3168_v32 = vpop.f32.mrb[41].mxu1  ;;  %v3517_v41 = vmul.f32 %v3462_v28, %v13006_v14  ;;  %v8369_v63 = vpop.f32.mrb[138].mxu0  ;;  %v3717_v26 = vld [vmem:[#allocation2 + $0x90] sm:$0xff] }
 0x1fe   : > { %3687 = vst.msk [vmem:[#allocation2 + $0xb1] sm:$0xff] %vm3628_vm3, %v3616_v13  ;;  %v3617_v16 = vmax.f32 %v3585_v52, 0.0  ;;  %v8845_v59 = vadd.f32 %v11091_v39, %v3168_v32  ;;  %v8335_v51 = vpop.f32.mrb[42].mxu1  ;;  %v3720_v36 = vld [vmem:[#allocation2 + $0xa8] sm:$0xff]  ;;  %v3520_v27 = vmul.f32 %v8369_v63, %v13007_v22  ;;  %v3465_v46 = vpop.f32.mrb[139].mxu0  ;;  %v4235_v5 = vld [vmem:[#allocation2 + $0x91] sm:$0xff] }
 0x1ff   : > { %v4238_v29 = vld [vmem:[#allocation2 + $0xa9] sm:$0xff]  ;;  %3690 = vst.msk [vmem:[#allocation2 + $0xc9] sm:$0xff] %vm3628_vm3, %v3619_v15  ;;  %v3551_v58 = vadd.f32 %v8840_v34, %v3519_v47  ;;  %v8850_v43 = vadd.f32 %v11094_v23, %v8335_v51  ;;  %v3171_v38 = vpop.f32.mrb[43].mxu1  ;;  %v3718_v55 = vld [vmem:[#allocation2 + $0x98] sm:$0xff]  ;;  %v3719_v31 = vld [vmem:[#allocation2 + $0xa0] sm:$0xff]  ;;  %v3518_v0 = vmul.f32 %v3465_v46, %v13008_v21 }
 0x200   : > { %v4236_v49 = vld [vmem:[#allocation2 + $0x99] sm:$0xff]  ;;  %3688 = vst.msk [vmem:[#allocation2 + $0xb9] sm:$0xff] %vm3628_vm3, %v3617_v16  ;;  %v3549_v39 = vadd.f32 %v8845_v59, %v3517_v41  ;;  %v8855_v10 = vadd.f32 %v11097_v9, %v3171_v38  ;;  %v11306_v45 = vpack.c.bf16 %v3718_v55, %v3717_v26  ;;  %v11311_v42 = vpack.c.bf16 %v3720_v36, %v3719_v31  ;;  %v4237_v13 = vld [vmem:[#allocation2 + $0xa1] sm:$0xff] }
 0x201   : > { %v3590_v18 = vadd.f32 %v11120_v19, %v3551_v58  ;;  %v3552_v23 = vadd.f32 %v8850_v43, %v3520_v27  ;;  %v11309_v37 = vpack.c.bf16 %v4236_v49, %v4235_v5  ;;  %v11316_v9 = vpack.c.bf16 %v4238_v29, %v4237_v13  ;;  %v13009_v59 = vld [vmem:[#allocation49_spill] sm:$0xff]  ;;  %v13010_v36 = vld [vmem:[#allocation38_spill] sm:$0xff] }
 0x202   : > { %v3588_v52 = vadd.f32 %v11120_v19, %v3549_v39  ;;  %v3550_v61 = vadd.f32 %v8855_v10, %v3518_v0  ;;  %8393 = vmatmul.mubr.msk.bf16.gmra.mrb[96].mxu1 %vm3628_vm3, %v11306_v45 }
 0x203   : > { %v3622_v3 = vmax.f32 %v3590_v18, 0.0  ;;  %v3591_v15 = vadd.f32 %v11120_v19, %v3552_v23  ;;  %8427 = vmatmul.mubr.msk.bf16.gmra.mrb[160].mxu0 %vm3628_vm3, %v11309_v37  ;;  %8396 = vmatprep.mubr.msk.bf16.mxu1 %vm3628_vm3, %v11311_v42  ;;  %v8372_v32 = vpop.f32.mrb[140].mxu0 }
 0x204   : > { %v3620_v34 = vmax.f32 %v3588_v52, 0.0  ;;  %v3589_v54 = vadd.f32 %v11120_v19, %v3550_v61  ;;  %8430 = vmatprep.mubr.msk.bf16.mxu0 %vm3628_vm3, %v11316_v9  ;;  %v8338_v47 = vpop.f32.mrb[44].mxu1  ;;  %v3523_v14 = vmul.f32 %v8372_v32, %v13009_v59  ;;  %v3478_v51 = vpop.f32.mrb[141].mxu0  ;;  %v4241_v61 = vld [vmem:[#allocation2 + $0xc1] sm:$0xff] }
 0x205   : > { %3693 = vst.msk [vmem:[#allocation2 + $0xe1] sm:$0xff] %vm3628_vm3, %v3622_v3  ;;  %v3623_v28 = vmax.f32 %v3591_v15, 0.0  ;;  %v8860_v16 = vadd.f32 %v11103_v12, %v8338_v47  ;;  %v3184_v41 = vpop.f32.mrb[45].mxu1  ;;  %v3521_v29 = vmul.f32 %v3478_v51, %v13010_v36  ;;  %v8373_v43 = vpop.f32.mrb[142].mxu0  ;;  %v3721_v22 = vld [vmem:[#allocation2 + $0xb0] sm:$0xff] }
 0x206   : > { %3691 = vst.msk [vmem:[#allocation2 + $0xd1] sm:$0xff] %vm3628_vm3, %v3620_v34  ;;  %v3621_v63 = vmax.f32 %v3589_v54, 0.0  ;;  %v8865_v26 = vadd.f32 %v11107_v60, %v3184_v41  ;;  %v8339_v58 = vpop.f32.mrb[46].mxu1  ;;  %v3724_v27 = vld [vmem:[#allocation2 + $0xc8] sm:$0xff]  ;;  %v3524_v55 = vmul.f32 %v8373_v43, %v12956_v17  ;;  %v3481_v31 = vpop.f32.mrb[143].mxu0  ;;  %v4239_v23 = vld [vmem:[#allocation2 + $0xb1] sm:$0xff] }
 0x207   : > { %v4242_v38 = vld [vmem:[#allocation2 + $0xc9] sm:$0xff]  ;;  %3694 = vst.msk [vmem:[#allocation2 + $0xe9] sm:$0xff] %vm3628_vm3, %v3623_v28  ;;  %v3555_v46 = vadd.f32 %v8860_v16, %v3523_v14  ;;  %v8870_v12 = vadd.f32 %v11110_v24, %v8339_v58  ;;  %v3187_v49 = vpop.f32.mrb[47].mxu1  ;;  %v3722_v39 = vld [vmem:[#allocation2 + $0xb8] sm:$0xff]  ;;  %v3723_v21 = vld [vmem:[#allocation2 + $0xc0] sm:$0xff]  ;;  %v3522_v5 = vmul.f32 %v3481_v31, %v12958_v57 }
 0x208   : > { %v4240_v10 = vld [vmem:[#allocation2 + $0xb9] sm:$0xff]  ;;  %3692 = vst.msk [vmem:[#allocation2 + $0xd9] sm:$0xff] %vm3628_vm3, %v3621_v63  ;;  %v3553_v60 = vadd.f32 %v8865_v26, %v3521_v29  ;;  %v8875_v0 = vadd.f32 %v11113_v62, %v3187_v49  ;;  %v11338_v18 = vpack.c.bf16 %v3722_v39, %v3721_v22  ;;  %v11343_v17 = vpack.c.bf16 %v3724_v27, %v3723_v21  ;;  %v4511_v27 = vld [vmem:[#allocation2 + $0x2] sm:$0xff] }
 0x209   : > { %v3594_v13 = vadd.f32 %v11120_v19, %v3555_v46  ;;  %v3556_v24 = vadd.f32 %v8870_v12, %v3524_v55  ;;  %v11341_v52 = vpack.c.bf16 %v4240_v10, %v4239_v23  ;;  %v11348_v62 = vpack.c.bf16 %v4242_v38, %v4241_v61  ;;  %v4512_v38 = vld [vmem:[#allocation2 + $0xa] sm:$0xff]  ;;  %v4513_v10 = vld [vmem:[#allocation2 + $0x12] sm:$0xff]  ;;  %v4514_v21 = vld [vmem:[#allocation2 + $0x1a] sm:$0xff] }
 0x20a   : > { %v3592_v3 = vadd.f32 %v11120_v19, %v3553_v60  ;;  %v3554_v15 = vadd.f32 %v8875_v0, %v3522_v5  ;;  %8397 = vmatmul.mubr.msk.bf16.gmra.mrb[100].mxu1 %vm3628_vm3, %v11338_v18  ;;  %v4543_v39 = vpack.c.bf16 %v4512_v38, %v4511_v27  ;;  %v4516_v60 = vld [vmem:[#allocation2 + $0x2a] sm:$0xff]  ;;  %v11389_v0 = vpack.c.bf16 %v4514_v21, %v4513_v10  ;;  %v4515_v23 = vld [vmem:[#allocation2 + $0x22] sm:$0xff]  ;;  %v4518_v61 = vld [vmem:[#allocation2 + $0x3a] sm:$0xff] }
 0x20b   : > { %v3626_v57 = vmax.f32 %v3594_v13, 0.0  ;;  %v3595_v34 = vadd.f32 %v11120_v19, %v3556_v24  ;;  %8431 = vmatmul.mubr.msk.bf16.gmra.mrb[164].mxu0 %vm3628_vm3, %v11341_v52  ;;  %8400 = vmatprep.mubr.msk.bf16.mxu1 %vm3628_vm3, %v11343_v17  ;;  %v5748_v5 = vsel %vm3796_vm2, %v11179_v44, 0  ;;  %v11395_v13 = vpack.c.bf16 %v4516_v60, %v4515_v23  ;;  %v11409_v44 = vld [vmem:[%s12571_s2 + $0x1c] sm:$0xf]  ;;  %v4531_v27 = vld [vmem:[#allocation2 + $0xa2] sm:$0xff] }
 0x20c   : > { %v3624_v54 = vmax.f32 %v3592_v3, 0.0  ;;  %v3593_v47 = vadd.f32 %v11120_v19, %v3554_v15  ;;  %8434 = vmatprep.mubr.msk.bf16.mxu0 %vm3628_vm3, %v11348_v62  ;;  %v4245_v58 = vld [vmem:[#allocation2 + $0xe1] sm:$0xff]  ;;  %v5454_v24 = vsel %vm3796_vm2, %v11187_v8, 0  ;;  %v4517_v8 = vld [vmem:[#allocation2 + $0x32] sm:$0xff]  ;;  %v4520_v3 = vld [vmem:[#allocation2 + $0x4a] sm:$0xff] }
 0x20d   : > { %3697 = vst.msk [vmem:[#allocation2 + $0x101] sm:$0xff] %vm3628_vm3, %v3626_v57  ;;  %v3627_v32 = vmax.f32 %v3595_v34, 0.0  ;;  %v3725_v28 = vld [vmem:[#allocation2 + $0xd0] sm:$0xff]  ;;  %v4519_v15 = vld [vmem:[#allocation2 + $0x42] sm:$0xff]  ;;  %v4522_v34 = vld [vmem:[#allocation2 + $0x5a] sm:$0xff] }
 0x20e   : > { %3695 = vst.msk [vmem:[#allocation2 + $0xf1] sm:$0xff] %vm3628_vm3, %v3624_v54  ;;  %v3625_v16 = vmax.f32 %v3593_v47, 0.0  ;;  %v4243_v59 = vld [vmem:[#allocation2 + $0xd1] sm:$0xff]  ;;  %v3728_v14 = vld [vmem:[#allocation2 + $0xe8] sm:$0xff]  ;;  %v11421_v57 = vpack.c.bf16 %v4520_v3, %v4519_v15 }
 0x20f   : > { %v4246_v41 = vld [vmem:[#allocation2 + $0xe9] sm:$0xff]  ;;  %3698 = vst.msk [vmem:[#allocation2 + $0x109] sm:$0xff] %vm3628_vm3, %v3627_v32  ;;  %v3726_v51 = vld [vmem:[#allocation2 + $0xd8] sm:$0xff]  ;;  %v3727_v26 = vld [vmem:[#allocation2 + $0xe0] sm:$0xff] }
 0x210   : > { %v4244_v63 = vld [vmem:[#allocation2 + $0xd9] sm:$0xff]  ;;  %3696 = vst.msk [vmem:[#allocation2 + $0xf9] sm:$0xff] %vm3628_vm3, %v3625_v16  ;;  %v11362_v19 = vpack.c.bf16 %v3726_v51, %v3725_v28  ;;  %v11366_v29 = vpack.c.bf16 %v3728_v14, %v3727_v26  ;;  %v11370_v43 = vpack.c.bf16 %v4246_v41, %v4245_v58  ;;  %v4524_v54 = vld [vmem:[#allocation2 + $0x6a] sm:$0xff]  ;;  %v4523_v32 = vld [vmem:[#allocation2 + $0x62] sm:$0xff] }
 0x211   : > { %v11364_v36 = vpack.c.bf16 %v4244_v63, %v4243_v59  ;;  %v11433_v28 = vpack.c.bf16 %v4524_v54, %v4523_v32  ;;  %v4526_v16 = vld [vmem:[#allocation2 + $0x7a] sm:$0xff]  ;;  %v4528_v59 = vld [vmem:[#allocation2 + $0x8a] sm:$0xff]  ;;  %v4527_v41 = vld [vmem:[#allocation2 + $0x82] sm:$0xff]  ;;  %v13011_v54 = vmov 0.0  }
 0x212   : > { %8401 = vmatmul.mubr.msk.bf16.gmra.mrb[104].mxu1 %vm3628_vm3, %v11362_v19  ;;  %v11445_v51 = vpack.c.bf16 %v4528_v59, %v4527_v41  ;;  %v4529_v63 = vld [vmem:[#allocation2 + $0x92] sm:$0xff]  ;;  %v4530_v26 = vld [vmem:[#allocation2 + $0x9a] sm:$0xff]  ;;  %v4532_v58 = vld [vmem:[#allocation2 + $0xaa] sm:$0xff]  ;;  %3666 = vst.msk [vmem:[#allocation2 + $0x120] sm:$0x3] %vm3665_vm4, %v13011_v54  ;;  %v6400_v59 = vsel %vm3796_vm2, %v11409_v44, 0 }
 0x213   : > { %8435 = vmatmul.mubr.msk.bf16.gmra.mrb[168].mxu0 %vm3628_vm3, %v11364_v36  ;;  %8404 = vmatprep.mubr.msk.bf16.mxu1 %vm3628_vm3, %v11366_v29  ;;  %v11457_v38 = vpack.c.bf16 %v4532_v58, %v4531_v27  ;;  %v4535_v10 = vld [vmem:[#allocation2 + $0xc2] sm:$0xff]  ;;  %v4537_v60 = vld [vmem:[#allocation2 + $0xd2] sm:$0xff] }
 0x214   : > { %8438 = vmatprep.mubr.msk.bf16.mxu0 %vm3628_vm3, %v11370_v43  ;;  %v11510_v41 = vld [vmem:[%s12571_s2 + $0x20] sm:$0xf]  ;;  %v6302_v54 = vld [vmem:[#allocation2 + $0x29] sm:$0xff] }
 0x215   : > { %v3729_v22 = vld [vmem:[#allocation2 + $0xf0] sm:$0xff] }
 0x216   : > { %v4247_v12 = vld [vmem:[#allocation2 + $0xf1] sm:$0xff] }
 0x217   : > { %v3730_v46 = vld [vmem:[#allocation2 + $0xf8] sm:$0xff]  ;;  %v4540_v23 = vld [vmem:[#allocation2 + $0xea] sm:$0xff] }
 0x218   : > { %v4248_v55 = vld [vmem:[#allocation2 + $0xf9] sm:$0xff]  ;;  %v11378_v49 = vpack.c.bf16 %v3730_v46, %v3729_v22  ;;  %v11455_v22 = vpack.c.bf16 %v4530_v26, %v4529_v63 }
 0x219   : > { %v11380_v31 = vpack.c.bf16 %v4248_v55, %v4247_v12  ;;  %v4533_v46 = vld [vmem:[#allocation2 + $0xb2] sm:$0xff]  ;;  %v4534_v12 = vld [vmem:[#allocation2 + $0xba] sm:$0xff]  ;;  %v4536_v55 = vld [vmem:[#allocation2 + $0xca] sm:$0xff] }
 0x21a   : > { %8405 = vmatmul.mubr.msk.bf16.gmra.mrb[108].mxu1 %vm3628_vm3, %v11378_v49  ;;  %v11469_v21 = vpack.c.bf16 %v4536_v55, %v4535_v10  ;;  %v4541_v3 = vld [vmem:[#allocation2 + $0xf2] sm:$0xff]  ;;  %v4542_v15 = vld [vmem:[#allocation2 + $0xfa] sm:$0xff] }
 0x21b   : > { %8439 = vmatmul.mubr.msk.bf16.gmra.mrb[172].mxu0 %vm3628_vm3, %v11380_v31  ;;  %8444 = vmatprep.mubr.msk.bf16.mxu1 %vm3628_vm3, %v4543_v39  ;;  %v11467_v39 = vpack.c.bf16 %v4534_v12, %v4533_v46  ;;  %v4558_v32 = vpack.c.bf16 %v4542_v15, %v4541_v3  ;;  %v5680_v3 = vld [vmem:[#allocation2 + $0x10a] sm:$0xff] }
 0x21c   : > { %8478 = vmatprep.mubr.msk.bf16.mxu0 %vm3628_vm3, %v11162_v4  ;;  %v11402_v4 = vld [vmem:[%s12571_s2 + $0x18] sm:$0xf]  ;;  %v5386_v15 = vld [vmem:[#allocation2 + $0x109] sm:$0xff] }
 0x222   : > { %8445 = vmatmul.mubr.msk.bf16.vlgmr.msra.gmra.mrb[112].mxu1 %vm3628_vm3, %v11389_v0 }
 0x223   : > { %8479 = vmatmul.mubr.msk.bf16.vlgmr.msra.gmra.mrb[176].mxu0 %vm3628_vm3, %v11167_v7  ;;  %8545 = vmatpush3.bf16.msra.mxu1 %v5748_v5  ;;  %v11419_v7 = vpack.c.bf16 %v4518_v61, %v4517_v8  ;;  %v4538_v5 = vld [vmem:[#allocation2 + $0xda] sm:$0xff]  ;;  %v4539_v8 = vld [vmem:[#allocation2 + $0xe2] sm:$0xff] }
 0x224   : > { %8448 = vmatprep.mubr.msk.bf16.mxu1 %vm3628_vm3, %v11395_v13  ;;  %8482 = vmatprep.mubr.msk.bf16.mxu0 %vm3628_vm3, %v11210_v2  ;;  %v4521_v2 = vld [vmem:[#allocation2 + $0x52] sm:$0xff]  ;;  %v11481_v61 = vpack.c.bf16 %v4540_v23, %v4539_v8  ;;  %v5679_v8 = vld [vmem:[#allocation2 + $0x102] sm:$0xff] }
 0x225   : > { %8511 = vmatpush3.bf16.msra.mxu0 %v5454_v24  ;;  %9276 = vmatprep.subr.msk.bf16.mxu1 %vm3796_vm2, %v11402_v4  ;;  %v11431_v47 = vpack.c.bf16 %v4522_v34, %v4521_v2  ;;  %v11479_v24 = vpack.c.bf16 %v4538_v5, %v4537_v60  ;;  %v5059_v2 = vld [vmem:[#allocation2 + $0x100] sm:$0xff]  ;;  %v5060_v34 = vld [vmem:[#allocation2 + $0x108] sm:$0xff] }
 0x226   : > { %9277 = vmatprep.subr.msk.bf16.mxu0 %vm3796_vm2, %v11409_v44 }
 0x22a   : > { %8449 = vmatmul.mubr.msk.bf16.gmra.mrb[116].mxu1 %vm3628_vm3, %v11419_v7 }
 0x22b   : > { %8483 = vmatmul.mubr.msk.bf16.gmra.mrb[180].mxu0 %vm3628_vm3, %v11215_v11  ;;  %8452 = vmatprep.mubr.msk.bf16.mxu1 %vm3628_vm3, %v11421_v57  ;;  %v4525_v11 = vld [vmem:[#allocation2 + $0x72] sm:$0xff] }
 0x22c   : > { %8486 = vmatprep.mubr.msk.bf16.mxu0 %vm3628_vm3, %v11242_v40  ;;  %v11443_v14 = vpack.c.bf16 %v4526_v16, %v4525_v11  ;;  %v11492_v11 = vpack.c.bf16 %v5060_v34, %v5059_v2  ;;  %v6074_v16 = vsel %vm3796_vm2, %v11402_v4, 0  ;;  %v11525_v4 = vpop.permute.xlu0 %3995  ;;  %v5975_v2 = vld [vmem:[#allocation2 + $0x20] sm:$0xff]  ;;  %v5976_v34 = vld [vmem:[#allocation2 + $0x28] sm:$0xff] }
 0x22d   : > { %13013 = vst [vmem:[#allocation25_spill] sm:$0xff] %v11525_v4 }
 0x230   : > { %v11535_v44 = vpop.permute.xlu0 %4005 }
 0x231   : > { %13015 = vst [vmem:[#allocation66_spill] sm:$0xff] %v11535_v44 }
 0x232   : > { %8453 = vmatmul.mubr.msk.bf16.gmra.mrb[120].mxu1 %vm3628_vm3, %v11431_v47 }
 0x233   : > { %8487 = vmatmul.mubr.msk.bf16.gmra.mrb[184].mxu0 %vm3628_vm3, %v11247_v6  ;;  %8456 = vmatprep.mubr.msk.bf16.mxu1 %vm3628_vm3, %v11433_v28 }
 0x234   : > { %8490 = vmatprep.mubr.msk.bf16.mxu0 %vm3628_vm3, %v11274_v35  ;;  %v11545_v63 = vpop.permute.xlu0 %4015 }
 0x235   : > { %13017 = vst [vmem:[#allocation54_spill] sm:$0xff] %v11545_v63 }
 0x238   : > { %v11557_v26 = vpop.permute.xlu0 %4025 }
 0x239   : > { %13019 = vst [vmem:[#allocation32_spill] sm:$0xff] %v11557_v26 }
 0x23a   : > { %8457 = vmatmul.mubr.msk.bf16.gmra.mrb[124].mxu1 %vm3628_vm3, %v11443_v14 }
 0x23b   : > { %8491 = vmatmul.mubr.msk.bf16.gmra.mrb[188].mxu0 %vm3628_vm3, %v11279_v53  ;;  %8460 = vmatprep.mubr.msk.bf16.mxu1 %vm3628_vm3, %v11445_v51 }
 0x23c   : > { %8494 = vmatprep.mubr.msk.bf16.mxu0 %vm3628_vm3, %v11306_v45  ;;  %v11569_v27 = vpop.permute.xlu0 %4035 }
 0x23d   : > { %13021 = vst [vmem:[#allocation39_spill] sm:$0xff] %v11569_v27 }
 0x240   : > { %v11575_v12 = vpop.permute.xlu0 %4045 }
 0x241   : > { %13023 = vst [vmem:[#allocation45_spill] sm:$0xff] %v11575_v12 }
 0x242   : > { %8461 = vmatmul.mubr.msk.bf16.gmra.mrb[128].mxu1 %vm3628_vm3, %v11455_v22 }
 0x243   : > { %8495 = vmatmul.mubr.msk.bf16.gmra.mrb[192].mxu0 %vm3628_vm3, %v11311_v42  ;;  %8464 = vmatprep.mubr.msk.bf16.mxu1 %vm3628_vm3, %v11457_v38 }
 0x244   : > { %8498 = vmatprep.mubr.msk.bf16.mxu0 %vm3628_vm3, %v11338_v18  ;;  %v11585_v10 = vpop.permute.xlu0 %4055 }
 0x245   : > { %13025 = vst [vmem:[#allocation40_spill] sm:$0xff] %v11585_v10 }
 0x248   : > { %v11597_v5 = vpop.permute.xlu0 %4065 }
 0x249   : > { %13027 = vst [vmem:[#allocation19_spill] sm:$0xff] %v11597_v5  ;;  %v6305_v5 = vld [vmem:[#allocation2 + $0x41] sm:$0xff] }
 0x24a   : > { %8465 = vmatmul.mubr.msk.bf16.gmra.mrb[132].mxu1 %vm3628_vm3, %v11467_v39 }
 0x24b   : > { %8499 = vmatmul.mubr.msk.bf16.gmra.mrb[196].mxu0 %vm3628_vm3, %v11343_v17  ;;  %8468 = vmatprep.mubr.msk.bf16.mxu1 %vm3628_vm3, %v11469_v21 }
 0x24c   : > { %8502 = vmatprep.mubr.msk.bf16.mxu0 %vm3628_vm3, %v11362_v19 }
 0x252   : > { %8469 = vmatmul.mubr.msk.bf16.gmra.mrb[136].mxu1 %vm3628_vm3, %v11479_v24 }
 0x253   : > { %8503 = vmatmul.mubr.msk.bf16.gmra.mrb[200].mxu0 %vm3628_vm3, %v11366_v29  ;;  %8472 = vmatprep.mubr.msk.bf16.mxu1 %vm3628_vm3, %v11481_v61 }
 0x254   : > { %8506 = vmatprep.mubr.msk.bf16.mxu0 %vm3628_vm3, %v11378_v49 }
 0x25a   : > { %8473 = vmatmul.mubr.msk.bf16.gmra.mrb[140].mxu1 %vm3628_vm3, %v4558_v32 }
 0x25b   : > { %8507 = vmatmul.mubr.msk.bf16.gmra.mrb[204].mxu0 %vm3628_vm3, %v11492_v11  ;;  %8546 = vmatprep.mubr.msk.bf16.mxu1 %vm3628_vm3, %v11389_v0  ;;  %v11519_v0 = vpop.permute.xlu1 %4000 }
 0x25c   : > { %8512 = vmatprep.mubr.msk.bf16.mxu0 %vm3628_vm3, %v11165_v48  ;;  %v11517_v48 = vld [vmem:[%s12572_s3] sm:$0x3]  ;;  %13012 = vst [vmem:[#allocation58_spill] sm:$0xff] %v11519_v0 }
 0x262   : > { %8547 = vmatmul.mubr.msk.bf16.vlgmr.msra.gmra.mrb[144].mxu1 %vm3628_vm3, %v11395_v13 }
 0x263   : > { %8513 = vmatmul.mubr.msk.bf16.vlgmr.msra.gmra.mrb[144].mxu0 %vm3628_vm3, %v11172_v50  ;;  %8579 = vmatpush3.bf16.msra.mxu1 %v6074_v16  ;;  %v11531_v50 = vpop.permute.xlu1 %4010  ;;  %v5385_v16 = vld [vmem:[#allocation2 + $0x101] sm:$0xff] }
 0x264   : > { %8516 = vmatprep.mubr.msk.bf16.mxu0 %vm3628_vm3, %v11213_v25  ;;  %8550 = vmatprep.mubr.msk.bf16.mxu1 %vm3628_vm3, %v11419_v7  ;;  %13014 = vst [vmem:[#allocation62_spill] sm:$0xff] %v11531_v50 }
 0x265   : > { %8613 = vmatpush3.bf16.msra.mxu0 %v6400_v59  ;;  %9278 = vmatprep.subr.msk.bf16.mxu1 %vm3796_vm2, %v11510_v41  ;;  %v11612_v59 = vpack.c.bf16 %v5386_v15, %v5385_v16  ;;  %v6304_v15 = vld [vmem:[#allocation2 + $0x39] sm:$0xff]  ;;  %v6306_v16 = vld [vmem:[#allocation2 + $0x49] sm:$0xff] }
 0x266   : > { %9279 = vmatprep.subr.msk.bf16.mxu0 %vm432_vm0, %v11517_v48 }
 0x267   : > { %v11543_v25 = vpop.permute.xlu1 %4020 }
 0x268   : > { %13016 = vst [vmem:[#allocation67_spill] sm:$0xff] %v11543_v25 }
 0x26a   : > { %8551 = vmatmul.mubr.msk.bf16.gmra.mrb[148].mxu1 %vm3628_vm3, %v11421_v57 }
 0x26b   : > { %8517 = vmatmul.mubr.msk.bf16.gmra.mrb[148].mxu0 %vm3628_vm3, %v11220_v1  ;;  %8554 = vmatprep.mubr.msk.bf16.mxu1 %vm3628_vm3, %v11431_v47  ;;  %v11555_v1 = vpop.permute.xlu1 %4030 }
 0x26c   : > { %8520 = vmatprep.mubr.msk.bf16.mxu0 %vm3628_vm3, %v11245_v20  ;;  %13018 = vst [vmem:[#allocation33_spill] sm:$0xff] %v11555_v1 }
 0x26f   : > { %v11565_v58 = vpop.permute.xlu1 %4040 }
 0x270   : > { %13020 = vst [vmem:[#allocation35_spill] sm:$0xff] %v11565_v58  ;;  %v7058_v58 = vsel %vm432_vm0, %v11517_v48, 0 }
 0x272   : > { %8555 = vmatmul.mubr.msk.bf16.gmra.mrb[152].mxu1 %vm3628_vm3, %v11433_v28 }
 0x273   : > { %8521 = vmatmul.mubr.msk.bf16.gmra.mrb[152].mxu0 %vm3628_vm3, %v11252_v33  ;;  %8558 = vmatprep.mubr.msk.bf16.mxu1 %vm3628_vm3, %v11443_v14  ;;  %v11571_v46 = vpop.permute.xlu1 %4050 }
 0x274   : > { %8524 = vmatprep.mubr.msk.bf16.mxu0 %vm3628_vm3, %v11277_v30  ;;  %13022 = vst [vmem:[#allocation44_spill] sm:$0xff] %v11571_v46 }
 0x277   : > { %v11583_v55 = vpop.permute.xlu1 %4060 }
 0x278   : > { %13024 = vst [vmem:[#allocation46_spill] sm:$0xff] %v11583_v55  ;;  %v6007_v55 = vpack.c.bf16 %v5976_v34, %v5975_v2  ;;  %v5979_v2 = vld [vmem:[#allocation2 + $0x40] sm:$0xff]  ;;  %v5980_v34 = vld [vmem:[#allocation2 + $0x48] sm:$0xff] }
 0x27a   : > { %8559 = vmatmul.mubr.msk.bf16.gmra.mrb[156].mxu1 %vm3628_vm3, %v11445_v51 }
 0x27b   : > { %8525 = vmatmul.mubr.msk.bf16.gmra.mrb[156].mxu0 %vm3628_vm3, %v11284_v56  ;;  %8562 = vmatprep.mubr.msk.bf16.mxu1 %vm3628_vm3, %v11455_v22  ;;  %v11595_v60 = vpop.permute.xlu1 %4070 }
 0x27c   : > { %8528 = vmatprep.mubr.msk.bf16.mxu0 %vm3628_vm3, %v11309_v37  ;;  %13026 = vst [vmem:[#allocation22_spill] sm:$0xff] %v11595_v60 }
 0x27f   : > { %v11604_v23 = vpop.permute.xlu1 %4080 }
 0x280   : > { %13028 = vst [vmem:[#allocation8_spill] sm:$0xff] %v11604_v23 }
 0x282   : > { %8563 = vmatmul.mubr.msk.bf16.gmra.mrb[160].mxu1 %vm3628_vm3, %v11457_v38 }
 0x283   : > { %8529 = vmatmul.mubr.msk.bf16.gmra.mrb[160].mxu0 %vm3628_vm3, %v11316_v9  ;;  %8566 = vmatprep.mubr.msk.bf16.mxu1 %vm3628_vm3, %v11467_v39  ;;  %v11614_v60 = vpop.permute.xlu1 %4090 }
 0x284   : > { %8532 = vmatprep.mubr.msk.bf16.mxu0 %vm3628_vm3, %v11341_v52  ;;  %13031 = vst [vmem:[#allocation3_spill] sm:$0xff] %v11614_v60 }
 0x287   : > { %v11624_v60 = vpop.permute.xlu1 %4100 }
 0x288   : > { %13033 = vst [vmem:[#allocation16_spill] sm:$0xff] %v11624_v60  ;;  %v6962_v60 = vld [vmem:[%s9409_s13 + $0x21] sm:$0xff] }
 0x28a   : > { %8567 = vmatmul.mubr.msk.bf16.gmra.mrb[164].mxu1 %vm3628_vm3, %v11469_v21 }
 0x28b   : > { %8533 = vmatmul.mubr.msk.bf16.gmra.mrb[164].mxu0 %vm3628_vm3, %v11348_v62  ;;  %8570 = vmatprep.mubr.msk.bf16.mxu1 %vm3628_vm3, %v11479_v24  ;;  %v11608_v24 = vpop.permute.xlu0 %4075 }
 0x28c   : > { %8536 = vmatprep.mubr.msk.bf16.mxu0 %vm3628_vm3, %v11364_v36  ;;  %13029 = vst [vmem:[#allocation4_spill] sm:$0xff] %v11608_v24 }
 0x28f   : > { %v11618_v24 = vpop.permute.xlu0 %4085 }
 0x290   : > { %13032 = vst [vmem:[#allocation37_spill] sm:$0xff] %v11618_v24 }
 0x292   : > { %8571 = vmatmul.mubr.msk.bf16.gmra.mrb[168].mxu1 %vm3628_vm3, %v11481_v61  ;;  %v11610_v61 = vpack.c.bf16 %v5680_v3, %v5679_v8  ;;  %v5978_v8 = vld [vmem:[#allocation2 + $0x38] sm:$0xff]  ;;  %v5977_v3 = vld [vmem:[#allocation2 + $0x30] sm:$0xff] }
 0x293   : > { %8537 = vmatmul.mubr.msk.bf16.gmra.mrb[168].mxu0 %vm3628_vm3, %v11370_v43  ;;  %8574 = vmatprep.mubr.msk.bf16.mxu1 %vm3628_vm3, %v4558_v32  ;;  %v6301_v32 = vld [vmem:[#allocation2 + $0x21] sm:$0xff]  ;;  %v6008_v10 = vpack.c.bf16 %v5978_v8, %v5977_v3 }
 0x294   : > { %8540 = vmatprep.mubr.msk.bf16.mxu0 %vm3628_vm3, %v11380_v31  ;;  %13030 = vst [vmem:[#allocation7_spill] sm:$0xff] %v11610_v61  ;;  %v6333_v23 = vpack.c.bf16 %v6302_v54, %v6301_v32  ;;  %v6694_v54 = vsel %vm3796_vm2, %v11510_v41, 0  ;;  %v11628_v32 = vpop.permute.xlu0 %4095  ;;  %v11636_v41 = vpop.permute.xlu1 %4110 }
 0x295   : > { %13034 = vst [vmem:[#allocation36_spill] sm:$0xff] %v11628_v32  ;;  %13035 = vst [vmem:[#allocation51_spill] sm:$0xff] %v11636_v41  ;;  %v6963_v41 = vld [vmem:[%s9409_s13 + $0x29] sm:$0xff] }
 0x298   : > { %v11638_v8 = vpop.permute.xlu0 %4105  ;;  %v11646_v48 = vpop.permute.xlu1 %4120 }
 0x299   : > { %13036 = vst [vmem:[#allocation13_spill] sm:$0xff] %v11638_v8  ;;  %13037 = vst [vmem:[#allocation52_spill] sm:$0xff] %v11646_v48 }
 0x29a   : > { %8575 = vmatmul.mubr.msk.bf16.gmra.mrb[172].mxu1 %vm3628_vm3, %v11610_v61  ;;  %v6303_v61 = vld [vmem:[#allocation2 + $0x31] sm:$0xff] }
 0x29b   : > { %8541 = vmatmul.mubr.msk.bf16.gmra.mrb[172].mxu0 %vm3628_vm3, %v11612_v59  ;;  %8580 = vmatprep.mubr.msk.bf16.mxu1 %vm3628_vm3, %v6007_v55  ;;  %v6334_v24 = vpack.c.bf16 %v6304_v15, %v6303_v61  ;;  %v6009_v55 = vpack.c.bf16 %v5980_v34, %v5979_v2 }
 0x29c   : > { %8614 = vmatprep.mubr.msk.bf16.mxu0 %vm3628_vm3, %v6333_v23  ;;  %v6335_v23 = vpack.c.bf16 %v6306_v16, %v6305_v5 }
 0x2a2   : > { %8581 = vmatmul.mubr.msk.bf16.vlgmr.msra.gmra.mrb[176].mxu1 %vm3628_vm3, %v6008_v10  ;;  %v11650_v10 = vpop.permute.xlu0 %4115 }
 0x2a3   : > { %8615 = vmatmul.mubr.msk.bf16.vlgmr.msra.gmra.mrb[144].mxu0 %vm3628_vm3, %v6334_v24  ;;  %8647 = vmatpush3.bf16.msra.mxu1 %v6694_v54  ;;  %13038 = vst [vmem:[#allocation55_spill] sm:$0xff] %v11650_v10 }
 0x2a4   : > { %8584 = vmatprep.mubr.msk.bf16.mxu1 %vm3628_vm3, %v6009_v55  ;;  %8618 = vmatprep.mubr.msk.bf16.mxu0 %vm3628_vm3, %v6335_v23 }
 0x2a5   : > { %8681 = vmatpush3.bf16.msra.mxu0 %v7058_v58  ;;  %v11652_v58 = vpop.permute.xlu1 %4130 }
 0x2a6   : > { %13039 = vst [vmem:[#allocation57_spill] sm:$0xff] %v11652_v58  ;;  %v11656_v5 = vpop.permute.xlu0 %4125 }
 0x2a7   : > { %13040 = vst [vmem:[#allocation48_spill] sm:$0xff] %v11656_v5 }
 0x2aa   : > { %8585 = vmatmul.mubr.msk.bf16.gmra.mrb[180].mxu1 %vm3628_vm3, %v11242_v40  ;;  %v11674_v24 = vpop.permute.xlu0 %4135 }
 0x2ab   : > { %8619 = vmatmul.mubr.msk.bf16.gmra.mrb[148].mxu0 %vm3628_vm3, %v11245_v20  ;;  %8588 = vmatprep.mubr.msk.bf16.mxu1 %vm3628_vm3, %v11247_v6  ;;  %13042 = vst [vmem:[#allocation65_spill] sm:$0xff] %v11674_v24  ;;  %v6961_v24 = vld [vmem:[%s9409_s13 + $0x19] sm:$0xff] }
 0x2ac   : > { %8622 = vmatprep.mubr.msk.bf16.mxu0 %vm3628_vm3, %v11252_v33  ;;  %v11670_v33 = vpop.permute.xlu1 %4140 }
 0x2ad   : > { %13041 = vst [vmem:[#allocation21_spill] sm:$0xff] %v11670_v33  ;;  %v6005_v33 = vld [vmem:[#allocation2 + $0x110] sm:$0xff] }
 0x2ae   : > { %v11690_v61 = vpop.permute.xlu0 %4145 }
 0x2af   : > { %13044 = vst [vmem:[#allocation41_spill] sm:$0xff] %v11690_v61 }
 0x2b2   : > { %8589 = vmatmul.mubr.msk.bf16.gmra.mrb[184].mxu1 %vm3628_vm3, %v11274_v35 }
 0x2b3   : > { %8623 = vmatmul.mubr.msk.bf16.gmra.mrb[152].mxu0 %vm3628_vm3, %v11277_v30  ;;  %8592 = vmatprep.mubr.msk.bf16.mxu1 %vm3628_vm3, %v11279_v53  ;;  %v11686_v53 = vpop.permute.xlu1 %4150 }
 0x2b4   : > { %8626 = vmatprep.mubr.msk.bf16.mxu0 %vm3628_vm3, %v11284_v56  ;;  %13043 = vst [vmem:[#allocation61_spill] sm:$0xff] %v11686_v53  ;;  %v6960_v53 = vld [vmem:[%s9409_s13 + $0x11] sm:$0xff] }
 0x2b5   : > { %v11664_v40 = vpop.f32.mrb[80].mxu1  ;;  %v6992_v10 = vpack.c.bf16 %v6961_v24, %v6960_v53 }
 0x2b6   : > { %v11666_v20 = vpop.f32.mrb[81].mxu1 }
 0x2b7   : > { %v11668_v6 = vpop.f32.mrb[82].mxu1 }
 0x2b8   : > { %v11672_v35 = vpop.f32.mrb[83].mxu1 }
 0x2ba   : > { %8593 = vmatmul.mubr.msk.bf16.gmra.mrb[188].mxu1 %vm3628_vm3, %v11306_v45 }
 0x2bb   : > { %8627 = vmatmul.mubr.msk.bf16.gmra.mrb[156].mxu0 %vm3628_vm3, %v11309_v37  ;;  %8596 = vmatprep.mubr.msk.bf16.mxu1 %vm3628_vm3, %v11311_v42  ;;  %v11702_v37 = vpop.permute.xlu1 %4812  ;;  %v11706_v42 = vpop.permute.xlu0 %4807 }
 0x2bc   : > { %8630 = vmatprep.mubr.msk.bf16.mxu0 %vm3628_vm3, %v11316_v9 }
 0x2bd   : > { %v11684_v30 = vpop.f32.mrb[84].mxu1 }
 0x2be   : > { %v11688_v56 = vpop.f32.mrb[85].mxu1 }
 0x2bf   : > { %v11692_v3 = vpop.f32.mrb[86].mxu1  ;;  %v11716_v34 = vpop.permute.xlu1 %4822 }
 0x2c0   : > { %v11694_v45 = vpop.f32.mrb[87].mxu1 }
 0x2c2   : > { %8597 = vmatmul.mubr.msk.bf16.gmra.mrb[192].mxu1 %vm3628_vm3, %v11338_v18 }
 0x2c3   : > { %8631 = vmatmul.mubr.msk.bf16.gmra.mrb[160].mxu0 %vm3628_vm3, %v11341_v52  ;;  %8600 = vmatprep.mubr.msk.bf16.mxu1 %vm3628_vm3, %v11343_v17  ;;  %v11720_v52 = vpop.permute.xlu0 %4817 }
 0x2c4   : > { %8634 = vmatprep.mubr.msk.bf16.mxu0 %vm3628_vm3, %v11348_v62  ;;  %13045 = vst [vmem:[#allocation34_spill] sm:$0xff] %v11720_v52 }
 0x2c5   : > { %v11708_v9 = vpop.f32.mrb[88].mxu1 }
 0x2c6   : > { %v11710_v15 = vpop.f32.mrb[89].mxu1 }
 0x2c7   : > { %v11712_v2 = vpop.f32.mrb[90].mxu1  ;;  %v11738_v55 = vpop.permute.xlu0 %4827 }
 0x2c8   : > { %v11714_v18 = vpop.f32.mrb[91].mxu1 }
 0x2ca   : > { %8601 = vmatmul.mubr.msk.bf16.gmra.mrb[196].mxu1 %vm3628_vm3, %v11362_v19  ;;  %v11734_v19 = vpop.permute.xlu1 %4832 }
 0x2cb   : > { %8635 = vmatmul.mubr.msk.bf16.gmra.mrb[164].mxu0 %vm3628_vm3, %v11364_v36  ;;  %8604 = vmatprep.mubr.msk.bf16.mxu1 %vm3628_vm3, %v11366_v29  ;;  %v6006_v36 = vld [vmem:[#allocation2 + $0x118] sm:$0xff] }
 0x2cc   : > { %8638 = vmatprep.mubr.msk.bf16.mxu0 %vm3628_vm3, %v11370_v43  ;;  %v6331_v29 = vld [vmem:[#allocation2 + $0x111] sm:$0xff]  ;;  %v6332_v43 = vld [vmem:[#allocation2 + $0x119] sm:$0xff]  ;;  %v6022_v58 = vpack.c.bf16 %v6006_v36, %v6005_v33 }
 0x2cd   : > { %v11728_v17 = vpop.f32.mrb[92].mxu1  ;;  %v6964_v33 = vld [vmem:[%s9409_s13 + $0x31] sm:$0xff] }
 0x2ce   : > { %v11730_v62 = vpop.f32.mrb[93].mxu1 }
 0x2cf   : > { %v11732_v16 = vpop.f32.mrb[94].mxu1 }
 0x2d0   : > { %v11736_v54 = vpop.f32.mrb[95].mxu1 }
 0x2d1   : > { %13046 = vst [vmem:[#allocation24_spill] sm:$0xff] %v11736_v54 }
 0x2d2   : > { %8605 = vmatmul.mubr.msk.bf16.gmra.mrb[200].mxu1 %vm3628_vm3, %v11378_v49  ;;  %v11752_v49 = vpop.permute.xlu1 %4842 }
 0x2d3   : > { %8639 = vmatmul.mubr.msk.bf16.gmra.mrb[168].mxu0 %vm3628_vm3, %v11380_v31  ;;  %8608 = vmatprep.mubr.msk.bf16.mxu1 %vm3628_vm3, %v11492_v11  ;;  %v11756_v31 = vpop.permute.xlu0 %4837 }
 0x2d4   : > { %8642 = vmatprep.mubr.msk.bf16.mxu0 %vm3628_vm3, %v11612_v59  ;;  %v6348_v59 = vpack.c.bf16 %v6332_v43, %v6331_v29 }
 0x2d5   : > { %v11748_v23 = vpop.f32.mrb[96].mxu1 }
 0x2d6   : > { %13047 = vst [vmem:[#allocation18_spill] sm:$0xff] %v11748_v23  ;;  %v11754_v61 = vpop.f32.mrb[97].mxu1  ;;  %v11766_v5 = vpop.permute.xlu1 %4852 }
 0x2d7   : > { %13048 = vst [vmem:[#allocation23_spill] sm:$0xff] %v11754_v61  ;;  %v11758_v11 = vpop.f32.mrb[98].mxu1  ;;  %13051 = vst [vmem:[#allocation27_spill] sm:$0xff] %v11766_v5  ;;  %v11771_v32 = vpop.permute.xlu0 %4847 }
 0x2d8   : > { %13049 = vst [vmem:[#allocation20_spill] sm:$0xff] %v11758_v11  ;;  %v11760_v48 = vpop.f32.mrb[99].mxu1 }
 0x2d9   : > { %13050 = vst [vmem:[#allocation29_spill] sm:$0xff] %v11760_v48  ;;  %v6976_v48 = vld [vmem:[%s9409_s13 + $0x91] sm:$0xff] }
 0x2da   : > { %8609 = vmatmul.mubr.msk.bf16.gmra.mrb[204].mxu1 %vm3628_vm3, %v6022_v58  ;;  %v6965_v58 = vld [vmem:[%s9409_s13 + $0x39] sm:$0xff]  ;;  %v11783_v43 = vpop.permute.xlu1 %4862 }
 0x2db   : > { %8643 = vmatmul.mubr.msk.bf16.gmra.mrb[172].mxu0 %vm3628_vm3, %v6348_v59  ;;  %8648 = vmatprep.mubr.msk.bf16.mxu1 %vm3628_vm3, %v11395_v13  ;;  %v6993_v13 = vpack.c.bf16 %v6963_v41, %v6962_v60  ;;  %13056 = vst [vmem:[#allocation14_spill] sm:$0xff] %v11783_v43  ;;  %v11787_v59 = vpop.permute.xlu0 %4857  ;;  %v6967_v60 = vld [vmem:[%s9409_s13 + $0x49] sm:$0xff] }
 0x2dc   : > { %8682 = vmatprep.mubr.msk.bf16.mxu0 %vm383_vm1, %v6992_v10  ;;  %v6994_v10 = vpack.c.bf16 %v6965_v58, %v6964_v33  ;;  %v6968_v33 = vld [vmem:[%s9409_s13 + $0x51] sm:$0xff]  ;;  %v6969_v58 = vld [vmem:[%s9409_s13 + $0x59] sm:$0xff] }
 0x2dd   : > { %v11773_v29 = vpop.f32.mrb[100].mxu1 }
 0x2de   : > { %13052 = vst [vmem:[#allocation28_spill] sm:$0xff] %v11773_v29  ;;  %v11777_v24 = vpop.f32.mrb[101].mxu1 }
 0x2df   : > { %13053 = vst [vmem:[#allocation26_spill] sm:$0xff] %v11777_v24  ;;  %v11779_v53 = vpop.f32.mrb[102].mxu1  ;;  %v6966_v24 = vld [vmem:[%s9409_s13 + $0x41] sm:$0xff]  ;;  %v11807_v29 = vpop.permute.xlu0 %4867 }
 0x2e0   : > { %13054 = vst [vmem:[#allocation15_spill] sm:$0xff] %v11779_v53  ;;  %v11781_v36 = vpop.f32.mrb[103].mxu1  ;;  %v11803_v53 = vpop.permute.xlu1 %4872  ;;  %13062 = vst [vmem:[#allocation9_spill] sm:$0xff] %v11807_v29 }
 0x2e1   : > { %13055 = vst [vmem:[#allocation11_spill] sm:$0xff] %v11781_v36  ;;  %13060 = vst [vmem:[#allocation12_spill] sm:$0xff] %v11803_v53 }
 0x2e2   : > { %8649 = vmatmul.mubr.msk.bf16.vlgmr.msra.gmra.mrb[208].mxu1 %vm3628_vm3, %v11419_v7 }
 0x2e3   : > { %8683 = vmatmul.mubr.msk.bf16.vlgmr.msra.gmra.mrb[144].mxu0 %vm383_vm1, %v6993_v13  ;;  %8652 = vmatprep.mubr.msk.bf16.mxu1 %vm3628_vm3, %v11421_v57  ;;  %v6995_v13 = vpack.c.bf16 %v6967_v60, %v6966_v24  ;;  %v6971_v24 = vld [vmem:[%s9409_s13 + $0x69] sm:$0xff] }
 0x2e4   : > { %8686 = vmatprep.mubr.msk.bf16.mxu0 %vm383_vm1, %v6994_v10  ;;  %v6996_v10 = vpack.c.bf16 %v6969_v58, %v6968_v33  ;;  %v6973_v33 = vld [vmem:[%s9409_s13 + $0x79] sm:$0xff]  ;;  %v11821_v58 = vpop.permute.xlu1 %4882 }
 0x2e5   : > { %v11795_v41 = vpop.f32.mrb[104].mxu1  ;;  %13064 = vst [vmem:[#allocation43_spill] sm:$0xff] %v11821_v58 }
 0x2e6   : > { %13057 = vst [vmem:[#allocation47_spill] sm:$0xff] %v11795_v41  ;;  %v11799_v7 = vpop.f32.mrb[105].mxu1 }
 0x2e7   : > { %13058 = vst [vmem:[#allocation10_spill] sm:$0xff] %v11799_v7  ;;  %v11801_v36 = vpop.f32.mrb[106].mxu1 }
 0x2e8   : > { %13059 = vst [vmem:[#allocation50_spill] sm:$0xff] %v11801_v36  ;;  %v11805_v57 = vpop.f32.mrb[107].mxu1  ;;  %v6970_v36 = vld [vmem:[%s9409_s13 + $0x61] sm:$0xff]  ;;  %v11837_v8 = vpop.permute.xlu1 %4892 }
 0x2e9   : > { %13061 = vst [vmem:[#allocation6_spill] sm:$0xff] %v11805_v57  ;;  %v6972_v57 = vld [vmem:[%s9409_s13 + $0x71] sm:$0xff]  ;;  %13069 = vst [vmem:[#allocation53_spill] sm:$0xff] %v11837_v8 }
 0x2ea   : > { %8653 = vmatmul.mubr.msk.bf16.gmra.mrb[212].mxu1 %vm3628_vm3, %v11431_v47  ;;  %v6998_v41 = vpack.c.bf16 %v6973_v33, %v6972_v57  ;;  %v4155_v57 = vmul.f32 %v11664_v40, %v11535_v44 }
 0x2eb   : > { %8687 = vmatmul.mubr.msk.bf16.gmra.mrb[148].mxu0 %vm383_vm1, %v6995_v13  ;;  %8656 = vmatprep.mubr.msk.bf16.mxu1 %vm3628_vm3, %v11433_v28  ;;  %v11825_v13 = vpop.permute.xlu0 %4877  ;;  %v6997_v28 = vpack.c.bf16 %v6971_v24, %v6970_v36 }
 0x2ec   : > { %8690 = vmatprep.mubr.msk.bf16.mxu0 %vm383_vm1, %v6996_v10  ;;  %13066 = vst [vmem:[#allocation42_spill] sm:$0xff] %v11825_v13 }
 0x2ed   : > { %v11817_v60 = vpop.f32.mrb[108].mxu1 }
 0x2ee   : > { %13063 = vst [vmem:[#allocation5_spill] sm:$0xff] %v11817_v60  ;;  %v11823_v47 = vpop.f32.mrb[109].mxu1  ;;  %v6974_v60 = vld [vmem:[%s9409_s13 + $0x81] sm:$0xff] }
 0x2ef   : > { %13065 = vst [vmem:[#allocation30_spill] sm:$0xff] %v11823_v47  ;;  %v11827_v7 = vpop.f32.mrb[110].mxu1  ;;  %v6975_v47 = vld [vmem:[%s9409_s13 + $0x89] sm:$0xff]  ;;  %v11843_v36 = vpop.permute.xlu0 %4887 }
 0x2f0   : > { %13067 = vst [vmem:[#allocation17_spill] sm:$0xff] %v11827_v7  ;;  %v11829_v10 = vpop.f32.mrb[111].mxu1  ;;  %v6977_v7 = vld [vmem:[%s9409_s13 + $0x99] sm:$0xff]  ;;  %13070 = vst [vmem:[#allocation60_spill] sm:$0xff] %v11843_v36  ;;  %v6999_v11 = vpack.c.bf16 %v6975_v47, %v6974_v60  ;;  %v4156_v36 = vmul.f32 %v11668_v6, %v11531_v50 }
 0x2f1   : > { %13068 = vst [vmem:[#allocation59_spill] sm:$0xff] %v11829_v10  ;;  %v7000_v61 = vpack.c.bf16 %v6977_v7, %v6976_v48 }
 0x2f2   : > { %8657 = vmatmul.mubr.msk.bf16.gmra.mrb[216].mxu1 %vm3628_vm3, %v11443_v14 }
 0x2f3   : > { %8691 = vmatmul.mubr.msk.bf16.gmra.mrb[152].mxu0 %vm383_vm1, %v6997_v28  ;;  %8660 = vmatprep.mubr.msk.bf16.mxu1 %vm3628_vm3, %v11445_v51  ;;  %v4153_v51 = vmul.f32 %v11525_v4, %v11666_v20  ;;  %v4154_v20 = vmul.f32 %v11519_v0, %v11672_v35 }
 0x2f4   : > { %8694 = vmatprep.mubr.msk.bf16.mxu0 %vm383_vm1, %v6998_v41 }
 0x2f5   : > { %v8446_v24 = vpop.f32.mrb[112].mxu1 }
 0x2f6   : > { %v4967_v14 = vmul.f32 %v8446_v24, %v11720_v52  ;;  %v8480_v33 = vpop.f32.mrb[176].mxu0  ;;  %v4646_v28 = vpop.f32.mrb[113].mxu1 }
 0x2f7   : > { %v4965_v10 = vmul.f32 %v11706_v42, %v4646_v28  ;;  %v5164_v8 = vpop.f32.mrb[177].mxu0  ;;  %v8447_v41 = vpop.f32.mrb[114].mxu1  ;;  %v5293_v53 = vmul.f32 %v8480_v33, %v11535_v44 }
 0x2f8   : > { %v8876_v23 = vadd.f32 %v4967_v14, %v4155_v57  ;;  %v4968_v40 = vmul.f32 %v8447_v41, %v11716_v34  ;;  %v8481_v24 = vpop.f32.mrb[178].mxu0  ;;  %v4649_v52 = vpop.f32.mrb[115].mxu1  ;;  %v5291_v28 = vmul.f32 %v5164_v8, %v11525_v4  ;;  %v6978_v8 = vld [vmem:[%s9409_s13 + $0xa1] sm:$0xff] }
 0x2f9   : > { %v8883_v54 = vadd.f32 %v4965_v10, %v4153_v51  ;;  %v4966_v48 = vmul.f32 %v11702_v37, %v4649_v52  ;;  %v5167_v7 = vpop.f32.mrb[179].mxu0  ;;  %v5294_v47 = vmul.f32 %v8481_v24, %v11531_v50  ;;  %v11871_v52 = vpop.permute.xlu1 %4902  ;;  %v13083_v50 = vld [vmem:[#allocation12_spill] sm:$0xff] }
 0x2fa   : > { %v11859_v6 = vadd.f32 %v8876_v23, %v5293_v53  ;;  %v8890_v60 = vadd.f32 %v4968_v40, %v4156_v36  ;;  %8661 = vmatmul.mubr.msk.bf16.gmra.mrb[220].mxu1 %vm3628_vm3, %v11455_v22  ;;  %v5292_v10 = vmul.f32 %v5167_v7, %v11519_v0  ;;  %13071 = vst [vmem:[#allocation56_spill] sm:$0xff] %v11871_v52  ;;  %v6979_v53 = vld [vmem:[%s9409_s13 + $0xa9] sm:$0xff]  ;;  %v6980_v36 = vld [vmem:[%s9409_s13 + $0xb1] sm:$0xff]  ;;  %v6981_v22 = vld [vmem:[%s9409_s13 + $0xb9] sm:$0xff] }
 0x2fb   : > { %v11864_v57 = vadd.f32 %v8883_v54, %v5291_v28  ;;  %v8897_v35 = vadd.f32 %v4966_v48, %v4154_v20  ;;  %8695 = vmatmul.mubr.msk.bf16.gmra.mrb[156].mxu0 %vm383_vm1, %v6999_v11  ;;  %8664 = vmatprep.mubr.msk.bf16.mxu1 %vm3628_vm3, %v11457_v38  ;;  %v11879_v54 = vpop.permute.xlu0 %4897  ;;  %v4159_v11 = vmul.f32 %v11684_v30, %v11557_v26 }
 0x2fc   : > { %v11873_v23 = vadd.f32 %v8890_v60, %v5294_v47  ;;  %8698 = vmatprep.mubr.msk.bf16.mxu0 %vm383_vm1, %v7000_v61  ;;  %13072 = vst [vmem:[#allocation68_spill] sm:$0xff] %v11879_v54  ;;  %v4157_v40 = vmul.f32 %v11545_v63, %v11688_v56  ;;  %v7001_v28 = vpack.c.bf16 %v6979_v53, %v6978_v8 }
 0x2fd   : > { %v11881_v14 = vadd.f32 %v8897_v35, %v5292_v10  ;;  %v8450_v33 = vpop.f32.mrb[116].mxu1  ;;  %v7002_v48 = vpack.c.bf16 %v6981_v22, %v6980_v36  ;;  %v4160_v7 = vmul.f32 %v11692_v3, %v11555_v1 }
 0x2fe   : > { %v4971_v38 = vmul.f32 %v8450_v33, %v11756_v31  ;;  %v8484_v51 = vpop.f32.mrb[180].mxu0  ;;  %v4662_v41 = vpop.f32.mrb[117].mxu1  ;;  %v4158_v33 = vmul.f32 %v11543_v25, %v11694_v45 }
 0x2ff   : > { %v4969_v61 = vmul.f32 %v11738_v55, %v4662_v41  ;;  %v5180_v24 = vpop.f32.mrb[181].mxu0  ;;  %v8451_v20 = vpop.f32.mrb[118].mxu1  ;;  %v5297_v47 = vmul.f32 %v8484_v51, %v11557_v26 }
 0x300   : > { %v8904_v60 = vadd.f32 %v4971_v38, %v4159_v11  ;;  %v4972_v30 = vmul.f32 %v8451_v20, %v11752_v49  ;;  %v8485_v35 = vpop.f32.mrb[182].mxu0  ;;  %v4665_v10 = vpop.f32.mrb[119].mxu1  ;;  %v5295_v41 = vmul.f32 %v5180_v24, %v11545_v63  ;;  %v6617_v11 = vld [vmem:[#allocation2 + $0xd2] sm:$0xff]  ;;  %v6620_v24 = vld [vmem:[#allocation2 + $0xea] sm:$0xff] }
 0x301   : > { %v8911_v56 = vadd.f32 %v4969_v61, %v4157_v40  ;;  %v4970_v8 = vmul.f32 %v11734_v19, %v4665_v10  ;;  %v5183_v53 = vpop.f32.mrb[183].mxu0  ;;  %v5298_v22 = vmul.f32 %v8485_v35, %v11555_v1  ;;  %v6618_v40 = vld [vmem:[#allocation2 + $0xda] sm:$0xff]  ;;  %v11909_v20 = vpop.permute.xlu1 %4912  ;;  %v6619_v10 = vld [vmem:[#allocation2 + $0xe2] sm:$0xff]  ;;  %v4164_v1 = vmul.f32 %v11712_v2, %v11571_v46 }
 0x302   : > { %v11897_v36 = vadd.f32 %v8904_v60, %v5297_v47  ;;  %v8918_v3 = vadd.f32 %v4972_v30, %v4160_v7  ;;  %8665 = vmatmul.mubr.msk.bf16.gmra.mrb[224].mxu1 %vm3628_vm3, %v11467_v39  ;;  %v5296_v51 = vmul.f32 %v5183_v53, %v11543_v25  ;;  %v6982_v61 = vld [vmem:[%s9409_s13 + $0xc1] sm:$0xff]  ;;  %13073 = vst [vmem:[#allocation63_spill] sm:$0xff] %v11909_v20  ;;  %v6983_v39 = vld [vmem:[%s9409_s13 + $0xc9] sm:$0xff]  ;;  %v6984_v60 = vld [vmem:[%s9409_s13 + $0xd1] sm:$0xff]  ;;  %v11917_v30 = vpop.permute.xlu0 %4907 }
 0x303   : > { %v11902_v45 = vadd.f32 %v8911_v56, %v5295_v41  ;;  %v8925_v38 = vadd.f32 %v4970_v8, %v4158_v33  ;;  %8699 = vmatmul.mubr.msk.bf16.gmra.mrb[160].mxu0 %vm383_vm1, %v7001_v28  ;;  %8668 = vmatprep.mubr.msk.bf16.mxu1 %vm3628_vm3, %v11469_v21  ;;  %v6985_v47 = vld [vmem:[%s9409_s13 + $0xd9] sm:$0xff]  ;;  %13074 = vst [vmem:[#allocation31_spill] sm:$0xff] %v11917_v30 }
 0x304   : > { %v11911_v7 = vadd.f32 %v8918_v3, %v5298_v22  ;;  %8702 = vmatprep.mubr.msk.bf16.mxu0 %vm383_vm1, %v7002_v48  ;;  %v4163_v21 = vmul.f32 %v11708_v9, %v11575_v12  ;;  %v6638_v8 = vpack.c.bf16 %v6618_v40, %v6617_v11  ;;  %v6639_v53 = vpack.c.bf16 %v6620_v24, %v6619_v10  ;;  %v13075_v40 = vld [vmem:[#allocation35_spill] sm:$0xff] }
 0x305   : > { %v11919_v35 = vadd.f32 %v8925_v38, %v5296_v51  ;;  %v8454_v28 = vpop.f32.mrb[120].mxu1  ;;  %v4161_v48 = vmul.f32 %v11569_v27, %v11710_v15  ;;  %v7003_v38 = vpack.c.bf16 %v6983_v39, %v6982_v61  ;;  %v7004_v51 = vpack.c.bf16 %v6985_v47, %v6984_v60 }
 0x306   : > { %v4975_v33 = vmul.f32 %v8454_v28, %v11787_v59  ;;  %v8488_v56 = vpop.f32.mrb[184].mxu0  ;;  %v4678_v41 = vpop.f32.mrb[121].mxu1  ;;  %v4162_v24 = vmul.f32 %v13075_v40, %v11714_v18 }
 0x307   : > { %v4973_v3 = vmul.f32 %v11771_v32, %v4678_v41  ;;  %v5196_v22 = vpop.f32.mrb[185].mxu0  ;;  %v8455_v25 = vpop.f32.mrb[122].mxu1  ;;  %v5301_v9 = vmul.f32 %v8488_v56, %v11575_v12  ;;  %v6622_v56 = vld [vmem:[#allocation2 + $0xfa] sm:$0xff] }
 0x308   : > { %v8932_v63 = vadd.f32 %v4975_v33, %v4163_v21  ;;  %v4976_v28 = vmul.f32 %v8455_v25, %v11783_v43  ;;  %v8489_v26 = vpop.f32.mrb[186].mxu0  ;;  %v4681_v11 = vpop.f32.mrb[123].mxu1  ;;  %v5299_v10 = vmul.f32 %v5196_v22, %v11569_v27  ;;  %v6621_v33 = vld [vmem:[#allocation2 + $0xf2] sm:$0xff] }
 0x309   : > { %v8939_v15 = vadd.f32 %v4973_v3, %v4161_v48  ;;  %v4974_v61 = vmul.f32 %v11766_v5, %v4681_v11  ;;  %v5199_v39 = vpop.f32.mrb[187].mxu0  ;;  %v5302_v25 = vmul.f32 %v8489_v26, %v11571_v46  ;;  %v11945_v41 = vpop.permute.xlu1 %4922  ;;  %v6987_v26 = vld [vmem:[%s9409_s13 + $0xe9] sm:$0xff]  ;;  %v6989_v48 = vld [vmem:[%s9409_s13 + $0xf9] sm:$0xff] }
 0x30a   : > { %v11935_v60 = vadd.f32 %v8932_v63, %v5301_v9  ;;  %v8946_v2 = vadd.f32 %v4976_v28, %v4164_v1  ;;  %8669 = vmatmul.mubr.msk.bf16.gmra.mrb[228].mxu1 %vm3628_vm3, %v6638_v8  ;;  %v5300_v21 = vmul.f32 %v5199_v39, %v13075_v40  ;;  %v6986_v63 = vld [vmem:[%s9409_s13 + $0xe1] sm:$0xff]  ;;  %13076 = vst [vmem:[#allocation64_spill] sm:$0xff] %v11945_v41  ;;  %v6988_v8 = vld [vmem:[%s9409_s13 + $0xf1] sm:$0xff]  ;;  %v11953_v3 = vpop.permute.xlu0 %4917 }
 0x30b   : > { %v11939_v47 = vadd.f32 %v8939_v15, %v5299_v10  ;;  %v8953_v18 = vadd.f32 %v4974_v61, %v4162_v24  ;;  %8703 = vmatmul.mubr.msk.bf16.gmra.mrb[164].mxu0 %vm383_vm1, %v7003_v38  ;;  %8672 = vmatprep.mubr.msk.bf16.mxu1 %vm3628_vm3, %v6639_v53  ;;  %13077 = vst [vmem:[#allocation49_spill] sm:$0xff] %v11953_v3  ;;  %v13078_v38 = vld [vmem:[#allocation19_spill] sm:$0xff]  ;;  %v13079_v10 = vld [vmem:[#allocation40_spill] sm:$0xff] }
 0x30c   : > { %v11947_v1 = vadd.f32 %v8946_v2, %v5302_v25  ;;  %8706 = vmatprep.mubr.msk.bf16.mxu0 %vm383_vm1, %v7004_v51  ;;  %v4167_v53 = vmul.f32 %v11728_v17, %v13078_v38  ;;  %v6640_v15 = vpack.c.bf16 %v6622_v56, %v6621_v33  ;;  %v4165_v61 = vmul.f32 %v13079_v10, %v11730_v62  ;;  %v13081_v33 = vld [vmem:[#allocation24_spill] sm:$0xff]  ;;  %v13082_v56 = vld [vmem:[#allocation46_spill] sm:$0xff] }
 0x30d   : > { %v11955_v22 = vadd.f32 %v8953_v18, %v5300_v21  ;;  %v8458_v9 = vpop.f32.mrb[124].mxu1  ;;  %v7005_v25 = vpack.c.bf16 %v6987_v26, %v6986_v63  ;;  %v7006_v40 = vpack.c.bf16 %v6989_v48, %v6988_v8  ;;  %v13080_v18 = vld [vmem:[#allocation22_spill] sm:$0xff]  ;;  %v4166_v0 = vmul.f32 %v13082_v56, %v13081_v33 }
 0x30e   : > { %v4979_v28 = vmul.f32 %v8458_v9, %v11825_v13  ;;  %v8492_v11 = vpop.f32.mrb[188].mxu0  ;;  %v4694_v24 = vpop.f32.mrb[125].mxu1  ;;  %v4168_v21 = vmul.f32 %v11732_v16, %v13080_v18 }
 0x30f   : > { %v4977_v51 = vmul.f32 %v11807_v29, %v4694_v24  ;;  %v5212_v39 = vpop.f32.mrb[189].mxu0  ;;  %v8459_v2 = vpop.f32.mrb[126].mxu1  ;;  %v5305_v17 = vmul.f32 %v8492_v11, %v13078_v38  ;;  %v13084_v11 = vld [vmem:[#allocation7_spill] sm:$0xff] }
 0x310   : > { %v8960_v46 = vadd.f32 %v4979_v28, %v4167_v53  ;;  %v4980_v9 = vmul.f32 %v8459_v2, %v11821_v58  ;;  %v8493_v27 = vpop.f32.mrb[190].mxu0  ;;  %v4697_v12 = vpop.f32.mrb[127].mxu1  ;;  %v5303_v24 = vmul.f32 %v5212_v39, %v13079_v10  ;;  %v13089_v2 = vld [vmem:[#allocation37_spill] sm:$0xff]  ;;  %v13094_v10 = vld [vmem:[#allocation3_spill] sm:$0xff] }
 0x311   : > { %v8967_v62 = vadd.f32 %v4977_v51, %v4165_v61  ;;  %v4978_v4 = vmul.f32 %v13083_v50, %v4697_v12  ;;  %v5215_v63 = vpop.f32.mrb[191].mxu0  ;;  %v5306_v8 = vmul.f32 %v8493_v27, %v13080_v18  ;;  %v6625_v12 = vld [vmem:[#allocation2 + $0x112] sm:$0xff]  ;;  %v6626_v61 = vld [vmem:[#allocation2 + $0x11a] sm:$0xff]  ;;  %v11981_v51 = vpop.permute.xlu1 %4932 }
 0x312   : > { %v11971_v26 = vadd.f32 %v8960_v46, %v5305_v17  ;;  %v8974_v16 = vadd.f32 %v4980_v9, %v4168_v21  ;;  %8673 = vmatmul.mubr.msk.bf16.gmra.mrb[232].mxu1 %vm3628_vm3, %v6640_v15  ;;  %v5304_v28 = vmul.f32 %v5215_v63, %v13082_v56  ;;  %13085 = vst [vmem:[#allocation38_spill] sm:$0xff] %v11981_v51  ;;  %v6990_v27 = vld [vmem:[%s9409_s13 + $0x101] sm:$0xff]  ;;  %v6991_v15 = vld [vmem:[%s9409_s13 + $0x109] sm:$0xff]  ;;  %v11988_v39 = vpop.permute.xlu0 %4927 }
 0x313   : > { %v11975_v48 = vadd.f32 %v8967_v62, %v5303_v24  ;;  %v8981_v53 = vadd.f32 %v4978_v4, %v4166_v0  ;;  %8707 = vmatmul.mubr.msk.bf16.gmra.mrb[168].mxu0 %vm383_vm1, %v7005_v25  ;;  %8676 = vmatprep.mubr.msk.bf16.mxu1 %vm3628_vm3, %v13084_v11  ;;  %13087 = vst [vmem:[#allocation7_spill] sm:$0xff] %v11988_v39  ;;  %v13090_v25 = vld [vmem:[#allocation18_spill] sm:$0xff]  ;;  %v13091_v24 = vld [vmem:[#allocation23_spill] sm:$0xff]  ;;  %v13092_v63 = vld [vmem:[#allocation4_spill] sm:$0xff] }
 0x314   : > { %v11983_v46 = vadd.f32 %v8974_v16, %v5306_v8  ;;  %8710 = vmatprep.mubr.msk.bf16.mxu0 %vm383_vm1, %v7006_v40  ;;  %v4171_v21 = vmul.f32 %v13090_v25, %v13089_v2  ;;  %v6642_v62 = vpack.c.bf16 %v6626_v61, %v6625_v12  ;;  %v4169_v16 = vmul.f32 %v13092_v63, %v13091_v24  ;;  %v13093_v8 = vld [vmem:[#allocation60_spill] sm:$0xff] }
 0x315   : > { %v11990_v0 = vadd.f32 %v8981_v53, %v5304_v28  ;;  %v8462_v4 = vpop.f32.mrb[128].mxu1  ;;  %v7007_v18 = vpack.c.bf16 %v6991_v15, %v6990_v27  ;;  %v13095_v53 = vld [vmem:[#allocation20_spill] sm:$0xff] }
 0x316   : > { %13086 = vst [vmem:[#allocation24_spill] sm:$0xff] %v11983_v46  ;;  %v4983_v17 = vmul.f32 %v8462_v4, %v11879_v54  ;;  %v8496_v9 = vpop.f32.mrb[192].mxu0  ;;  %v4710_v33 = vpop.f32.mrb[129].mxu1  ;;  %v4172_v28 = vmul.f32 %v13095_v53, %v13094_v10  ;;  %v13097_v12 = vld [vmem:[#allocation8_spill] sm:$0xff] }
 0x317   : > { %13088 = vst [vmem:[#allocation69_spill] sm:$0xff] %v11990_v0  ;;  %v4981_v40 = vmul.f32 %v13093_v8, %v4710_v33  ;;  %v5228_v11 = vpop.f32.mrb[193].mxu0  ;;  %v8463_v56 = vpop.f32.mrb[130].mxu1  ;;  %v5309_v44 = vmul.f32 %v8496_v9, %v13089_v2  ;;  %v13096_v0 = vld [vmem:[#allocation29_spill] sm:$0xff] }
 0x318   : > { %v8988_v38 = vadd.f32 %v4983_v17, %v4171_v21  ;;  %v4984_v25 = vmul.f32 %v8463_v56, %v11871_v52  ;;  %v8497_v4 = vpop.f32.mrb[194].mxu0  ;;  %v4713_v54 = vpop.f32.mrb[131].mxu1  ;;  %v4170_v61 = vmul.f32 %v13097_v12, %v13096_v0  ;;  %v5307_v24 = vmul.f32 %v5228_v11, %v13092_v63  ;;  %v13098_v33 = vld [vmem:[#allocation53_spill] sm:$0xff]  ;;  %v13103_v11 = vld [vmem:[#allocation28_spill] sm:$0xff] }
 0x319   : > { %v8995_v46 = vadd.f32 %v4981_v40, %v4169_v16  ;;  %v4982_v8 = vmul.f32 %v13098_v33, %v4713_v54  ;;  %v5231_v50 = vpop.f32.mrb[195].mxu0  ;;  %v5310_v21 = vmul.f32 %v8497_v4, %v13094_v10  ;;  %v12014_v0 = vpop.permute.xlu1 %4942  ;;  %v13102_v40 = vld [vmem:[#allocation13_spill] sm:$0xff]  ;;  %v13109_v63 = vld [vmem:[#allocation16_spill] sm:$0xff] }
 0x31a   : > { %v12006_v27 = vadd.f32 %v8988_v38, %v5309_v44  ;;  %v9002_v15 = vadd.f32 %v4984_v25, %v4172_v28  ;;  %8677 = vmatmul.mubr.msk.bf16.gmra.mrb[236].mxu1 %vm3628_vm3, %v6642_v62  ;;  %v5308_v9 = vmul.f32 %v5231_v50, %v13097_v12  ;;  %v12018_v54 = vpop.permute.xlu0 %4937  ;;  %v4175_v53 = vmul.f32 %v13103_v11, %v13102_v40  ;;  %v13104_v28 = vld [vmem:[#allocation26_spill] sm:$0xff]  ;;  %v13105_v50 = vld [vmem:[#allocation36_spill] sm:$0xff] }
 0x31b   : > { %v12010_v17 = vadd.f32 %v8995_v46, %v5307_v24  ;;  %v9009_v56 = vadd.f32 %v4982_v8, %v4170_v61  ;;  %8711 = vmatmul.mubr.msk.bf16.gmra.mrb[172].mxu0 %vm383_vm1, %v7007_v18  ;;  %13100 = vst [vmem:[#allocation23_spill] sm:$0xff] %v12018_v54  ;;  %v4173_v25 = vmul.f32 %v13105_v50, %v13104_v28  ;;  %v13106_v24 = vld [vmem:[#allocation51_spill] sm:$0xff] }
 0x31c   : > { %v12016_v16 = vadd.f32 %v9002_v15, %v5310_v21  ;;  %v13107_v15 = vld [vmem:[#allocation15_spill] sm:$0xff] }
 0x31d   : > { %v12020_v44 = vadd.f32 %v9009_v56, %v5308_v9  ;;  %v8466_v38 = vpop.f32.mrb[132].mxu1  ;;  %v4176_v21 = vmul.f32 %v13107_v15, %v13106_v24  ;;  %v12042_v15 = vpop.permute.xlu1 %4952 }
 0x31e   : > { %13099 = vst [vmem:[#allocation18_spill] sm:$0xff] %v12016_v16  ;;  %v4987_v46 = vmul.f32 %v8466_v38, %v11953_v3  ;;  %v8500_v62 = vpop.f32.mrb[196].mxu0  ;;  %v4726_v8 = vpop.f32.mrb[133].mxu1  ;;  %v13108_v38 = vld [vmem:[#allocation11_spill] sm:$0xff]  ;;  %13111 = vst [vmem:[#allocation28_spill] sm:$0xff] %v12042_v15 }
 0x31f   : > { %13101 = vst [vmem:[#allocation20_spill] sm:$0xff] %v12020_v44  ;;  %v4985_v18 = vmul.f32 %v11917_v30, %v4726_v8  ;;  %v5244_v4 = vpop.f32.mrb[197].mxu0  ;;  %v8467_v61 = vpop.f32.mrb[134].mxu1  ;;  %v5313_v9 = vmul.f32 %v8500_v62, %v13102_v40  ;;  %v4174_v2 = vmul.f32 %v13109_v63, %v13108_v38 }
 0x320   : > { %v9016_v56 = vadd.f32 %v4987_v46, %v4175_v53  ;;  %v4988_v12 = vmul.f32 %v8467_v61, %v11945_v41  ;;  %v8501_v11 = vpop.f32.mrb[198].mxu0  ;;  %v4729_v10 = vpop.f32.mrb[135].mxu1  ;;  %v5311_v28 = vmul.f32 %v5244_v4, %v13105_v50  ;;  %v13115_v4 = vld [vmem:[#allocation48_spill] sm:$0xff] }
 0x321   : > { %v9023_v3 = vadd.f32 %v4985_v18, %v4173_v25  ;;  %v4986_v8 = vmul.f32 %v11909_v20, %v4729_v10  ;;  %v5247_v30 = vpop.f32.mrb[199].mxu0  ;;  %v5314_v53 = vmul.f32 %v8501_v11, %v13106_v24  ;;  %v12046_v25 = vpop.permute.xlu0 %4947  ;;  %v13117_v11 = vld [vmem:[#allocation10_spill] sm:$0xff] }
 0x322   : > { %v12036_v44 = vadd.f32 %v9016_v56, %v5313_v9  ;;  %v9030_v16 = vadd.f32 %v4988_v12, %v4176_v21  ;;  %v5312_v61 = vmul.f32 %v5247_v30, %v13109_v63  ;;  %13113 = vst [vmem:[#allocation15_spill] sm:$0xff] %v12046_v25  ;;  %v13116_v56 = vld [vmem:[#allocation47_spill] sm:$0xff] }
 0x323   : > { %v12039_v46 = vadd.f32 %v9023_v3, %v5311_v28  ;;  %v9037_v62 = vadd.f32 %v4986_v8, %v4174_v2  ;;  %v4179_v9 = vmul.f32 %v13116_v56, %v13115_v4  ;;  %v13118_v2 = vld [vmem:[#allocation55_spill] sm:$0xff]  ;;  %v13119_v8 = vld [vmem:[#allocation57_spill] sm:$0xff] }
 0x324   : > { %v12044_v40 = vadd.f32 %v9030_v16, %v5314_v53  ;;  %v4177_v38 = vmul.f32 %v13118_v2, %v13117_v11  ;;  %v13120_v53 = vld [vmem:[#allocation50_spill] sm:$0xff] }
 0x325   : > { %13110 = vst [vmem:[#allocation29_spill] sm:$0xff] %v12039_v46  ;;  %v12048_v18 = vadd.f32 %v9037_v62, %v5312_v61  ;;  %v8470_v10 = vpop.f32.mrb[136].mxu1  ;;  %v4180_v63 = vmul.f32 %v13120_v53, %v13119_v8  ;;  %v12070_v53 = vpop.permute.xlu1 %4962 }
 0x326   : > { %13112 = vst [vmem:[#allocation26_spill] sm:$0xff] %v12044_v40  ;;  %v4991_v12 = vmul.f32 %v8470_v10, %v12018_v54  ;;  %v8504_v21 = vpop.f32.mrb[200].mxu0  ;;  %v4742_v3 = vpop.f32.mrb[137].mxu1  ;;  %v13121_v10 = vld [vmem:[#allocation6_spill] sm:$0xff]  ;;  %v13122_v54 = vld [vmem:[#allocation52_spill] sm:$0xff]  ;;  %13124 = vst [vmem:[#allocation10_spill] sm:$0xff] %v12070_v53 }
 0x327   : > { %13114 = vst [vmem:[#allocation11_spill] sm:$0xff] %v12048_v18  ;;  %v4989_v30 = vmul.f32 %v11988_v39, %v4742_v3  ;;  %v5260_v28 = vpop.f32.mrb[201].mxu0  ;;  %v8471_v16 = vpop.f32.mrb[138].mxu1  ;;  %v5317_v61 = vmul.f32 %v8504_v21, %v13115_v4  ;;  %v4178_v18 = vmul.f32 %v13122_v54, %v13121_v10 }
 0x328   : > { %v9044_v62 = vadd.f32 %v4991_v12, %v4179_v9  ;;  %v4992_v24 = vmul.f32 %v8471_v16, %v12014_v0  ;;  %v8505_v56 = vpop.f32.mrb[202].mxu0  ;;  %v4745_v50 = vpop.f32.mrb[139].mxu1  ;;  %v5315_v11 = vmul.f32 %v5260_v28, %v13118_v2  ;;  %v13128_v28 = vld [vmem:[#allocation41_spill] sm:$0xff] }
 0x329   : > { %v9051_v40 = vadd.f32 %v4989_v30, %v4177_v38  ;;  %v4990_v3 = vmul.f32 %v11981_v51, %v4745_v50  ;;  %v5263_v39 = vpop.f32.mrb[203].mxu0  ;;  %v5318_v9 = vmul.f32 %v8505_v56, %v13119_v8  ;;  %v12074_v38 = vpop.permute.xlu0 %4957  ;;  %v13130_v56 = vld [vmem:[#allocation30_spill] sm:$0xff] }
 0x32a   : > { %v12064_v20 = vadd.f32 %v9044_v62, %v5317_v61  ;;  %v9058_v46 = vadd.f32 %v4992_v24, %v4180_v63  ;;  %v5316_v16 = vmul.f32 %v5263_v39, %v13122_v54  ;;  %13126 = vst [vmem:[#allocation6_spill] sm:$0xff] %v12074_v38  ;;  %v13129_v62 = vld [vmem:[#allocation5_spill] sm:$0xff] }
 0x32b   : > { %v12067_v12 = vadd.f32 %v9051_v40, %v5315_v11  ;;  %v9065_v21 = vadd.f32 %v4990_v3, %v4178_v18  ;;  %v4183_v61 = vmul.f32 %v13129_v62, %v13128_v28  ;;  %v13131_v18 = vld [vmem:[#allocation65_spill] sm:$0xff] }
 0x32c   : > { %v12072_v4 = vadd.f32 %v9058_v46, %v5318_v9  ;;  %v4181_v10 = vmul.f32 %v13131_v18, %v13130_v56  ;;  %v13132_v3 = vld [vmem:[#allocation61_spill] sm:$0xff] }
 0x32d   : > { %13123 = vst [vmem:[#allocation47_spill] sm:$0xff] %v12067_v12  ;;  %v12076_v30 = vadd.f32 %v9065_v21, %v5316_v16  ;;  %v8474_v50 = vpop.f32.mrb[140].mxu1  ;;  %v13133_v9 = vld [vmem:[#allocation17_spill] sm:$0xff] }
 0x32e   : > { %13125 = vst [vmem:[#allocation50_spill] sm:$0xff] %v12072_v4  ;;  %v4995_v63 = vmul.f32 %v8474_v50, %v12074_v38  ;;  %v8508_v24 = vpop.f32.mrb[204].mxu0  ;;  %v4758_v40 = vpop.f32.mrb[141].mxu1  ;;  %v4184_v54 = vmul.f32 %v13133_v9, %v13132_v3  ;;  %v13134_v50 = vld [vmem:[#allocation59_spill] sm:$0xff]  ;;  %v13135_v38 = vld [vmem:[#allocation21_spill] sm:$0xff] }
 0x32f   : > { %13127 = vst [vmem:[#allocation70_spill] sm:$0xff] %v12076_v30  ;;  %v4993_v39 = vmul.f32 %v12046_v25, %v4758_v40  ;;  %v5276_v11 = vpop.f32.mrb[205].mxu0  ;;  %v8475_v46 = vpop.f32.mrb[142].mxu1  ;;  %v5321_v16 = vmul.f32 %v8508_v24, %v13128_v28  ;;  %v4182_v30 = vmul.f32 %v13135_v38, %v13134_v50 }
 0x330   : > { %v9072_v21 = vadd.f32 %v4995_v63, %v4183_v61  ;;  %v4996_v8 = vmul.f32 %v8475_v46, %v12070_v53  ;;  %v8509_v62 = vpop.f32.mrb[206].mxu0  ;;  %v4761_v2 = vpop.f32.mrb[143].mxu1  ;;  %v5319_v56 = vmul.f32 %v5276_v11, %v13131_v18 }
 0x331   : > { %v9079_v4 = vadd.f32 %v4993_v39, %v4181_v10  ;;  %v4994_v40 = vmul.f32 %v12042_v15, %v4761_v2  ;;  %v5279_v25 = vpop.f32.mrb[207].mxu0  ;;  %v5322_v61 = vmul.f32 %v8509_v62, %v13132_v3  ;;  %v13136_v39 = vld [vmem:[#allocation34_spill] sm:$0xff] }
 0x332   : > { %v12092_v51 = vadd.f32 %v9072_v21, %v5321_v16  ;;  %v9086_v12 = vadd.f32 %v4996_v8, %v4184_v54  ;;  %v5320_v46 = vmul.f32 %v5279_v25, %v13135_v38 }
 0x333   : > { %v12095_v63 = vadd.f32 %v9079_v4, %v5319_v56  ;;  %v9093_v24 = vadd.f32 %v4994_v40, %v4182_v30 }
 0x334   : > { %v12098_v9 = vadd.f32 %v9086_v12, %v5322_v61 }
 0x335   : > { %v12100_v28 = vadd.f32 %v9093_v24, %v5320_v46  ;;  %v8548_v10 = vpop.f32.mrb[144].mxu1 }
 0x336   : > { %v5913_v11 = vmul.f32 %v8548_v10, %v13136_v39  ;;  %v5784_v50 = vpop.f32.mrb[145].mxu1 }
 0x337   : > { %v5911_v2 = vmul.f32 %v5784_v50, %v11706_v42  ;;  %v8549_v21 = vpop.f32.mrb[146].mxu1 }
 0x338   : > { %v12105_v54 = vadd.f32 %v11859_v6, %v5913_v11  ;;  %v5914_v4 = vmul.f32 %v8549_v21, %v11716_v34  ;;  %v5787_v8 = vpop.f32.mrb[147].mxu1 }
 0x339   : > { %v12109_v30 = vadd.f32 %v11864_v57, %v5911_v2  ;;  %v5912_v25 = vmul.f32 %v5787_v8, %v11702_v37 }
 0x33a   : > { %v12113_v12 = vadd.f32 %v11873_v23, %v5914_v4 }
 0x33b   : > { %v12116_v16 = vadd.f32 %v11881_v14, %v5912_v25 }
 0x33d   : > { %v8552_v62 = vpop.f32.mrb[148].mxu1 }
 0x33e   : > { %v5917_v56 = vmul.f32 %v8552_v62, %v11756_v31  ;;  %v5800_v40 = vpop.f32.mrb[149].mxu1 }
 0x33f   : > { %v5915_v6 = vmul.f32 %v5800_v40, %v11738_v55  ;;  %v8553_v61 = vpop.f32.mrb[150].mxu1 }
 0x340   : > { %v12121_v24 = vadd.f32 %v11897_v36, %v5917_v56  ;;  %v5918_v57 = vmul.f32 %v8553_v61, %v11752_v49  ;;  %v5803_v46 = vpop.f32.mrb[151].mxu1 }
 0x341   : > { %v12125_v10 = vadd.f32 %v11902_v45, %v5915_v6  ;;  %v5916_v23 = vmul.f32 %v5803_v46, %v11734_v19 }
 0x342   : > { %v12129_v14 = vadd.f32 %v11911_v7, %v5918_v57 }
 0x343   : > { %v12132_v11 = vadd.f32 %v11919_v35, %v5916_v23 }
 0x345   : > { %v8556_v50 = vpop.f32.mrb[152].mxu1 }
 0x346   : > { %v5921_v2 = vmul.f32 %v8556_v50, %v11787_v59  ;;  %v5816_v21 = vpop.f32.mrb[153].mxu1 }
 0x347   : > { %v5919_v36 = vmul.f32 %v5816_v21, %v11771_v32  ;;  %v8557_v4 = vpop.f32.mrb[154].mxu1 }
 0x348   : > { %v12137_v8 = vadd.f32 %v11935_v60, %v5921_v2  ;;  %v5922_v45 = vmul.f32 %v8557_v4, %v11783_v43  ;;  %v5819_v25 = vpop.f32.mrb[155].mxu1 }
 0x349   : > { %v12141_v62 = vadd.f32 %v11939_v47, %v5919_v36  ;;  %v5920_v7 = vmul.f32 %v5819_v25, %v11766_v5  ;;  %v13139_v36 = vld [vmem:[#allocation69_spill] sm:$0xff]  ;;  %v13140_v25 = vld [vmem:[#allocation68_spill] sm:$0xff] }
 0x34a   : > { %v12145_v35 = vadd.f32 %v11947_v1, %v5922_v45  ;;  %v13137_v1 = vld [vmem:[#allocation12_spill] sm:$0xff] }
 0x34b   : > { %v12148_v56 = vadd.f32 %v11955_v22, %v5920_v7  ;;  %v13138_v22 = vld [vmem:[#allocation24_spill] sm:$0xff] }
 0x34d   : > { %v8560_v40 = vpop.f32.mrb[156].mxu1 }
 0x34e   : > { %v5925_v6 = vmul.f32 %v8560_v40, %v11825_v13  ;;  %v5832_v61 = vpop.f32.mrb[157].mxu1 }
 0x34f   : > { %v5923_v60 = vmul.f32 %v5832_v61, %v11807_v29  ;;  %v8561_v57 = vpop.f32.mrb[158].mxu1 }
 0x350   : > { %v12153_v46 = vadd.f32 %v11971_v26, %v5925_v6  ;;  %v5926_v47 = vmul.f32 %v8561_v57, %v11821_v58  ;;  %v5835_v23 = vpop.f32.mrb[159].mxu1  ;;  %v13141_v26 = vld [vmem:[#allocation60_spill] sm:$0xff] }
 0x351   : > { %v12157_v50 = vadd.f32 %v11975_v48, %v5923_v60  ;;  %v5924_v2 = vmul.f32 %v5835_v23, %v13137_v1 }
 0x352   : > { %v12161_v21 = vadd.f32 %v13138_v22, %v5926_v47 }
 0x353   : > { %v12164_v4 = vadd.f32 %v13139_v36, %v5924_v2  ;;  %v13142_v2 = vld [vmem:[#allocation18_spill] sm:$0xff]  ;;  %v13143_v36 = vld [vmem:[#allocation20_spill] sm:$0xff] }
 0x355   : > { %v8564_v45 = vpop.f32.mrb[160].mxu1 }
 0x356   : > { %v5929_v7 = vmul.f32 %v8564_v45, %v13140_v25  ;;  %v5848_v40 = vpop.f32.mrb[161].mxu1 }
 0x357   : > { %v5927_v6 = vmul.f32 %v5848_v40, %v13141_v26  ;;  %v8565_v61 = vpop.f32.mrb[162].mxu1  ;;  %v13144_v40 = vld [vmem:[#allocation49_spill] sm:$0xff] }
 0x358   : > { %v12169_v57 = vadd.f32 %v12006_v27, %v5929_v7  ;;  %v5930_v48 = vmul.f32 %v8565_v61, %v11871_v52  ;;  %v5851_v60 = vpop.f32.mrb[163].mxu1  ;;  %v13145_v27 = vld [vmem:[#allocation31_spill] sm:$0xff] }
 0x359   : > { %v12173_v23 = vadd.f32 %v12010_v17, %v5927_v6  ;;  %v5928_v47 = vmul.f32 %v5851_v60, %v13098_v33  ;;  %v13146_v60 = vld [vmem:[#allocation29_spill] sm:$0xff]  ;;  %v13149_v52 = vld [vmem:[#allocation11_spill] sm:$0xff] }
 0x35a   : > { %v12177_v22 = vadd.f32 %v13142_v2, %v5930_v48  ;;  %v13147_v48 = vld [vmem:[#allocation63_spill] sm:$0xff] }
 0x35b   : > { %v12180_v45 = vadd.f32 %v13143_v36, %v5928_v47  ;;  %v13148_v47 = vld [vmem:[#allocation26_spill] sm:$0xff] }
 0x35d   : > { %v8568_v25 = vpop.f32.mrb[164].mxu1 }
 0x35e   : > { %v5933_v26 = vmul.f32 %v8568_v25, %v13144_v40  ;;  %v5864_v1 = vpop.f32.mrb[165].mxu1 }
 0x35f   : > { %v5931_v7 = vmul.f32 %v5864_v1, %v13145_v27  ;;  %v8569_v58 = vpop.f32.mrb[166].mxu1  ;;  %v13150_v1 = vld [vmem:[#allocation23_spill] sm:$0xff] }
 0x360   : > { %v12185_v61 = vadd.f32 %v12036_v44, %v5933_v26  ;;  %v5934_v17 = vmul.f32 %v8569_v58, %v11945_v41  ;;  %v5867_v6 = vpop.f32.mrb[167].mxu1  ;;  %v13151_v44 = vld [vmem:[#allocation7_spill] sm:$0xff]  ;;  %v13155_v41 = vld [vmem:[#allocation70_spill] sm:$0xff] }
 0x361   : > { %v12189_v33 = vadd.f32 %v13146_v60, %v5931_v7  ;;  %v5932_v2 = vmul.f32 %v5867_v6, %v13147_v48  ;;  %v13152_v6 = vld [vmem:[#allocation47_spill] sm:$0xff] }
 0x362   : > { %v12193_v36 = vadd.f32 %v13148_v47, %v5934_v17  ;;  %v13153_v17 = vld [vmem:[#allocation38_spill] sm:$0xff] }
 0x363   : > { %v12196_v25 = vadd.f32 %v13149_v52, %v5932_v2  ;;  %v13154_v52 = vld [vmem:[#allocation50_spill] sm:$0xff] }
 0x365   : > { %v8572_v40 = vpop.f32.mrb[168].mxu1 }
 0x366   : > { %v5937_v27 = vmul.f32 %v8572_v40, %v13150_v1  ;;  %v5880_v29 = vpop.f32.mrb[169].mxu1 }
 0x367   : > { %v5935_v26 = vmul.f32 %v5880_v29, %v13151_v44  ;;  %v8573_v13 = vpop.f32.mrb[170].mxu1  ;;  %v13156_v29 = vld [vmem:[#allocation6_spill] sm:$0xff] }
 0x368   : > { %v12201_v58 = vadd.f32 %v12064_v20, %v5937_v27  ;;  %v5938_v7 = vmul.f32 %v8573_v13, %v12014_v0  ;;  %v5883_v60 = vpop.f32.mrb[171].mxu1  ;;  %v13157_v20 = vld [vmem:[#allocation15_spill] sm:$0xff] }
 0x369   : > { %v12205_v48 = vadd.f32 %v13152_v6, %v5935_v26  ;;  %v5936_v47 = vmul.f32 %v5883_v60, %v13153_v17 }
 0x36a   : > { %v12209_v2 = vadd.f32 %v13154_v52, %v5938_v7 }
 0x36b   : > { %v12212_v40 = vadd.f32 %v13155_v41, %v5936_v47 }
 0x36d   : > { %v8576_v1 = vpop.f32.mrb[172].mxu1 }
 0x36e   : > { %v5941_v44 = vmul.f32 %v8576_v1, %v13156_v29  ;;  %v5896_v5 = vpop.f32.mrb[173].mxu1 }
 0x36f   : > { %v5939_v27 = vmul.f32 %v5896_v5, %v13157_v20  ;;  %v8577_v43 = vpop.f32.mrb[174].mxu1  ;;  %v13158_v5 = vld [vmem:[#allocation66_spill] sm:$0xff] }
 0x370   : > { %v12217_v13 = vadd.f32 %v12092_v51, %v5941_v44  ;;  %v5942_v26 = vmul.f32 %v8577_v43, %v12070_v53  ;;  %v5899_v6 = vpop.f32.mrb[175].mxu1  ;;  %v13159_v51 = vld [vmem:[#allocation25_spill] sm:$0xff] }
 0x371   : > { %v12221_v60 = vadd.f32 %v12095_v63, %v5939_v27  ;;  %v5940_v7 = vmul.f32 %v5899_v6, %v12042_v15  ;;  %v13160_v63 = vld [vmem:[#allocation62_spill] sm:$0xff] }
 0x372   : > { %v12225_v41 = vadd.f32 %v12098_v9, %v5942_v26  ;;  %v13161_v9 = vld [vmem:[#allocation58_spill] sm:$0xff] }
 0x373   : > { %v12228_v1 = vadd.f32 %v12100_v28, %v5940_v7 }
 0x375   : > { %v8582_v47 = vpop.f32.mrb[176].mxu1 }
 0x376   : > { %v6239_v52 = vmul.f32 %v8582_v47, %v13158_v5  ;;  %v6110_v20 = vpop.f32.mrb[177].mxu1 }
 0x377   : > { %v6237_v44 = vmul.f32 %v6110_v20, %v13159_v51  ;;  %v8583_v29 = vpop.f32.mrb[178].mxu1  ;;  %v13162_v20 = vld [vmem:[#allocation32_spill] sm:$0xff] }
 0x378   : > { %v12233_v43 = vadd.f32 %v12105_v54, %v6239_v52  ;;  %v6240_v27 = vmul.f32 %v8583_v29, %v13160_v63  ;;  %v6113_v53 = vpop.f32.mrb[179].mxu1  ;;  %v13163_v54 = vld [vmem:[#allocation54_spill] sm:$0xff] }
 0x379   : > { %v12237_v6 = vadd.f32 %v12109_v30, %v6237_v44  ;;  %v6238_v26 = vmul.f32 %v6113_v53, %v13161_v9  ;;  %v13164_v30 = vld [vmem:[#allocation33_spill] sm:$0xff] }
 0x37a   : > { %v12241_v28 = vadd.f32 %v12113_v12, %v6240_v27  ;;  %v13165_v12 = vld [vmem:[#allocation67_spill] sm:$0xff] }
 0x37b   : > { %v12244_v7 = vadd.f32 %v12116_v16, %v6238_v26 }
 0x37d   : > { %v8586_v47 = vpop.f32.mrb[180].mxu1 }
 0x37e   : > { %v6243_v5 = vmul.f32 %v8586_v47, %v13162_v20  ;;  %v6126_v51 = vpop.f32.mrb[181].mxu1  ;;  %v13166_v47 = vld [vmem:[#allocation45_spill] sm:$0xff] }
 0x37f   : > { %v6241_v52 = vmul.f32 %v6126_v51, %v13163_v54  ;;  %v8587_v15 = vpop.f32.mrb[182].mxu1 }
 0x380   : > { %v12249_v29 = vadd.f32 %v12121_v24, %v6243_v5  ;;  %v6244_v44 = vmul.f32 %v8587_v15, %v13164_v30  ;;  %v6129_v63 = vpop.f32.mrb[183].mxu1  ;;  %v13167_v24 = vld [vmem:[#allocation39_spill] sm:$0xff] }
 0x381   : > { %v12253_v53 = vadd.f32 %v12125_v10, %v6241_v52  ;;  %v6242_v27 = vmul.f32 %v6129_v63, %v13165_v12  ;;  %v13168_v10 = vld [vmem:[#allocation44_spill] sm:$0xff] }
 0x382   : > { %v12257_v16 = vadd.f32 %v12129_v14, %v6244_v44  ;;  %v13169_v14 = vld [vmem:[#allocation35_spill] sm:$0xff] }
 0x383   : > { %v12260_v9 = vadd.f32 %v12132_v11, %v6242_v27 }
 0x385   : > { %v8590_v26 = vpop.f32.mrb[184].mxu1 }
 0x386   : > { %v6247_v20 = vmul.f32 %v8590_v26, %v13166_v47  ;;  %v6142_v51 = vpop.f32.mrb[185].mxu1  ;;  %v13170_v26 = vld [vmem:[#allocation19_spill] sm:$0xff] }
 0x387   : > { %v6245_v5 = vmul.f32 %v6142_v51, %v13167_v24  ;;  %v8591_v54 = vpop.f32.mrb[186].mxu1 }
 0x388   : > { %v12265_v15 = vadd.f32 %v12137_v8, %v6247_v20  ;;  %v6248_v52 = vmul.f32 %v8591_v54, %v13168_v10  ;;  %v6145_v30 = vpop.f32.mrb[187].mxu1  ;;  %v13171_v8 = vld [vmem:[#allocation40_spill] sm:$0xff] }
 0x389   : > { %v12269_v63 = vadd.f32 %v12141_v62, %v6245_v5  ;;  %v6246_v44 = vmul.f32 %v6145_v30, %v13169_v14  ;;  %v13172_v62 = vld [vmem:[#allocation22_spill] sm:$0xff] }
 0x38a   : > { %v12273_v11 = vadd.f32 %v12145_v35, %v6248_v52  ;;  %v13173_v35 = vld [vmem:[#allocation46_spill] sm:$0xff] }
 0x38b   : > { %v12276_v12 = vadd.f32 %v12148_v56, %v6246_v44 }
 0x38d   : > { %v8594_v27 = vpop.f32.mrb[188].mxu1 }
 0x38e   : > { %v6251_v47 = vmul.f32 %v8594_v27, %v13170_v26  ;;  %v6158_v51 = vpop.f32.mrb[189].mxu1  ;;  %v13174_v27 = vld [vmem:[#allocation37_spill] sm:$0xff] }
 0x38f   : > { %v6249_v20 = vmul.f32 %v6158_v51, %v13171_v8  ;;  %v8595_v24 = vpop.f32.mrb[190].mxu1 }
 0x390   : > { %v12281_v54 = vadd.f32 %v12153_v46, %v6251_v47  ;;  %v6252_v5 = vmul.f32 %v8595_v24, %v13172_v62  ;;  %v6161_v10 = vpop.f32.mrb[191].mxu1  ;;  %v13175_v46 = vld [vmem:[#allocation4_spill] sm:$0xff] }
 0x391   : > { %v12285_v30 = vadd.f32 %v12157_v50, %v6249_v20  ;;  %v6250_v52 = vmul.f32 %v6161_v10, %v13173_v35  ;;  %v13176_v50 = vld [vmem:[#allocation3_spill] sm:$0xff] }
 0x392   : > { %v12289_v56 = vadd.f32 %v12161_v21, %v6252_v5  ;;  %v13177_v21 = vld [vmem:[#allocation8_spill] sm:$0xff] }
 0x393   : > { %v12292_v14 = vadd.f32 %v12164_v4, %v6250_v52 }
 0x395   : > { %v8598_v44 = vpop.f32.mrb[192].mxu1 }
 0x396   : > { %v6255_v26 = vmul.f32 %v8598_v44, %v13174_v27  ;;  %v6174_v51 = vpop.f32.mrb[193].mxu1  ;;  %v13178_v44 = vld [vmem:[#allocation13_spill] sm:$0xff] }
 0x397   : > { %v6253_v47 = vmul.f32 %v6174_v51, %v13175_v46  ;;  %v8599_v8 = vpop.f32.mrb[194].mxu1 }
 0x398   : > { %v12297_v24 = vadd.f32 %v12169_v57, %v6255_v26  ;;  %v6256_v20 = vmul.f32 %v8599_v8, %v13176_v50  ;;  %v6177_v62 = vpop.f32.mrb[195].mxu1  ;;  %v13179_v57 = vld [vmem:[#allocation36_spill] sm:$0xff] }
 0x399   : > { %v12301_v10 = vadd.f32 %v12173_v23, %v6253_v47  ;;  %v6254_v5 = vmul.f32 %v6177_v62, %v13177_v21  ;;  %v13180_v23 = vld [vmem:[#allocation51_spill] sm:$0xff] }
 0x39a   : > { %v12305_v4 = vadd.f32 %v12177_v22, %v6256_v20  ;;  %v13181_v22 = vld [vmem:[#allocation16_spill] sm:$0xff] }
 0x39b   : > { %v12308_v35 = vadd.f32 %v12180_v45, %v6254_v5 }
 0x39d   : > { %v8602_v52 = vpop.f32.mrb[196].mxu1 }
 0x39e   : > { %v6259_v27 = vmul.f32 %v8602_v52, %v13178_v44  ;;  %v6190_v51 = vpop.f32.mrb[197].mxu1  ;;  %v13182_v52 = vld [vmem:[#allocation48_spill] sm:$0xff] }
 0x39f   : > { %v6257_v26 = vmul.f32 %v6190_v51, %v13179_v57  ;;  %v8603_v46 = vpop.f32.mrb[198].mxu1 }
 0x3a0   : > { %v12313_v8 = vadd.f32 %v12185_v61, %v6259_v27  ;;  %v6260_v47 = vmul.f32 %v8603_v46, %v13180_v23  ;;  %v6193_v50 = vpop.f32.mrb[199].mxu1  ;;  %v13183_v61 = vld [vmem:[#allocation55_spill] sm:$0xff] }
 0x3a1   : > { %v12317_v62 = vadd.f32 %v12189_v33, %v6257_v26  ;;  %v6258_v20 = vmul.f32 %v6193_v50, %v13181_v22  ;;  %v13184_v33 = vld [vmem:[#allocation57_spill] sm:$0xff] }
 0x3a2   : > { %v12321_v45 = vadd.f32 %v12193_v36, %v6260_v47  ;;  %v13185_v36 = vld [vmem:[#allocation52_spill] sm:$0xff] }
 0x3a3   : > { %v12324_v21 = vadd.f32 %v12196_v25, %v6258_v20 }
 0x3a5   : > { %v8606_v5 = vpop.f32.mrb[200].mxu1 }
 0x3a6   : > { %v6263_v44 = vmul.f32 %v8606_v5, %v13182_v52  ;;  %v6206_v51 = vpop.f32.mrb[201].mxu1  ;;  %v13186_v5 = vld [vmem:[#allocation41_spill] sm:$0xff] }
 0x3a7   : > { %v6261_v27 = vmul.f32 %v6206_v51, %v13183_v61  ;;  %v8607_v57 = vpop.f32.mrb[202].mxu1 }
 0x3a8   : > { %v12329_v46 = vadd.f32 %v12201_v58, %v6263_v44  ;;  %v6264_v26 = vmul.f32 %v8607_v57, %v13184_v33  ;;  %v6209_v23 = vpop.f32.mrb[203].mxu1 }
 0x3a9   : > { %v12333_v50 = vadd.f32 %v12205_v48, %v6261_v27  ;;  %v6262_v47 = vmul.f32 %v6209_v23, %v13185_v36 }
 0x3aa   : > { %v12337_v25 = vadd.f32 %v12209_v2, %v6264_v26 }
 0x3ab   : > { %v12340_v22 = vadd.f32 %v12212_v40, %v6262_v47 }
 0x3ad   : > { %v8610_v20 = vpop.f32.mrb[204].mxu1 }
 0x3ae   : > { %v6267_v52 = vmul.f32 %v8610_v20, %v13186_v5  ;;  %v6222_v51 = vpop.f32.mrb[205].mxu1 }
 0x3af   : > { %v6265_v58 = vmul.f32 %v6222_v51, %v13131_v18  ;;  %v8611_v44 = vpop.f32.mrb[206].mxu1 }
 0x3b0   : > { %v12345_v61 = vadd.f32 %v12217_v13, %v6267_v52  ;;  %v6268_v48 = vmul.f32 %v8611_v44, %v13132_v3  ;;  %v6225_v27 = vpop.f32.mrb[207].mxu1  ;;  %v12362_v3 = vld [vmem:[%s12574_s5] ss:$0 sm:$0xff] }
 0x3b1   : > { %v12349_v57 = vadd.f32 %v12221_v60, %v6265_v58  ;;  %v6266_v2 = vmul.f32 %v6225_v27, %v13135_v38 }
 0x3b2   : > { %v12353_v40 = vadd.f32 %v12225_v41, %v6268_v48 }
 0x3b3   : > { %v12356_v33 = vadd.f32 %v12228_v1, %v6266_v2 }
 0x3b5   : > { %v8650_v26 = vpop.f32.mrb[208].mxu1 }
 0x3b6   : > { %v6859_v18 = vmul.f32 %v8650_v26, %v13136_v39  ;;  %v8684_v23 = vpop.f32.mrb[144].mxu0  ;;  %v6730_v13 = vpop.f32.mrb[209].mxu1 }
 0x3b7   : > { %v6857_v60 = vmul.f32 %v6730_v13, %v11706_v42  ;;  %v7094_v38 = vpop.f32.mrb[145].mxu0  ;;  %v8651_v36 = vpop.f32.mrb[210].mxu1  ;;  %v12374_v42 = vld [vmem:[%s12575_s6] ss:$0 sm:$0xff] }
 0x3b8   : > { %v8880_v41 = vadd.f32 %v12233_v43, %v6859_v18  ;;  %v6860_v1 = vmul.f32 %v8651_v36, %v11716_v34  ;;  %v8685_v47 = vpop.f32.mrb[146].mxu0  ;;  %v6733_v20 = vpop.f32.mrb[211].mxu1 }
 0x3b9   : > { %v8887_v39 = vadd.f32 %v12237_v6, %v6857_v60  ;;  %v6858_v5 = vmul.f32 %v6733_v20, %v11702_v37  ;;  %v7097_v52 = vpop.f32.mrb[147].mxu0 }
 0x3ba   : > { %v8881_v51 = vadd.f32 %v8880_v41, %v12362_v3  ;;  %v8894_v58 = vadd.f32 %v12241_v28, %v6860_v1 }
 0x3bb   : > { %v8888_v43 = vadd.f32 %v8887_v39, %v12362_v3  ;;  %v8901_v34 = vadd.f32 %v12244_v7, %v6858_v5 }
 0x3bc   : > { %v8882_v44 = vadd.f32 %v8881_v51, %v8684_v23  ;;  %v8895_v6 = vadd.f32 %v8894_v58, %v12362_v3 }
 0x3bd   : > { %v8889_v48 = vadd.f32 %v8888_v43, %v7094_v38  ;;  %v8902_v37 = vadd.f32 %v8901_v34, %v12362_v3  ;;  %v8654_v27 = vpop.f32.mrb[212].mxu1 }
 0x3be   : > { %v7262_v2 = vadd.f32 %v8882_v44, %v12374_v42  ;;  %v8896_v28 = vadd.f32 %v8895_v6, %v8685_v47  ;;  %v6863_v26 = vmul.f32 %v8654_v27, %v11756_v31  ;;  %v8688_v18 = vpop.f32.mrb[148].mxu0  ;;  %v6746_v13 = vpop.f32.mrb[213].mxu1 }
 0x3bf   : > { %v7260_v7 = vadd.f32 %v8889_v48, %v12374_v42  ;;  %v8903_v23 = vadd.f32 %v8902_v37, %v7097_v52  ;;  %v6861_v60 = vmul.f32 %v6746_v13, %v11738_v55  ;;  %v7110_v38 = vpop.f32.mrb[149].mxu0  ;;  %v8655_v36 = vpop.f32.mrb[214].mxu1 }
 0x3c0   : > { %v7294_v41 = vmax.f32 %v7262_v2, 0.0  ;;  %v7263_v1 = vadd.f32 %v8896_v28, %v12374_v42  ;;  %v8908_v31 = vadd.f32 %v12249_v29, %v6863_v26  ;;  %v6864_v47 = vmul.f32 %v8655_v36, %v11752_v49  ;;  %v8689_v20 = vpop.f32.mrb[150].mxu0  ;;  %v6749_v39 = vpop.f32.mrb[215].mxu1 }
 0x3c1   : > { %v7292_v5 = vmax.f32 %v7260_v7, 0.0  ;;  %v7261_v51 = vadd.f32 %v8903_v23, %v12374_v42  ;;  %v8915_v52 = vadd.f32 %v12253_v53, %v6861_v60  ;;  %v6862_v55 = vmul.f32 %v6749_v39, %v11734_v19  ;;  %v7113_v58 = vpop.f32.mrb[151].mxu0 }
 0x3c2   : > { %7326 = vst.msk [vmem:[%s12386_s18 + $0x10] sm:$0xff] %vm3628_vm3, %v7294_v41  ;;  %v7295_v43 = vmax.f32 %v7263_v1, 0.0  ;;  %v8909_v34 = vadd.f32 %v8908_v31, %v12362_v3  ;;  %v8922_v29 = vadd.f32 %v12257_v16, %v6864_v47  ;;  %v13187_v1 = vld [vmem:[#allocation14_spill] sm:$0xff] }
 0x3c3   : > { %7324 = vst.msk [vmem:[%s12386_s18] sm:$0xff] %vm3628_vm3, %v7292_v5  ;;  %v7293_v49 = vmax.f32 %v7261_v51, 0.0  ;;  %v8916_v44 = vadd.f32 %v8915_v52, %v12362_v3  ;;  %v8929_v6 = vadd.f32 %v12260_v9, %v6862_v55 }
 0x3c4   : > { %7327 = vst.msk [vmem:[%s12386_s18 + $0x18] sm:$0xff] %vm3628_vm3, %v7295_v43  ;;  %v8910_v53 = vadd.f32 %v8909_v34, %v8688_v18  ;;  %v8923_v19 = vadd.f32 %v8922_v29, %v12362_v3 }
 0x3c5   : > { %7325 = vst.msk [vmem:[%s12386_s18 + $0x8] sm:$0xff] %vm3628_vm3, %v7293_v49  ;;  %v8917_v48 = vadd.f32 %v8916_v44, %v7110_v38  ;;  %v8930_v37 = vadd.f32 %v8929_v6, %v12362_v3  ;;  %v8658_v27 = vpop.f32.mrb[216].mxu1 }
 0x3c6   : > { %v7266_v16 = vadd.f32 %v8910_v53, %v12374_v42  ;;  %v8924_v2 = vadd.f32 %v8923_v19, %v8689_v20  ;;  %v6867_v28 = vmul.f32 %v8658_v27, %v11787_v59  ;;  %v8692_v26 = vpop.f32.mrb[152].mxu0  ;;  %v6762_v13 = vpop.f32.mrb[217].mxu1 }
 0x3c7   : > { %v7264_v9 = vadd.f32 %v8917_v48, %v12374_v42  ;;  %v8931_v7 = vadd.f32 %v8930_v37, %v7113_v58  ;;  %v6865_v18 = vmul.f32 %v6762_v13, %v11771_v32  ;;  %v7126_v23 = vpop.f32.mrb[153].mxu0  ;;  %v8659_v60 = vpop.f32.mrb[218].mxu1  ;;  %v13188_v32 = vld [vmem:[#allocation27_spill] sm:$0xff]  ;;  %v13189_v48 = vld [vmem:[#allocation42_spill] sm:$0xff] }
 0x3c8   : > { %v7298_v38 = vmax.f32 %v7266_v16, 0.0  ;;  %v7267_v36 = vadd.f32 %v8924_v2, %v12374_v42  ;;  %v8936_v41 = vadd.f32 %v12265_v15, %v6867_v28  ;;  %v6868_v31 = vmul.f32 %v8659_v60, %v13187_v1  ;;  %v8693_v59 = vpop.f32.mrb[154].mxu0  ;;  %v6765_v47 = vpop.f32.mrb[219].mxu1  ;;  %v13190_v28 = vld [vmem:[#allocation9_spill] sm:$0xff]  ;;  %v13191_v60 = vld [vmem:[#allocation43_spill] sm:$0xff] }
 0x3c9   : > { %v7296_v20 = vmax.f32 %v7264_v9, 0.0  ;;  %v7265_v39 = vadd.f32 %v8931_v7, %v12374_v42  ;;  %v8943_v5 = vadd.f32 %v12269_v63, %v6865_v18  ;;  %v6866_v51 = vmul.f32 %v6765_v47, %v13188_v32  ;;  %v7129_v52 = vpop.f32.mrb[155].mxu0  ;;  %v13192_v47 = vld [vmem:[#allocation12_spill] sm:$0xff] }
 0x3ca   : > { %7330 = vst.msk [vmem:[%s12386_s18 + $0x30] sm:$0xff] %vm3628_vm3, %v7298_v38  ;;  %v7299_v55 = vmax.f32 %v7267_v36, 0.0  ;;  %v8937_v58 = vadd.f32 %v8936_v41, %v12362_v3  ;;  %v8950_v15 = vadd.f32 %v12273_v11, %v6868_v31 }
 0x3cb   : > { %7328 = vst.msk [vmem:[%s12386_s18 + $0x20] sm:$0xff] %vm3628_vm3, %v7296_v20  ;;  %v7297_v43 = vmax.f32 %v7265_v39, 0.0  ;;  %v8944_v34 = vadd.f32 %v8943_v5, %v12362_v3  ;;  %v8957_v29 = vadd.f32 %v12276_v12, %v6866_v51 }
 0x3cc   : > { %7331 = vst.msk [vmem:[%s12386_s18 + $0x38] sm:$0xff] %vm3628_vm3, %v7299_v55  ;;  %v8938_v63 = vadd.f32 %v8937_v58, %v8692_v26  ;;  %v8951_v49 = vadd.f32 %v8950_v15, %v12362_v3 }
 0x3cd   : > { %7329 = vst.msk [vmem:[%s12386_s18 + $0x28] sm:$0xff] %vm3628_vm3, %v7297_v43  ;;  %v8945_v44 = vadd.f32 %v8944_v34, %v7126_v23  ;;  %v8958_v6 = vadd.f32 %v8957_v29, %v12362_v3  ;;  %v8662_v53 = vpop.f32.mrb[220].mxu1 }
 0x3ce   : > { %v7270_v11 = vadd.f32 %v8938_v63, %v12374_v42  ;;  %v8952_v19 = vadd.f32 %v8951_v49, %v8693_v59  ;;  %v6871_v37 = vmul.f32 %v8662_v53, %v13189_v48  ;;  %v8696_v27 = vpop.f32.mrb[156].mxu0  ;;  %v6778_v16 = vpop.f32.mrb[221].mxu1  ;;  %v13193_v63 = vld [vmem:[#allocation68_spill] sm:$0xff] }
 0x3cf   : > { %v7268_v12 = vadd.f32 %v8945_v44, %v12374_v42  ;;  %v8959_v2 = vadd.f32 %v8958_v6, %v7129_v52  ;;  %v6869_v26 = vmul.f32 %v6778_v16, %v13190_v28  ;;  %v7142_v13 = vpop.f32.mrb[157].mxu0  ;;  %v8663_v9 = vpop.f32.mrb[222].mxu1 }
 0x3d0   : > { %v7302_v7 = vmax.f32 %v7270_v11, 0.0  ;;  %v7271_v18 = vadd.f32 %v8952_v19, %v12374_v42  ;;  %v8964_v23 = vadd.f32 %v12281_v54, %v6871_v37  ;;  %v6872_v38 = vmul.f32 %v8663_v9, %v13191_v60  ;;  %v8697_v36 = vpop.f32.mrb[158].mxu0  ;;  %v6781_v41 = vpop.f32.mrb[223].mxu1  ;;  %v13194_v11 = vld [vmem:[#allocation60_spill] sm:$0xff] }
 0x3d1   : > { %v7300_v1 = vmax.f32 %v7268_v12, 0.0  ;;  %v7269_v31 = vadd.f32 %v8959_v2, %v12374_v42  ;;  %v8971_v59 = vadd.f32 %v12285_v30, %v6869_v26  ;;  %v6870_v20 = vmul.f32 %v6781_v41, %v13192_v47  ;;  %v7145_v39 = vpop.f32.mrb[159].mxu0  ;;  %v13195_v2 = vld [vmem:[#allocation56_spill] sm:$0xff] }
 0x3d2   : > { %7334 = vst.msk [vmem:[%s12386_s18 + $0x50] sm:$0xff] %vm3628_vm3, %v7302_v7  ;;  %v7303_v5 = vmax.f32 %v7271_v18, 0.0  ;;  %v8965_v32 = vadd.f32 %v8964_v23, %v12362_v3  ;;  %v8978_v54 = vadd.f32 %v12289_v56, %v6872_v38  ;;  %v13196_v23 = vld [vmem:[#allocation53_spill] sm:$0xff] }
 0x3d3   : > { %7332 = vst.msk [vmem:[%s12386_s18 + $0x40] sm:$0xff] %vm3628_vm3, %v7300_v1  ;;  %v7301_v51 = vmax.f32 %v7269_v31, 0.0  ;;  %v8972_v52 = vadd.f32 %v8971_v59, %v12362_v3  ;;  %v8985_v55 = vadd.f32 %v12292_v14, %v6870_v20 }
 0x3d4   : > { %7335 = vst.msk [vmem:[%s12386_s18 + $0x58] sm:$0xff] %vm3628_vm3, %v7303_v5  ;;  %v8966_v30 = vadd.f32 %v8965_v32, %v8696_v27  ;;  %v8979_v58 = vadd.f32 %v8978_v54, %v12362_v3  ;;  %v13197_v54 = vld [vmem:[#allocation49_spill] sm:$0xff] }
 0x3d5   : > { %7333 = vst.msk [vmem:[%s12386_s18 + $0x48] sm:$0xff] %vm3628_vm3, %v7301_v51  ;;  %v8973_v15 = vadd.f32 %v8972_v52, %v7142_v13  ;;  %v8986_v43 = vadd.f32 %v8985_v55, %v12362_v3  ;;  %v8666_v34 = vpop.f32.mrb[224].mxu1 }
 0x3d6   : > { %v7274_v56 = vadd.f32 %v8966_v30, %v12374_v42  ;;  %v8980_v29 = vadd.f32 %v8979_v58, %v8697_v36  ;;  %v6875_v49 = vmul.f32 %v8666_v34, %v13193_v63  ;;  %v8700_v44 = vpop.f32.mrb[160].mxu0  ;;  %v6794_v6 = vpop.f32.mrb[225].mxu1  ;;  %v13198_v58 = vld [vmem:[#allocation31_spill] sm:$0xff] }
 0x3d7   : > { %v7272_v14 = vadd.f32 %v8973_v15, %v12374_v42  ;;  %v8987_v53 = vadd.f32 %v8986_v43, %v7145_v39  ;;  %v6873_v19 = vmul.f32 %v6794_v6, %v13194_v11  ;;  %v7158_v48 = vpop.f32.mrb[161].mxu0  ;;  %v8667_v37 = vpop.f32.mrb[226].mxu1 }
 0x3d8   : > { %v7306_v27 = vmax.f32 %v7274_v56, 0.0  ;;  %v7275_v16 = vadd.f32 %v8980_v29, %v12374_v42  ;;  %v8992_v12 = vadd.f32 %v12297_v24, %v6875_v49  ;;  %v6876_v28 = vmul.f32 %v8667_v37, %v13195_v2  ;;  %v8701_v26 = vpop.f32.mrb[162].mxu0  ;;  %v6797_v13 = vpop.f32.mrb[227].mxu1  ;;  %v13199_v49 = vld [vmem:[#allocation64_spill] sm:$0xff] }
 0x3d9   : > { %v7304_v9 = vmax.f32 %v7272_v14, 0.0  ;;  %v7273_v7 = vadd.f32 %v8987_v53, %v12374_v42  ;;  %v8999_v18 = vadd.f32 %v12301_v10, %v6873_v19  ;;  %v6874_v60 = vmul.f32 %v6797_v13, %v13196_v23  ;;  %v7161_v38 = vpop.f32.mrb[163].mxu0 }
 0x3da   : > { %7338 = vst.msk [vmem:[%s12386_s18 + $0x70] sm:$0xff] %vm3628_vm3, %v7306_v27  ;;  %v7307_v36 = vmax.f32 %v7275_v16, 0.0  ;;  %v8993_v41 = vadd.f32 %v8992_v12, %v12362_v3  ;;  %v9006_v24 = vadd.f32 %v12305_v4, %v6876_v28 }
 0x3db   : > { %7336 = vst.msk [vmem:[%s12386_s18 + $0x60] sm:$0xff] %vm3628_vm3, %v7304_v9  ;;  %v7305_v1 = vmax.f32 %v7273_v7, 0.0  ;;  %v9000_v31 = vadd.f32 %v8999_v18, %v12362_v3  ;;  %v9013_v59 = vadd.f32 %v12308_v35, %v6874_v60  ;;  %v13201_v60 = vld [vmem:[#allocation23_spill] sm:$0xff] }
 0x3dc   : > { %7339 = vst.msk [vmem:[%s12386_s18 + $0x78] sm:$0xff] %vm3628_vm3, %v7307_v36  ;;  %v8994_v10 = vadd.f32 %v8993_v41, %v8700_v44  ;;  %v9007_v47 = vadd.f32 %v9006_v24, %v12362_v3 }
 0x3dd   : > { %7337 = vst.msk [vmem:[%s12386_s18 + $0x68] sm:$0xff] %vm3628_vm3, %v7305_v1  ;;  %v9001_v20 = vadd.f32 %v9000_v31, %v7158_v48  ;;  %v9014_v39 = vadd.f32 %v9013_v59, %v12362_v3  ;;  %v8670_v5 = vpop.f32.mrb[228].mxu1  ;;  %v13200_v48 = vld [vmem:[#allocation63_spill] sm:$0xff] }
 0x3de   : > { %v7278_v4 = vadd.f32 %v8994_v10, %v12374_v42  ;;  %v9008_v32 = vadd.f32 %v9007_v47, %v8701_v26  ;;  %v6879_v51 = vmul.f32 %v8670_v5, %v13197_v54  ;;  %v8704_v52 = vpop.f32.mrb[164].mxu0  ;;  %v6810_v55 = vpop.f32.mrb[229].mxu1  ;;  %v13202_v1 = vld [vmem:[#allocation7_spill] sm:$0xff] }
 0x3df   : > { %v7276_v35 = vadd.f32 %v9001_v20, %v12374_v42  ;;  %v9015_v30 = vadd.f32 %v9014_v39, %v7161_v38  ;;  %v6877_v15 = vmul.f32 %v6810_v55, %v13198_v58  ;;  %v7174_v43 = vpop.f32.mrb[165].mxu0  ;;  %v8671_v34 = vpop.f32.mrb[230].mxu1 }
 0x3e0   : > { %v7310_v56 = vmax.f32 %v7278_v4, 0.0  ;;  %v7279_v29 = vadd.f32 %v9008_v32, %v12374_v42  ;;  %v9020_v63 = vadd.f32 %v12313_v8, %v6879_v51  ;;  %v6880_v44 = vmul.f32 %v8671_v34, %v13199_v49  ;;  %v8705_v6 = vpop.f32.mrb[166].mxu0  ;;  %v6813_v14 = vpop.f32.mrb[231].mxu1  ;;  %v13203_v49 = vld [vmem:[#allocation6_spill] sm:$0xff] }
 0x3e1   : > { %v7308_v53 = vmax.f32 %v7276_v35, 0.0  ;;  %v7277_v11 = vadd.f32 %v9015_v30, %v12374_v42  ;;  %v9027_v19 = vadd.f32 %v12317_v62, %v6877_v15  ;;  %v6878_v37 = vmul.f32 %v6813_v14, %v13200_v48  ;;  %v7177_v27 = vpop.f32.mrb[167].mxu0 }
 0x3e2   : > { %7342 = vst.msk [vmem:[%s12386_s18 + $0x90] sm:$0xff] %vm3628_vm3, %v7310_v56  ;;  %v7311_v16 = vmax.f32 %v7279_v29, 0.0  ;;  %v9021_v12 = vadd.f32 %v9020_v63, %v12362_v3  ;;  %v9034_v8 = vadd.f32 %v12321_v45, %v6880_v44 }
 0x3e3   : > { %7340 = vst.msk [vmem:[%s12386_s18 + $0x80] sm:$0xff] %vm3628_vm3, %v7308_v53  ;;  %v7309_v2 = vmax.f32 %v7277_v11, 0.0  ;;  %v9028_v28 = vadd.f32 %v9027_v19, %v12362_v3  ;;  %v9041_v26 = vadd.f32 %v12324_v21, %v6878_v37  ;;  %v13204_v11 = vld [vmem:[#allocation15_spill] sm:$0xff] }
 0x3e4   : > { %7343 = vst.msk [vmem:[%s12386_s18 + $0x98] sm:$0xff] %vm3628_vm3, %v7311_v16  ;;  %v9022_v62 = vadd.f32 %v9021_v12, %v8704_v52  ;;  %v9035_v13 = vadd.f32 %v9034_v8, %v12362_v3  ;;  %v13205_v8 = vld [vmem:[#allocation10_spill] sm:$0xff] }
 0x3e5   : > { %7341 = vst.msk [vmem:[%s12386_s18 + $0x88] sm:$0xff] %vm3628_vm3, %v7309_v2  ;;  %v9029_v9 = vadd.f32 %v9028_v28, %v7174_v43  ;;  %v9042_v7 = vadd.f32 %v9041_v26, %v12362_v3  ;;  %v8674_v18 = vpop.f32.mrb[232].mxu1 }
 0x3e6   : > { %v7282_v45 = vadd.f32 %v9022_v62, %v12374_v42  ;;  %v9036_v23 = vadd.f32 %v9035_v13, %v8705_v6  ;;  %v6883_v38 = vmul.f32 %v8674_v18, %v13201_v60  ;;  %v8708_v36 = vpop.f32.mrb[168].mxu0  ;;  %v6826_v41 = vpop.f32.mrb[233].mxu1 }
 0x3e7   : > { %v7280_v21 = vadd.f32 %v9029_v9, %v12374_v42  ;;  %v9043_v24 = vadd.f32 %v9042_v7, %v7177_v27  ;;  %v6881_v31 = vmul.f32 %v6826_v41, %v13202_v1  ;;  %v7190_v59 = vpop.f32.mrb[169].mxu0  ;;  %v8675_v10 = vpop.f32.mrb[234].mxu1  ;;  %v13206_v7 = vld [vmem:[#allocation28_spill] sm:$0xff] }
 0x3e8   : > { %v7314_v47 = vmax.f32 %v7282_v45, 0.0  ;;  %v7283_v20 = vadd.f32 %v9036_v23, %v12374_v42  ;;  %v9048_v39 = vadd.f32 %v12329_v46, %v6883_v38  ;;  %v6884_v5 = vmul.f32 %v8675_v10, %v12014_v0  ;;  %v8709_v4 = vpop.f32.mrb[170].mxu0  ;;  %v6829_v32 = vpop.f32.mrb[235].mxu1 }
 0x3e9   : > { %v7312_v54 = vmax.f32 %v7280_v21, 0.0  ;;  %v7281_v51 = vadd.f32 %v9043_v24, %v12374_v42  ;;  %v9055_v52 = vadd.f32 %v12333_v50, %v6881_v31  ;;  %v6882_v55 = vmul.f32 %v6829_v32, %v13153_v17  ;;  %v7193_v35 = vpop.f32.mrb[171].mxu0 }
 0x3ea   : > { %7346 = vst.msk [vmem:[%s12386_s18 + $0xb0] sm:$0xff] %vm3628_vm3, %v7314_v47  ;;  %v7315_v30 = vmax.f32 %v7283_v20, 0.0  ;;  %v9049_v58 = vadd.f32 %v9048_v39, %v12362_v3  ;;  %v9062_v46 = vadd.f32 %v12337_v25, %v6884_v5 }
 0x3eb   : > { %7344 = vst.msk [vmem:[%s12386_s18 + $0xa0] sm:$0xff] %vm3628_vm3, %v7312_v54  ;;  %v7313_v0 = vmax.f32 %v7281_v51, 0.0  ;;  %v9056_v15 = vadd.f32 %v9055_v52, %v12362_v3  ;;  %v9069_v43 = vadd.f32 %v12340_v22, %v6882_v55 }
 0x3ec   : > { %7347 = vst.msk [vmem:[%s12386_s18 + $0xb8] sm:$0xff] %vm3628_vm3, %v7315_v30  ;;  %v9050_v50 = vadd.f32 %v9049_v58, %v8708_v36  ;;  %v9063_v17 = vadd.f32 %v9062_v46, %v12362_v3 }
 0x3ed   : > { %7345 = vst.msk [vmem:[%s12386_s18 + $0xa8] sm:$0xff] %vm3628_vm3, %v7313_v0  ;;  %v9057_v34 = vadd.f32 %v9056_v15, %v7190_v59  ;;  %v9070_v56 = vadd.f32 %v9069_v43, %v12362_v3  ;;  %v8678_v29 = vpop.f32.mrb[236].mxu1 }
 0x3ee   : > { %v7286_v25 = vadd.f32 %v9050_v50, %v12374_v42  ;;  %v9064_v63 = vadd.f32 %v9063_v17, %v8709_v4  ;;  %v6887_v44 = vmul.f32 %v8678_v29, %v13203_v49  ;;  %v8712_v6 = vpop.f32.mrb[172].mxu0  ;;  %v6842_v14 = vpop.f32.mrb[237].mxu1 }
 0x3ef   : > { %v7284_v22 = vadd.f32 %v9057_v34, %v12374_v42  ;;  %v9071_v53 = vadd.f32 %v9070_v56, %v7193_v35  ;;  %v6885_v19 = vmul.f32 %v6842_v14, %v13204_v11  ;;  %v7206_v48 = vpop.f32.mrb[173].mxu0  ;;  %v8679_v37 = vpop.f32.mrb[238].mxu1 }
 0x3f0   : > { %v7318_v27 = vmax.f32 %v7286_v25, 0.0  ;;  %v7287_v16 = vadd.f32 %v9064_v63, %v12374_v42  ;;  %v9076_v12 = vadd.f32 %v12345_v61, %v6887_v44  ;;  %v6888_v2 = vmul.f32 %v8679_v37, %v13205_v8  ;;  %v8713_v28 = vpop.f32.mrb[174].mxu0  ;;  %v6845_v26 = vpop.f32.mrb[239].mxu1 }
 0x3f1   : > { %v7316_v62 = vmax.f32 %v7284_v22, 0.0  ;;  %v7285_v13 = vadd.f32 %v9071_v53, %v12374_v42  ;;  %v9083_v9 = vadd.f32 %v12349_v57, %v6885_v19  ;;  %v6886_v18 = vmul.f32 %v6845_v26, %v13206_v7  ;;  %v7209_v45 = vpop.f32.mrb[175].mxu0 }
 0x3f2   : > { %7350 = vst.msk [vmem:[%s12386_s18 + $0xd0] sm:$0xff] %vm3628_vm3, %v7318_v27  ;;  %v7319_v23 = vmax.f32 %v7287_v16, 0.0  ;;  %v9077_v60 = vadd.f32 %v9076_v12, %v12362_v3  ;;  %v9090_v61 = vadd.f32 %v12353_v40, %v6888_v2 }
 0x3f3   : > { %7348 = vst.msk [vmem:[%s12386_s18 + $0xc0] sm:$0xff] %vm3628_vm3, %v7316_v62  ;;  %v7317_v38 = vmax.f32 %v7285_v13, 0.0  ;;  %v9084_v36 = vadd.f32 %v9083_v9, %v12362_v3  ;;  %v9097_v41 = vadd.f32 %v12356_v33, %v6886_v18 }
 0x3f4   : > { %7351 = vst.msk [vmem:[%s12386_s18 + $0xd8] sm:$0xff] %vm3628_vm3, %v7319_v23  ;;  %v9078_v57 = vadd.f32 %v9077_v60, %v8712_v6  ;;  %v9091_v21 = vadd.f32 %v9090_v61, %v12362_v3 }
 0x3f5   : > { %7349 = vst.msk [vmem:[%s12386_s18 + $0xc8] sm:$0xff] %vm3628_vm3, %v7317_v38  ;;  %v9085_v24 = vadd.f32 %v9084_v36, %v7206_v48  ;;  %v9098_v40 = vadd.f32 %v9097_v41, %v12362_v3 }
 0x3f6   : > { %v7290_v1 = vadd.f32 %v9078_v57, %v12374_v42  ;;  %v9092_v31 = vadd.f32 %v9091_v21, %v8713_v28 }
 0x3f7   : > { %v7288_v59 = vadd.f32 %v9085_v24, %v12374_v42  ;;  %v9099_v10 = vadd.f32 %v9098_v40, %v7209_v45 }
 0x3f8   : > { %v7322_v33 = vmax.f32 %v7290_v1, 0.0  ;;  %v7291_v47 = vadd.f32 %v9092_v31, %v12374_v42 }
 0x3f9   : > { %v7320_v20 = vmax.f32 %v7288_v59, 0.0  ;;  %v7289_v39 = vadd.f32 %v9099_v10, %v12374_v42 }
 0x3fa   : > { %7354 = vst.msk [vmem:[%s12386_s18 + $0xf0] sm:$0xff] %vm3628_vm3, %v7322_v33  ;;  %v7323_v5 = vmax.f32 %v7291_v47, 0.0 }
 0x3fb   : > { %7352 = vst.msk [vmem:[%s12386_s18 + $0xe0] sm:$0xff] %vm3628_vm3, %v7320_v20  ;;  %v7321_v4 = vmax.f32 %v7289_v39, 0.0 }
 0x3fc   : > { %7355 = vst.msk [vmem:[%s12386_s18 + $0xf8] sm:$0xff] %vm3628_vm3, %v7323_v5 }
 0x3fd   : > { %7353 = vst.msk [vmem:[%s12386_s18 + $0xe8] sm:$0xff] %vm3628_vm3, %v7321_v4 }
 0x3fe PF: > { %s19_s30 = sadd.s32 1, %s9299_s30  }
 0x3ff   : > { %p16_p4 = scmp.ge.s32.totalorder %s19_s30, 4  }
 0x401   :  { %18 = sbr.rel (!%p16_p4) target bundleno = 1 (0x1), region = 102 }

</bundles_post_ra>
